<compile_context>
chip_gen: v5e
topology: v5e:2x2
jax: 0.10.0
libtpu: 0.0.40
codegen_flags: <defaults>
</compile_context>

<pallas_src>
import jax
import jax.numpy as jnp
from jax.experimental import pallas as pl

# ---------------- tiny synthetic "bert-base" config ----------------
VOCAB = 50        # synthetic vocab
MAX_POS = 16      # max position embeddings
SEQ = 8           # padded sequence length (<= 256 in the reference)
HIDDEN = 32       # text_fea_dim (768 in real BERT) - small for the demo
N_HEADS = 4
HEAD_DIM = HIDDEN // N_HEADS
FFN = 64
N_LAYERS = 2
PROJ_DIM = 16     # proj_fea_dim
BATCH = 2
LN_EPS = 1e-12
H3 = 3 * HIDDEN   # fused QKV output width
N_LVEC = 8        # packed per-layer 1-D params (rows)
N_GVEC = 6        # packed global 1-D params (rows)


def _ln(x, g, b, eps=LN_EPS):
    mu = jnp.mean(x, axis=-1, keepdims=True)
    var = jnp.mean((x - mu) ** 2, axis=-1, keepdims=True)
    return (x - mu) * jax.lax.rsqrt(var + eps) * g + b


# ---------------- single fused kernel: whole TextEncoder forward ----------------
def text_encoder_kernel(x_ref, mask_ref, wqkv_ref, wo_ref, wf1_ref, wf2_ref,
                        lvec_ref, gvec_ref, poolw_ref, projw_ref, o_ref):
    gv = gvec_ref[...]                                   # (N_GVEC, H) packed globals
    # embeddings LayerNorm on the flattened [B*S, H] activations
    x = _ln(x_ref[...], gv[0:1, :], gv[1:2, :])

    scale = 1.0 / (HEAD_DIM ** 0.5)

    # Static unroll over the (two) encoder layers; layer weights arrive as
    # stacked (N_LAYERS, ...) arrays so leading-dim indexing is free.
    # TODO(synk): at real BERT depth/width, iterate layers via a grid axis
    # marked "arbitrary" and stream per-layer weights (Buffered(1)/bf16)
    # instead of keeping them all resident (v7x VMEM = 64 MiB).
    for li in range(N_LAYERS):
        wqkv = wqkv_ref[li]                              # (H, 3H)  = [Wq | Wk | Wv]
        wo = wo_ref[li]                                  # (H, H)
        lv = lvec_ref[li]                                # (N_LVEC, 3H) packed vectors

        # fused QKV projection: ONE matmul over all batch*seq rows
        qkv = jnp.dot(x, wqkv, preferred_element_type=jnp.float32) + lv[0:1, :]

        # attention is per-batch because of the padding mask
        attn_rows = []
        for b in range(BATCH):
            add_mask = mask_ref[b]                       # (1, S) additive mask
            rows = slice(b * SEQ, (b + 1) * SEQ)         # sublane row slice (free)
            attn_b = lv[1:2, :HIDDEN]                    # Wo bias; broadcasts to (S, H)
            for h in range(N_HEADS):
                # NOTE: 8-wide lane-offset head slices lower to a few XLU
                # selects; the XLU slot is idle here so this is free filler at
                # toy sizes.  At real head_dim (64/128) these become
                # tile-aligned (or pre-split per-head weights in the wrapper).
                cq = slice(h * HEAD_DIM, (h + 1) * HEAD_DIM)
                ck = slice(HIDDEN + h * HEAD_DIM, HIDDEN + (h + 1) * HEAD_DIM)
                cv = slice(2 * HIDDEN + h * HEAD_DIM, 2 * HIDDEN + (h + 1) * HEAD_DIM)
                qh = qkv[rows, cq]
                kh = qkv[rows, ck]
                vh = qkv[rows, cv]
                s = jnp.dot(qh, kh.T, preferred_element_type=jnp.float32) * scale
                s = s + add_mask
                s = s - jnp.max(s, axis=-1, keepdims=True)
                p = jnp.exp(s)
                p = p / jnp.sum(p, axis=-1, keepdims=True)
                ctx = jnp.dot(p, vh, preferred_element_type=jnp.float32)    # (S, dh)
                # concat-over-heads @ Wo  ==  sum_h ctx_h @ Wo[h*dh:(h+1)*dh, :]
                attn_b = attn_b + jnp.dot(
                    ctx, wo[h * HEAD_DIM:(h + 1) * HEAD_DIM, :],
                    preferred_element_type=jnp.float32)
            attn_rows.append(attn_b)                     # (S, H)
        attn = jnp.concatenate(attn_rows, axis=0)        # (B*S, H)

        h1 = _ln(x + attn, lv[2:3, :HIDDEN], lv[3:4, :HIDDEN])
        ff = jnp.dot(h1, wf1_ref[li], preferred_element_type=jnp.float32) + lv[4:5, :FFN]
        # TODO(synk): HF BERT uses exact erf-GELU; tanh approximation used here.
        ff = jax.nn.gelu(ff, approximate=True)
        ff = jnp.dot(ff, wf2_ref[li], preferred_element_type=jnp.float32) + lv[5:6, :HIDDEN]
        x = _ln(h1 + ff, lv[6:7, :HIDDEN], lv[7:8, :HIDDEN])

    # pooler (tanh dense on CLS) + FeatureProjector, fused into the same kernel.
    # CLS tokens are rows b*S of the flattened activations (sublane slices).
    cls = jnp.concatenate([x[b * SEQ:b * SEQ + 1, :] for b in range(BATCH)], axis=0)
    pooled = jnp.tanh(
        jnp.dot(cls, poolw_ref[...], preferred_element_type=jnp.float32) + gv[2:3, :])
    # TODO(synk): exact FeatureProjector definition not in the reference source;
    # implemented as Linear -> (dropout = identity in eval) -> LayerNorm.
    proj = (jnp.dot(pooled, projw_ref[...], preferred_element_type=jnp.float32)
            + gv[3:4, :PROJ_DIM])
    # Only this tiny (B, PROJ_DIM) store is lane-masked (<128 lanes); everything
    # else stays in VMEM/vregs thanks to the full fusion.
    o_ref[...] = _ln(proj, gv[4:5, :PROJ_DIM], gv[5:6, :PROJ_DIM])


# ---------------- parameters (pre-packed for minimal DMA descriptors) ----------------
def _row(v, width):
    v = jnp.asarray(v, jnp.float32).reshape(1, -1)
    return jnp.pad(v, ((0, 0), (0, width - v.shape[1])))


def init_params(key):
    def nrm(k, shape, scale=0.02):
        return scale * jax.random.normal(k, shape, dtype=jnp.float32)

    keys = iter(jax.random.split(key, 8 + 6 * N_LAYERS))
    word_emb = nrm(next(keys), (VOCAB, HIDDEN))
    pos_emb = nrm(next(keys), (MAX_POS, HIDDEN))
    type_emb = nrm(next(keys), (2, HIDDEN))
    pool_w = nrm(next(keys), (HIDDEN, HIDDEN))
    proj_w = nrm(next(keys), (HIDDEN, PROJ_DIM))

    # packed global 1-D params (one (N_GVEC, H) array -> one DMA):
    #   0 emb LN gamma, 1 emb LN beta, 2 pooler bias,
    #   3 proj bias, 4 proj LN gamma, 5 proj LN beta (PROJ rows zero-padded)
    gvecs = jnp.concatenate([
        _row(jnp.ones(HIDDEN), HIDDEN),
        _row(jnp.zeros(HIDDEN), HIDDEN),
        _row(jnp.zeros(HIDDEN), HIDDEN),
        _row(jnp.zeros(PROJ_DIM), HIDDEN),
        _row(jnp.ones(PROJ_DIM), HIDDEN),
        _row(jnp.zeros(PROJ_DIM), HIDDEN),
    ], axis=0)

    w_qkv, w_o, w_f1, w_f2, lvecs = [], [], [], [], []
    for _ in range(N_LAYERS):
        wq = nrm(next(keys), (HIDDEN, HIDDEN))
        wk = nrm(next(keys), (HIDDEN, HIDDEN))
        wv = nrm(next(keys), (HIDDEN, HIDDEN))
        w_qkv.append(jnp.concatenate([wq, wk, wv], axis=1))        # (H, 3H) fused QKV
        w_o.append(nrm(next(keys), (HIDDEN, HIDDEN)))
        w_f1.append(nrm(next(keys), (HIDDEN, FFN)))
        w_f2.append(nrm(next(keys), (FFN, HIDDEN)))
        # packed per-layer 1-D params, all in one (N_LVEC, 3H) slab:
        #   0 [bq|bk|bv], 1 bo, 2 LN1 gamma, 3 LN1 beta,
        #   4 bf1, 5 bf2, 6 LN2 gamma, 7 LN2 beta   (zero-padded to 3H)
        lvecs.append(jnp.concatenate([
            _row(jnp.zeros(H3), H3),
            _row(jnp.zeros(HIDDEN), H3),
            _row(jnp.ones(HIDDEN), H3),
            _row(jnp.zeros(HIDDEN), H3),
            _row(jnp.zeros(FFN), H3),
            _row(jnp.zeros(HIDDEN), H3),
            _row(jnp.ones(HIDDEN), H3),
            _row(jnp.zeros(HIDDEN), H3),
        ], axis=0))

    return {
        "word_emb": word_emb, "pos_emb": pos_emb, "type_emb": type_emb,
        "w_qkv": jnp.stack(w_qkv),    # (N_LAYERS, H, 3H)
        "w_o": jnp.stack(w_o),        # (N_LAYERS, H, H)
        "w_f1": jnp.stack(w_f1),      # (N_LAYERS, H, FFN)
        "w_f2": jnp.stack(w_f2),      # (N_LAYERS, FFN, H)
        "lvecs": jnp.stack(lvecs),    # (N_LAYERS, N_LVEC, 3H)
        "gvecs": gvecs,               # (N_GVEC, H)
        "pool_w": pool_w, "proj_w": proj_w,
    }


# ---------------- forward (TextEncoder.forward equivalent) ----------------
@jax.jit
def text_encoder_forward(token_ids, attn_mask, p):
    # TODO(synk): BertTokenizer (string -> ids) has no Pallas equivalent; the
    # wrapper takes already-tokenized ids + attention mask.
    B, S = token_ids.shape
    # Embedding gather stays in plain JAX (data-dependent gather glue); its
    # LayerNorm and everything downstream run inside the single fused kernel.
    emb = (jnp.take(p["word_emb"], token_ids, axis=0)
           + p["pos_emb"][None, :S, :]
           + p["type_emb"][0][None, None, :])
    x2 = emb.reshape(B * S, HIDDEN).astype(jnp.float32)           # flattened [B*S, H]
    mask_add = ((1.0 - attn_mask) * -1e9).astype(jnp.float32).reshape(B, 1, S)

    # One pallas_call, no grid: every operand is a single whole-array VMEM
    # block (one DMA each), so there are no per-layer launches, no per-batch
    # grid steps, and no HBM round-trips of activations between layers.
    return pl.pallas_call(
        text_encoder_kernel,
        out_shape=jax.ShapeDtypeStruct((B, PROJ_DIM), jnp.float32),
    )(x2, mask_add, p["w_qkv"], p["w_o"], p["w_f1"], p["w_f2"],
      p["lvecs"], p["gvecs"], p["pool_w"], p["proj_w"])


if __name__ == "__main__":
    key = jax.random.PRNGKey(0)
    k_ids, k_param = jax.random.split(key)
    token_ids = jax.random.randint(k_ids, (BATCH, SEQ), 0, VOCAB, dtype=jnp.int32)
    # first sequence fully valid, second padded after 6 tokens
    attn_mask = jnp.array([[1, 1, 1, 1, 1, 1, 1, 1],
                           [1, 1, 1, 1, 1, 1, 0, 0]], dtype=jnp.float32)
    params = init_params(k_param)

    out = text_encoder_forward(token_ids, attn_mask, params)
    jax.block_until_ready(out)
    assert out.shape == (BATCH, PROJ_DIM) and out.dtype == jnp.float32
    print("KERNEL_OK")
</pallas_src>

<mosaic_0001>
module attributes {stable_mosaic.version = 11 : i64} {
  func.func @text_encoder_kernel(%arg0: memref<16x32xf32, #tpu.memory_space<vmem>>, %arg1: memref<2x1x8xf32, #tpu.memory_space<vmem>>, %arg2: memref<2x32x96xf32, #tpu.memory_space<vmem>>, %arg3: memref<2x32x32xf32, #tpu.memory_space<vmem>>, %arg4: memref<2x32x64xf32, #tpu.memory_space<vmem>>, %arg5: memref<2x64x32xf32, #tpu.memory_space<vmem>>, %arg6: memref<2x8x96xf32, #tpu.memory_space<vmem>>, %arg7: memref<6x32xf32, #tpu.memory_space<vmem>>, %arg8: memref<32x32xf32, #tpu.memory_space<vmem>>, %arg9: memref<32x16xf32, #tpu.memory_space<vmem>>, %arg10: memref<2x16xf32, #tpu.memory_space<vmem>>) attributes {dimension_semantics = [], scalar_prefetch = 0 : i64, scratch_operands = 0 : i64, tpu.core_type = #tpu.core_type<tc>} {
    %c0 = arith.constant 0 : index
    %c0_0 = arith.constant 0 : index
    %0 = vector.load %arg7[%c0, %c0_0] : memref<6x32xf32, #tpu.memory_space<vmem>>, vector<6x32xf32>
    %c0_1 = arith.constant 0 : index
    %c0_2 = arith.constant 0 : index
    %1 = vector.load %arg0[%c0_1, %c0_2] : memref<16x32xf32, #tpu.memory_space<vmem>>, vector<16x32xf32>
    %2 = vector.extract_strided_slice %0 {offsets = [0, 0], sizes = [1, 32], strides = [1, 1]} : vector<6x32xf32> to vector<1x32xf32>
    %3 = vector.extract_strided_slice %0 {offsets = [1, 0], sizes = [1, 32], strides = [1, 1]} : vector<6x32xf32> to vector<1x32xf32>
    %cst = arith.constant dense<0.000000e+00> : vector<16xf32>
    %4 = vector.multi_reduction <add>, %1, %cst [1] : vector<16x32xf32> to vector<16xf32>
    %5 = vector.shape_cast %4 : vector<16xf32> to vector<16x1xf32>
    %cst_3 = arith.constant 3.200000e+01 : f32
    %6 = vector.broadcast %cst_3 : f32 to vector<16x1xf32>
    %7 = arith.divf %5, %6 : vector<16x1xf32>
    %8 = vector.broadcast %7 : vector<16x1xf32> to vector<16x32xf32>
    %9 = arith.subf %1, %8 : vector<16x32xf32>
    %10 = arith.mulf %9, %9 : vector<16x32xf32>
    %cst_4 = arith.constant dense<0.000000e+00> : vector<16xf32>
    %11 = vector.multi_reduction <add>, %10, %cst_4 [1] : vector<16x32xf32> to vector<16xf32>
    %12 = vector.shape_cast %11 : vector<16xf32> to vector<16x1xf32>
    %cst_5 = arith.constant 3.200000e+01 : f32
    %13 = vector.broadcast %cst_5 : f32 to vector<16x1xf32>
    %14 = arith.divf %12, %13 : vector<16x1xf32>
    %15 = vector.broadcast %7 : vector<16x1xf32> to vector<16x32xf32>
    %16 = arith.subf %1, %15 : vector<16x32xf32>
    %cst_6 = arith.constant 9.99999996E-13 : f32
    %17 = vector.broadcast %cst_6 : f32 to vector<16x1xf32>
    %18 = arith.addf %14, %17 : vector<16x1xf32>
    %19 = math.rsqrt %18 : vector<16x1xf32>
    %20 = vector.broadcast %19 : vector<16x1xf32> to vector<16x32xf32>
    %21 = arith.mulf %16, %20 : vector<16x32xf32>
    %22 = vector.broadcast %2 : vector<1x32xf32> to vector<16x32xf32>
    %23 = arith.mulf %21, %22 : vector<16x32xf32>
    %24 = vector.broadcast %3 : vector<1x32xf32> to vector<16x32xf32>
    %25 = arith.addf %23, %24 : vector<16x32xf32>
    %c0_7 = arith.constant 0 : index
    %c0_8 = arith.constant 0 : index
    %c0_9 = arith.constant 0 : index
    %26 = vector.load %arg2[%c0_7, %c0_8, %c0_9] : memref<2x32x96xf32, #tpu.memory_space<vmem>>, vector<1x32x96xf32>
    %27 = vector.shape_cast %26 : vector<1x32x96xf32> to vector<32x96xf32>
    %c0_10 = arith.constant 0 : index
    %c0_11 = arith.constant 0 : index
    %c0_12 = arith.constant 0 : index
    %28 = vector.load %arg3[%c0_10, %c0_11, %c0_12] : memref<2x32x32xf32, #tpu.memory_space<vmem>>, vector<1x32x32xf32>
    %29 = vector.shape_cast %28 : vector<1x32x32xf32> to vector<32x32xf32>
    %c0_13 = arith.constant 0 : index
    %c0_14 = arith.constant 0 : index
    %c0_15 = arith.constant 0 : index
    %30 = vector.load %arg6[%c0_13, %c0_14, %c0_15] : memref<2x8x96xf32, #tpu.memory_space<vmem>>, vector<1x8x96xf32>
    %31 = vector.shape_cast %30 : vector<1x8x96xf32> to vector<8x96xf32>
    %cst_16 = arith.constant dense<0.000000e+00> : vector<16x96xf32>
    %32 = tpu.matmul %25, %27, %cst_16 {dimension_numbers = #tpu.dot_dimension_numbers<[1], [0], [0], [1], [0, 0, 1, 1], [], []>} : vector<16x32xf32>, vector<32x96xf32>, vector<16x96xf32> -> vector<16x96xf32>
    %33 = vector.extract_strided_slice %31 {offsets = [0, 0], sizes = [1, 96], strides = [1, 1]} : vector<8x96xf32> to vector<1x96xf32>
    %34 = vector.broadcast %33 : vector<1x96xf32> to vector<16x96xf32>
    %35 = arith.addf %32, %34 : vector<16x96xf32>
    %c0_17 = arith.constant 0 : index
    %c0_18 = arith.constant 0 : index
    %c0_19 = arith.constant 0 : index
    %36 = vector.load %arg1[%c0_17, %c0_18, %c0_19] : memref<2x1x8xf32, #tpu.memory_space<vmem>>, vector<1x1x8xf32>
    %37 = vector.shape_cast %36 : vector<1x1x8xf32> to vector<1x8xf32>
    %38 = vector.extract_strided_slice %31 {offsets = [1, 0], sizes = [1, 32], strides = [1, 1]} : vector<8x96xf32> to vector<1x32xf32>
    %39 = vector.extract_strided_slice %35 {offsets = [0, 0], sizes = [8, 8], strides = [1, 1]} : vector<16x96xf32> to vector<8x8xf32>
    %40 = vector.extract_strided_slice %35 {offsets = [0, 32], sizes = [8, 8], strides = [1, 1]} : vector<16x96xf32> to vector<8x8xf32>
    %41 = vector.extract_strided_slice %35 {offsets = [0, 64], sizes = [8, 8], strides = [1, 1]} : vector<16x96xf32> to vector<8x8xf32>
    %42 = tpu.transpose %40, [1, 0] : vector<8x8xf32> -> vector<8x8xf32>
    %cst_20 = arith.constant dense<0.000000e+00> : vector<8x8xf32>
    %43 = tpu.matmul %39, %42, %cst_20 {dimension_numbers = #tpu.dot_dimension_numbers<[1], [0], [0], [1], [0, 0, 1, 1], [], []>} : vector<8x8xf32>, vector<8x8xf32>, vector<8x8xf32> -> vector<8x8xf32>
    %cst_21 = arith.constant 0.353553385 : f32
    %44 = vector.broadcast %cst_21 : f32 to vector<8x8xf32>
    %45 = arith.mulf %43, %44 : vector<8x8xf32>
    %46 = vector.broadcast %37 : vector<1x8xf32> to vector<8x8xf32>
    %47 = arith.addf %45, %46 : vector<8x8xf32>
    %cst_22 = arith.constant dense<0xFF800000> : vector<8xf32>
    %48 = vector.multi_reduction <maximumf>, %47, %cst_22 [1] : vector<8x8xf32> to vector<8xf32>
    %49 = vector.shape_cast %48 : vector<8xf32> to vector<8x1xf32>
    %50 = vector.broadcast %49 : vector<8x1xf32> to vector<8x8xf32>
    %51 = arith.subf %47, %50 : vector<8x8xf32>
    %52 = math.exp %51 : vector<8x8xf32>
    %cst_23 = arith.constant dense<0.000000e+00> : vector<8xf32>
    %53 = vector.multi_reduction <add>, %52, %cst_23 [1] : vector<8x8xf32> to vector<8xf32>
    %54 = vector.shape_cast %53 : vector<8xf32> to vector<8x1xf32>
    %55 = vector.broadcast %54 : vector<8x1xf32> to vector<8x8xf32>
    %56 = arith.divf %52, %55 : vector<8x8xf32>
    %cst_24 = arith.constant dense<0.000000e+00> : vector<8x8xf32>
    %57 = tpu.matmul %56, %41, %cst_24 {dimension_numbers = #tpu.dot_dimension_numbers<[1], [0], [0], [1], [0, 0, 1, 1], [], []>} : vector<8x8xf32>, vector<8x8xf32>, vector<8x8xf32> -> vector<8x8xf32>
    %58 = vector.extract_strided_slice %29 {offsets = [0, 0], sizes = [8, 32], strides = [1, 1]} : vector<32x32xf32> to vector<8x32xf32>
    %cst_25 = arith.constant dense<0.000000e+00> : vector<8x32xf32>
    %59 = tpu.matmul %57, %58, %cst_25 {dimension_numbers = #tpu.dot_dimension_numbers<[1], [0], [0], [1], [0, 0, 1, 1], [], []>} : vector<8x8xf32>, vector<8x32xf32>, vector<8x32xf32> -> vector<8x32xf32>
    %60 = vector.broadcast %38 : vector<1x32xf32> to vector<8x32xf32>
    %61 = arith.addf %60, %59 : vector<8x32xf32>
    %62 = vector.extract_strided_slice %35 {offsets = [0, 8], sizes = [8, 8], strides = [1, 1]} : vector<16x96xf32> to vector<8x8xf32>
    %63 = vector.extract_strided_slice %35 {offsets = [0, 40], sizes = [8, 8], strides = [1, 1]} : vector<16x96xf32> to vector<8x8xf32>
    %64 = vector.extract_strided_slice %35 {offsets = [0, 72], sizes = [8, 8], strides = [1, 1]} : vector<16x96xf32> to vector<8x8xf32>
    %65 = tpu.transpose %63, [1, 0] : vector<8x8xf32> -> vector<8x8xf32>
    %cst_26 = arith.constant dense<0.000000e+00> : vector<8x8xf32>
    %66 = tpu.matmul %62, %65, %cst_26 {dimension_numbers = #tpu.dot_dimension_numbers<[1], [0], [0], [1], [0, 0, 1, 1], [], []>} : vector<8x8xf32>, vector<8x8xf32>, vector<8x8xf32> -> vector<8x8xf32>
    %cst_27 = arith.constant 0.353553385 : f32
    %67 = vector.broadcast %cst_27 : f32 to vector<8x8xf32>
    %68 = arith.mulf %66, %67 : vector<8x8xf32>
    %69 = vector.broadcast %37 : vector<1x8xf32> to vector<8x8xf32>
    %70 = arith.addf %68, %69 : vector<8x8xf32>
    %cst_28 = arith.constant dense<0xFF800000> : vector<8xf32>
    %71 = vector.multi_reduction <maximumf>, %70, %cst_28 [1] : vector<8x8xf32> to vector<8xf32>
    %72 = vector.shape_cast %71 : vector<8xf32> to vector<8x1xf32>
    %73 = vector.broadcast %72 : vector<8x1xf32> to vector<8x8xf32>
    %74 = arith.subf %70, %73 : vector<8x8xf32>
    %75 = math.exp %74 : vector<8x8xf32>
    %cst_29 = arith.constant dense<0.000000e+00> : vector<8xf32>
    %76 = vector.multi_reduction <add>, %75, %cst_29 [1] : vector<8x8xf32> to vector<8xf32>
    %77 = vector.shape_cast %76 : vector<8xf32> to vector<8x1xf32>
    %78 = vector.broadcast %77 : vector<8x1xf32> to vector<8x8xf32>
    %79 = arith.divf %75, %78 : vector<8x8xf32>
    %cst_30 = arith.constant dense<0.000000e+00> : vector<8x8xf32>
    %80 = tpu.matmul %79, %64, %cst_30 {dimension_numbers = #tpu.dot_dimension_numbers<[1], [0], [0], [1], [0, 0, 1, 1], [], []>} : vector<8x8xf32>, vector<8x8xf32>, vector<8x8xf32> -> vector<8x8xf32>
    %81 = vector.extract_strided_slice %29 {offsets = [8, 0], sizes = [8, 32], strides = [1, 1]} : vector<32x32xf32> to vector<8x32xf32>
    %cst_31 = arith.constant dense<0.000000e+00> : vector<8x32xf32>
    %82 = tpu.matmul %80, %81, %cst_31 {dimension_numbers = #tpu.dot_dimension_numbers<[1], [0], [0], [1], [0, 0, 1, 1], [], []>} : vector<8x8xf32>, vector<8x32xf32>, vector<8x32xf32> -> vector<8x32xf32>
    %83 = arith.addf %61, %82 : vector<8x32xf32>
    %84 = vector.extract_strided_slice %35 {offsets = [0, 16], sizes = [8, 8], strides = [1, 1]} : vector<16x96xf32> to vector<8x8xf32>
    %85 = vector.extract_strided_slice %35 {offsets = [0, 48], sizes = [8, 8], strides = [1, 1]} : vector<16x96xf32> to vector<8x8xf32>
    %86 = vector.extract_strided_slice %35 {offsets = [0, 80], sizes = [8, 8], strides = [1, 1]} : vector<16x96xf32> to vector<8x8xf32>
    %87 = tpu.transpose %85, [1, 0] : vector<8x8xf32> -> vector<8x8xf32>
    %cst_32 = arith.constant dense<0.000000e+00> : vector<8x8xf32>
    %88 = tpu.matmul %84, %87, %cst_32 {dimension_numbers = #tpu.dot_dimension_numbers<[1], [0], [0], [1], [0, 0, 1, 1], [], []>} : vector<8x8xf32>, vector<8x8xf32>, vector<8x8xf32> -> vector<8x8xf32>
    %cst_33 = arith.constant 0.353553385 : f32
    %89 = vector.broadcast %cst_33 : f32 to vector<8x8xf32>
    %90 = arith.mulf %88, %89 : vector<8x8xf32>
    %91 = vector.broadcast %37 : vector<1x8xf32> to vector<8x8xf32>
    %92 = arith.addf %90, %91 : vector<8x8xf32>
    %cst_34 = arith.constant dense<0xFF800000> : vector<8xf32>
    %93 = vector.multi_reduction <maximumf>, %92, %cst_34 [1] : vector<8x8xf32> to vector<8xf32>
    %94 = vector.shape_cast %93 : vector<8xf32> to vector<8x1xf32>
    %95 = vector.broadcast %94 : vector<8x1xf32> to vector<8x8xf32>
    %96 = arith.subf %92, %95 : vector<8x8xf32>
    %97 = math.exp %96 : vector<8x8xf32>
    %cst_35 = arith.constant dense<0.000000e+00> : vector<8xf32>
    %98 = vector.multi_reduction <add>, %97, %cst_35 [1] : vector<8x8xf32> to vector<8xf32>
    %99 = vector.shape_cast %98 : vector<8xf32> to vector<8x1xf32>
    %100 = vector.broadcast %99 : vector<8x1xf32> to vector<8x8xf32>
    %101 = arith.divf %97, %100 : vector<8x8xf32>
    %cst_36 = arith.constant dense<0.000000e+00> : vector<8x8xf32>
    %102 = tpu.matmul %101, %86, %cst_36 {dimension_numbers = #tpu.dot_dimension_numbers<[1], [0], [0], [1], [0, 0, 1, 1], [], []>} : vector<8x8xf32>, vector<8x8xf32>, vector<8x8xf32> -> vector<8x8xf32>
    %103 = vector.extract_strided_slice %29 {offsets = [16, 0], sizes = [8, 32], strides = [1, 1]} : vector<32x32xf32> to vector<8x32xf32>
    %cst_37 = arith.constant dense<0.000000e+00> : vector<8x32xf32>
    %104 = tpu.matmul %102, %103, %cst_37 {dimension_numbers = #tpu.dot_dimension_numbers<[1], [0], [0], [1], [0, 0, 1, 1], [], []>} : vector<8x8xf32>, vector<8x32xf32>, vector<8x32xf32> -> vector<8x32xf32>
    %105 = arith.addf %83, %104 : vector<8x32xf32>
    %106 = vector.extract_strided_slice %35 {offsets = [0, 24], sizes = [8, 8], strides = [1, 1]} : vector<16x96xf32> to vector<8x8xf32>
    %107 = vector.extract_strided_slice %35 {offsets = [0, 56], sizes = [8, 8], strides = [1, 1]} : vector<16x96xf32> to vector<8x8xf32>
    %108 = vector.extract_strided_slice %35 {offsets = [0, 88], sizes = [8, 8], strides = [1, 1]} : vector<16x96xf32> to vector<8x8xf32>
    %109 = tpu.transpose %107, [1, 0] : vector<8x8xf32> -> vector<8x8xf32>
    %cst_38 = arith.constant dense<0.000000e+00> : vector<8x8xf32>
    %110 = tpu.matmul %106, %109, %cst_38 {dimension_numbers = #tpu.dot_dimension_numbers<[1], [0], [0], [1], [0, 0, 1, 1], [], []>} : vector<8x8xf32>, vector<8x8xf32>, vector<8x8xf32> -> vector<8x8xf32>
    %cst_39 = arith.constant 0.353553385 : f32
    %111 = vector.broadcast %cst_39 : f32 to vector<8x8xf32>
    %112 = arith.mulf %110, %111 : vector<8x8xf32>
    %113 = vector.broadcast %37 : vector<1x8xf32> to vector<8x8xf32>
    %114 = arith.addf %112, %113 : vector<8x8xf32>
    %cst_40 = arith.constant dense<0xFF800000> : vector<8xf32>
    %115 = vector.multi_reduction <maximumf>, %114, %cst_40 [1] : vector<8x8xf32> to vector<8xf32>
    %116 = vector.shape_cast %115 : vector<8xf32> to vector<8x1xf32>
    %117 = vector.broadcast %116 : vector<8x1xf32> to vector<8x8xf32>
    %118 = arith.subf %114, %117 : vector<8x8xf32>
    %119 = math.exp %118 : vector<8x8xf32>
    %cst_41 = arith.constant dense<0.000000e+00> : vector<8xf32>
    %120 = vector.multi_reduction <add>, %119, %cst_41 [1] : vector<8x8xf32> to vector<8xf32>
    %121 = vector.shape_cast %120 : vector<8xf32> to vector<8x1xf32>
    %122 = vector.broadcast %121 : vector<8x1xf32> to vector<8x8xf32>
    %123 = arith.divf %119, %122 : vector<8x8xf32>
    %cst_42 = arith.constant dense<0.000000e+00> : vector<8x8xf32>
    %124 = tpu.matmul %123, %108, %cst_42 {dimension_numbers = #tpu.dot_dimension_numbers<[1], [0], [0], [1], [0, 0, 1, 1], [], []>} : vector<8x8xf32>, vector<8x8xf32>, vector<8x8xf32> -> vector<8x8xf32>
    %125 = vector.extract_strided_slice %29 {offsets = [24, 0], sizes = [8, 32], strides = [1, 1]} : vector<32x32xf32> to vector<8x32xf32>
    %cst_43 = arith.constant dense<0.000000e+00> : vector<8x32xf32>
    %126 = tpu.matmul %124, %125, %cst_43 {dimension_numbers = #tpu.dot_dimension_numbers<[1], [0], [0], [1], [0, 0, 1, 1], [], []>} : vector<8x8xf32>, vector<8x32xf32>, vector<8x32xf32> -> vector<8x32xf32>
    %127 = arith.addf %105, %126 : vector<8x32xf32>
    %c1 = arith.constant 1 : index
    %c0_44 = arith.constant 0 : index
    %c0_45 = arith.constant 0 : index
    %128 = vector.load %arg1[%c1, %c0_44, %c0_45] : memref<2x1x8xf32, #tpu.memory_space<vmem>>, vector<1x1x8xf32>
    %129 = vector.shape_cast %128 : vector<1x1x8xf32> to vector<1x8xf32>
    %130 = vector.extract_strided_slice %31 {offsets = [1, 0], sizes = [1, 32], strides = [1, 1]} : vector<8x96xf32> to vector<1x32xf32>
    %131 = vector.extract_strided_slice %35 {offsets = [8, 0], sizes = [8, 8], strides = [1, 1]} : vector<16x96xf32> to vector<8x8xf32>
    %132 = vector.extract_strided_slice %35 {offsets = [8, 32], sizes = [8, 8], strides = [1, 1]} : vector<16x96xf32> to vector<8x8xf32>
    %133 = vector.extract_strided_slice %35 {offsets = [8, 64], sizes = [8, 8], strides = [1, 1]} : vector<16x96xf32> to vector<8x8xf32>
    %134 = tpu.transpose %132, [1, 0] : vector<8x8xf32> -> vector<8x8xf32>
    %cst_46 = arith.constant dense<0.000000e+00> : vector<8x8xf32>
    %135 = tpu.matmul %131, %134, %cst_46 {dimension_numbers = #tpu.dot_dimension_numbers<[1], [0], [0], [1], [0, 0, 1, 1], [], []>} : vector<8x8xf32>, vector<8x8xf32>, vector<8x8xf32> -> vector<8x8xf32>
    %cst_47 = arith.constant 0.353553385 : f32
    %136 = vector.broadcast %cst_47 : f32 to vector<8x8xf32>
    %137 = arith.mulf %135, %136 : vector<8x8xf32>
    %138 = vector.broadcast %129 : vector<1x8xf32> to vector<8x8xf32>
    %139 = arith.addf %137, %138 : vector<8x8xf32>
    %cst_48 = arith.constant dense<0xFF800000> : vector<8xf32>
    %140 = vector.multi_reduction <maximumf>, %139, %cst_48 [1] : vector<8x8xf32> to vector<8xf32>
    %141 = vector.shape_cast %140 : vector<8xf32> to vector<8x1xf32>
    %142 = vector.broadcast %141 : vector<8x1xf32> to vector<8x8xf32>
    %143 = arith.subf %139, %142 : vector<8x8xf32>
    %144 = math.exp %143 : vector<8x8xf32>
    %cst_49 = arith.constant dense<0.000000e+00> : vector<8xf32>
    %145 = vector.multi_reduction <add>, %144, %cst_49 [1] : vector<8x8xf32> to vector<8xf32>
    %146 = vector.shape_cast %145 : vector<8xf32> to vector<8x1xf32>
    %147 = vector.broadcast %146 : vector<8x1xf32> to vector<8x8xf32>
    %148 = arith.divf %144, %147 : vector<8x8xf32>
    %cst_50 = arith.constant dense<0.000000e+00> : vector<8x8xf32>
    %149 = tpu.matmul %148, %133, %cst_50 {dimension_numbers = #tpu.dot_dimension_numbers<[1], [0], [0], [1], [0, 0, 1, 1], [], []>} : vector<8x8xf32>, vector<8x8xf32>, vector<8x8xf32> -> vector<8x8xf32>
    %150 = vector.extract_strided_slice %29 {offsets = [0, 0], sizes = [8, 32], strides = [1, 1]} : vector<32x32xf32> to vector<8x32xf32>
    %cst_51 = arith.constant dense<0.000000e+00> : vector<8x32xf32>
    %151 = tpu.matmul %149, %150, %cst_51 {dimension_numbers = #tpu.dot_dimension_numbers<[1], [0], [0], [1], [0, 0, 1, 1], [], []>} : vector<8x8xf32>, vector<8x32xf32>, vector<8x32xf32> -> vector<8x32xf32>
    %152 = vector.broadcast %130 : vector<1x32xf32> to vector<8x32xf32>
    %153 = arith.addf %152, %151 : vector<8x32xf32>
    %154 = vector.extract_strided_slice %35 {offsets = [8, 8], sizes = [8, 8], strides = [1, 1]} : vector<16x96xf32> to vector<8x8xf32>
    %155 = vector.extract_strided_slice %35 {offsets = [8, 40], sizes = [8, 8], strides = [1, 1]} : vector<16x96xf32> to vector<8x8xf32>
    %156 = vector.extract_strided_slice %35 {offsets = [8, 72], sizes = [8, 8], strides = [1, 1]} : vector<16x96xf32> to vector<8x8xf32>
    %157 = tpu.transpose %155, [1, 0] : vector<8x8xf32> -> vector<8x8xf32>
    %cst_52 = arith.constant dense<0.000000e+00> : vector<8x8xf32>
    %158 = tpu.matmul %154, %157, %cst_52 {dimension_numbers = #tpu.dot_dimension_numbers<[1], [0], [0], [1], [0, 0, 1, 1], [], []>} : vector<8x8xf32>, vector<8x8xf32>, vector<8x8xf32> -> vector<8x8xf32>
    %cst_53 = arith.constant 0.353553385 : f32
    %159 = vector.broadcast %cst_53 : f32 to vector<8x8xf32>
    %160 = arith.mulf %158, %159 : vector<8x8xf32>
    %161 = vector.broadcast %129 : vector<1x8xf32> to vector<8x8xf32>
    %162 = arith.addf %160, %161 : vector<8x8xf32>
    %cst_54 = arith.constant dense<0xFF800000> : vector<8xf32>
    %163 = vector.multi_reduction <maximumf>, %162, %cst_54 [1] : vector<8x8xf32> to vector<8xf32>
    %164 = vector.shape_cast %163 : vector<8xf32> to vector<8x1xf32>
    %165 = vector.broadcast %164 : vector<8x1xf32> to vector<8x8xf32>
    %166 = arith.subf %162, %165 : vector<8x8xf32>
    %167 = math.exp %166 : vector<8x8xf32>
    %cst_55 = arith.constant dense<0.000000e+00> : vector<8xf32>
    %168 = vector.multi_reduction <add>, %167, %cst_55 [1] : vector<8x8xf32> to vector<8xf32>
    %169 = vector.shape_cast %168 : vector<8xf32> to vector<8x1xf32>
    %170 = vector.broadcast %169 : vector<8x1xf32> to vector<8x8xf32>
    %171 = arith.divf %167, %170 : vector<8x8xf32>
    %cst_56 = arith.constant dense<0.000000e+00> : vector<8x8xf32>
    %172 = tpu.matmul %171, %156, %cst_56 {dimension_numbers = #tpu.dot_dimension_numbers<[1], [0], [0], [1], [0, 0, 1, 1], [], []>} : vector<8x8xf32>, vector<8x8xf32>, vector<8x8xf32> -> vector<8x8xf32>
    %173 = vector.extract_strided_slice %29 {offsets = [8, 0], sizes = [8, 32], strides = [1, 1]} : vector<32x32xf32> to vector<8x32xf32>
    %cst_57 = arith.constant dense<0.000000e+00> : vector<8x32xf32>
    %174 = tpu.matmul %172, %173, %cst_57 {dimension_numbers = #tpu.dot_dimension_numbers<[1], [0], [0], [1], [0, 0, 1, 1], [], []>} : vector<8x8xf32>, vector<8x32xf32>, vector<8x32xf32> -> vector<8x32xf32>
    %175 = arith.addf %153, %174 : vector<8x32xf32>
    %176 = vector.extract_strided_slice %35 {offsets = [8, 16], sizes = [8, 8], strides = [1, 1]} : vector<16x96xf32> to vector<8x8xf32>
    %177 = vector.extract_strided_slice %35 {offsets = [8, 48], sizes = [8, 8], strides = [1, 1]} : vector<16x96xf32> to vector<8x8xf32>
    %178 = vector.extract_strided_slice %35 {offsets = [8, 80], sizes = [8, 8], strides = [1, 1]} : vector<16x96xf32> to vector<8x8xf32>
    %179 = tpu.transpose %177, [1, 0] : vector<8x8xf32> -> vector<8x8xf32>
    %cst_58 = arith.constant dense<0.000000e+00> : vector<8x8xf32>
    %180 = tpu.matmul %176, %179, %cst_58 {dimension_numbers = #tpu.dot_dimension_numbers<[1], [0], [0], [1], [0, 0, 1, 1], [], []>} : vector<8x8xf32>, vector<8x8xf32>, vector<8x8xf32> -> vector<8x8xf32>
    %cst_59 = arith.constant 0.353553385 : f32
    %181 = vector.broadcast %cst_59 : f32 to vector<8x8xf32>
    %182 = arith.mulf %180, %181 : vector<8x8xf32>
    %183 = vector.broadcast %129 : vector<1x8xf32> to vector<8x8xf32>
    %184 = arith.addf %182, %183 : vector<8x8xf32>
    %cst_60 = arith.constant dense<0xFF800000> : vector<8xf32>
    %185 = vector.multi_reduction <maximumf>, %184, %cst_60 [1] : vector<8x8xf32> to vector<8xf32>
    %186 = vector.shape_cast %185 : vector<8xf32> to vector<8x1xf32>
    %187 = vector.broadcast %186 : vector<8x1xf32> to vector<8x8xf32>
    %188 = arith.subf %184, %187 : vector<8x8xf32>
    %189 = math.exp %188 : vector<8x8xf32>
    %cst_61 = arith.constant dense<0.000000e+00> : vector<8xf32>
    %190 = vector.multi_reduction <add>, %189, %cst_61 [1] : vector<8x8xf32> to vector<8xf32>
    %191 = vector.shape_cast %190 : vector<8xf32> to vector<8x1xf32>
    %192 = vector.broadcast %191 : vector<8x1xf32> to vector<8x8xf32>
    %193 = arith.divf %189, %192 : vector<8x8xf32>
    %cst_62 = arith.constant dense<0.000000e+00> : vector<8x8xf32>
    %194 = tpu.matmul %193, %178, %cst_62 {dimension_numbers = #tpu.dot_dimension_numbers<[1], [0], [0], [1], [0, 0, 1, 1], [], []>} : vector<8x8xf32>, vector<8x8xf32>, vector<8x8xf32> -> vector<8x8xf32>
    %195 = vector.extract_strided_slice %29 {offsets = [16, 0], sizes = [8, 32], strides = [1, 1]} : vector<32x32xf32> to vector<8x32xf32>
    %cst_63 = arith.constant dense<0.000000e+00> : vector<8x32xf32>
    %196 = tpu.matmul %194, %195, %cst_63 {dimension_numbers = #tpu.dot_dimension_numbers<[1], [0], [0], [1], [0, 0, 1, 1], [], []>} : vector<8x8xf32>, vector<8x32xf32>, vector<8x32xf32> -> vector<8x32xf32>
    %197 = arith.addf %175, %196 : vector<8x32xf32>
    %198 = vector.extract_strided_slice %35 {offsets = [8, 24], sizes = [8, 8], strides = [1, 1]} : vector<16x96xf32> to vector<8x8xf32>
    %199 = vector.extract_strided_slice %35 {offsets = [8, 56], sizes = [8, 8], strides = [1, 1]} : vector<16x96xf32> to vector<8x8xf32>
    %200 = vector.extract_strided_slice %35 {offsets = [8, 88], sizes = [8, 8], strides = [1, 1]} : vector<16x96xf32> to vector<8x8xf32>
    %201 = tpu.transpose %199, [1, 0] : vector<8x8xf32> -> vector<8x8xf32>
    %cst_64 = arith.constant dense<0.000000e+00> : vector<8x8xf32>
    %202 = tpu.matmul %198, %201, %cst_64 {dimension_numbers = #tpu.dot_dimension_numbers<[1], [0], [0], [1], [0, 0, 1, 1], [], []>} : vector<8x8xf32>, vector<8x8xf32>, vector<8x8xf32> -> vector<8x8xf32>
    %cst_65 = arith.constant 0.353553385 : f32
    %203 = vector.broadcast %cst_65 : f32 to vector<8x8xf32>
    %204 = arith.mulf %202, %203 : vector<8x8xf32>
    %205 = vector.broadcast %129 : vector<1x8xf32> to vector<8x8xf32>
    %206 = arith.addf %204, %205 : vector<8x8xf32>
    %cst_66 = arith.constant dense<0xFF800000> : vector<8xf32>
    %207 = vector.multi_reduction <maximumf>, %206, %cst_66 [1] : vector<8x8xf32> to vector<8xf32>
    %208 = vector.shape_cast %207 : vector<8xf32> to vector<8x1xf32>
    %209 = vector.broadcast %208 : vector<8x1xf32> to vector<8x8xf32>
    %210 = arith.subf %206, %209 : vector<8x8xf32>
    %211 = math.exp %210 : vector<8x8xf32>
    %cst_67 = arith.constant dense<0.000000e+00> : vector<8xf32>
    %212 = vector.multi_reduction <add>, %211, %cst_67 [1] : vector<8x8xf32> to vector<8xf32>
    %213 = vector.shape_cast %212 : vector<8xf32> to vector<8x1xf32>
    %214 = vector.broadcast %213 : vector<8x1xf32> to vector<8x8xf32>
    %215 = arith.divf %211, %214 : vector<8x8xf32>
    %cst_68 = arith.constant dense<0.000000e+00> : vector<8x8xf32>
    %216 = tpu.matmul %215, %200, %cst_68 {dimension_numbers = #tpu.dot_dimension_numbers<[1], [0], [0], [1], [0, 0, 1, 1], [], []>} : vector<8x8xf32>, vector<8x8xf32>, vector<8x8xf32> -> vector<8x8xf32>
    %217 = vector.extract_strided_slice %29 {offsets = [24, 0], sizes = [8, 32], strides = [1, 1]} : vector<32x32xf32> to vector<8x32xf32>
    %cst_69 = arith.constant dense<0.000000e+00> : vector<8x32xf32>
    %218 = tpu.matmul %216, %217, %cst_69 {dimension_numbers = #tpu.dot_dimension_numbers<[1], [0], [0], [1], [0, 0, 1, 1], [], []>} : vector<8x8xf32>, vector<8x32xf32>, vector<8x32xf32> -> vector<8x32xf32>
    %219 = arith.addf %197, %218 : vector<8x32xf32>
    %220 = tpu.concatenate %127, %219 in 0 : vector<8x32xf32>, vector<8x32xf32> -> vector<16x32xf32>
    %221 = arith.addf %25, %220 : vector<16x32xf32>
    %222 = vector.extract_strided_slice %31 {offsets = [2, 0], sizes = [1, 32], strides = [1, 1]} : vector<8x96xf32> to vector<1x32xf32>
    %223 = vector.extract_strided_slice %31 {offsets = [3, 0], sizes = [1, 32], strides = [1, 1]} : vector<8x96xf32> to vector<1x32xf32>
    %cst_70 = arith.constant dense<0.000000e+00> : vector<16xf32>
    %224 = vector.multi_reduction <add>, %221, %cst_70 [1] : vector<16x32xf32> to vector<16xf32>
    %225 = vector.shape_cast %224 : vector<16xf32> to vector<16x1xf32>
    %cst_71 = arith.constant 3.200000e+01 : f32
    %226 = vector.broadcast %cst_71 : f32 to vector<16x1xf32>
    %227 = arith.divf %225, %226 : vector<16x1xf32>
    %228 = vector.broadcast %227 : vector<16x1xf32> to vector<16x32xf32>
    %229 = arith.subf %221, %228 : vector<16x32xf32>
    %230 = arith.mulf %229, %229 : vector<16x32xf32>
    %cst_72 = arith.constant dense<0.000000e+00> : vector<16xf32>
    %231 = vector.multi_reduction <add>, %230, %cst_72 [1] : vector<16x32xf32> to vector<16xf32>
    %232 = vector.shape_cast %231 : vector<16xf32> to vector<16x1xf32>
    %cst_73 = arith.constant 3.200000e+01 : f32
    %233 = vector.broadcast %cst_73 : f32 to vector<16x1xf32>
    %234 = arith.divf %232, %233 : vector<16x1xf32>
    %235 = vector.broadcast %227 : vector<16x1xf32> to vector<16x32xf32>
    %236 = arith.subf %221, %235 : vector<16x32xf32>
    %cst_74 = arith.constant 9.99999996E-13 : f32
    %237 = vector.broadcast %cst_74 : f32 to vector<16x1xf32>
    %238 = arith.addf %234, %237 : vector<16x1xf32>
    %239 = math.rsqrt %238 : vector<16x1xf32>
    %240 = vector.broadcast %239 : vector<16x1xf32> to vector<16x32xf32>
    %241 = arith.mulf %236, %240 : vector<16x32xf32>
    %242 = vector.broadcast %222 : vector<1x32xf32> to vector<16x32xf32>
    %243 = arith.mulf %241, %242 : vector<16x32xf32>
    %244 = vector.broadcast %223 : vector<1x32xf32> to vector<16x32xf32>
    %245 = arith.addf %243, %244 : vector<16x32xf32>
    %c0_75 = arith.constant 0 : index
    %c0_76 = arith.constant 0 : index
    %c0_77 = arith.constant 0 : index
    %246 = vector.load %arg4[%c0_75, %c0_76, %c0_77] : memref<2x32x64xf32, #tpu.memory_space<vmem>>, vector<1x32x64xf32>
    %247 = vector.shape_cast %246 : vector<1x32x64xf32> to vector<32x64xf32>
    %cst_78 = arith.constant dense<0.000000e+00> : vector<16x64xf32>
    %248 = tpu.matmul %245, %247, %cst_78 {dimension_numbers = #tpu.dot_dimension_numbers<[1], [0], [0], [1], [0, 0, 1, 1], [], []>} : vector<16x32xf32>, vector<32x64xf32>, vector<16x64xf32> -> vector<16x64xf32>
    %249 = vector.extract_strided_slice %31 {offsets = [4, 0], sizes = [1, 64], strides = [1, 1]} : vector<8x96xf32> to vector<1x64xf32>
    %250 = vector.broadcast %249 : vector<1x64xf32> to vector<16x64xf32>
    %251 = arith.addf %248, %250 : vector<16x64xf32>
    %252 = arith.mulf %251, %251 : vector<16x64xf32>
    %253 = arith.mulf %251, %252 : vector<16x64xf32>
    %cst_79 = arith.constant 4.471500e-02 : f32
    %254 = vector.broadcast %cst_79 : f32 to vector<16x64xf32>
    %255 = arith.mulf %254, %253 : vector<16x64xf32>
    %256 = arith.addf %251, %255 : vector<16x64xf32>
    %cst_80 = arith.constant 0.797884583 : f32
    %257 = vector.broadcast %cst_80 : f32 to vector<16x64xf32>
    %258 = arith.mulf %257, %256 : vector<16x64xf32>
    %259 = math.tanh %258 : vector<16x64xf32>
    %cst_81 = arith.constant 1.000000e+00 : f32
    %260 = vector.broadcast %cst_81 : f32 to vector<16x64xf32>
    %261 = arith.addf %260, %259 : vector<16x64xf32>
    %cst_82 = arith.constant 5.000000e-01 : f32
    %262 = vector.broadcast %cst_82 : f32 to vector<16x64xf32>
    %263 = arith.mulf %262, %261 : vector<16x64xf32>
    %264 = arith.mulf %251, %263 : vector<16x64xf32>
    %c0_83 = arith.constant 0 : index
    %c0_84 = arith.constant 0 : index
    %c0_85 = arith.constant 0 : index
    %265 = vector.load %arg5[%c0_83, %c0_84, %c0_85] : memref<2x64x32xf32, #tpu.memory_space<vmem>>, vector<1x64x32xf32>
    %266 = vector.shape_cast %265 : vector<1x64x32xf32> to vector<64x32xf32>
    %cst_86 = arith.constant dense<0.000000e+00> : vector<16x32xf32>
    %267 = tpu.matmul %264, %266, %cst_86 {dimension_numbers = #tpu.dot_dimension_numbers<[1], [0], [0], [1], [0, 0, 1, 1], [], []>} : vector<16x64xf32>, vector<64x32xf32>, vector<16x32xf32> -> vector<16x32xf32>
    %268 = vector.extract_strided_slice %31 {offsets = [5, 0], sizes = [1, 32], strides = [1, 1]} : vector<8x96xf32> to vector<1x32xf32>
    %269 = vector.broadcast %268 : vector<1x32xf32> to vector<16x32xf32>
    %270 = arith.addf %267, %269 : vector<16x32xf32>
    %271 = arith.addf %245, %270 : vector<16x32xf32>
    %272 = vector.extract_strided_slice %31 {offsets = [6, 0], sizes = [1, 32], strides = [1, 1]} : vector<8x96xf32> to vector<1x32xf32>
    %273 = vector.extract_strided_slice %31 {offsets = [7, 0], sizes = [1, 32], strides = [1, 1]} : vector<8x96xf32> to vector<1x32xf32>
    %cst_87 = arith.constant dense<0.000000e+00> : vector<16xf32>
    %274 = vector.multi_reduction <add>, %271, %cst_87 [1] : vector<16x32xf32> to vector<16xf32>
    %275 = vector.shape_cast %274 : vector<16xf32> to vector<16x1xf32>
    %cst_88 = arith.constant 3.200000e+01 : f32
    %276 = vector.broadcast %cst_88 : f32 to vector<16x1xf32>
    %277 = arith.divf %275, %276 : vector<16x1xf32>
    %278 = vector.broadcast %277 : vector<16x1xf32> to vector<16x32xf32>
    %279 = arith.subf %271, %278 : vector<16x32xf32>
    %280 = arith.mulf %279, %279 : vector<16x32xf32>
    %cst_89 = arith.constant dense<0.000000e+00> : vector<16xf32>
    %281 = vector.multi_reduction <add>, %280, %cst_89 [1] : vector<16x32xf32> to vector<16xf32>
    %282 = vector.shape_cast %281 : vector<16xf32> to vector<16x1xf32>
    %cst_90 = arith.constant 3.200000e+01 : f32
    %283 = vector.broadcast %cst_90 : f32 to vector<16x1xf32>
    %284 = arith.divf %282, %283 : vector<16x1xf32>
    %285 = vector.broadcast %277 : vector<16x1xf32> to vector<16x32xf32>
    %286 = arith.subf %271, %285 : vector<16x32xf32>
    %cst_91 = arith.constant 9.99999996E-13 : f32
    %287 = vector.broadcast %cst_91 : f32 to vector<16x1xf32>
    %288 = arith.addf %284, %287 : vector<16x1xf32>
    %289 = math.rsqrt %288 : vector<16x1xf32>
    %290 = vector.broadcast %289 : vector<16x1xf32> to vector<16x32xf32>
    %291 = arith.mulf %286, %290 : vector<16x32xf32>
    %292 = vector.broadcast %272 : vector<1x32xf32> to vector<16x32xf32>
    %293 = arith.mulf %291, %292 : vector<16x32xf32>
    %294 = vector.broadcast %273 : vector<1x32xf32> to vector<16x32xf32>
    %295 = arith.addf %293, %294 : vector<16x32xf32>
    %c1_92 = arith.constant 1 : index
    %c0_93 = arith.constant 0 : index
    %c0_94 = arith.constant 0 : index
    %296 = vector.load %arg2[%c1_92, %c0_93, %c0_94] : memref<2x32x96xf32, #tpu.memory_space<vmem>>, vector<1x32x96xf32>
    %297 = vector.shape_cast %296 : vector<1x32x96xf32> to vector<32x96xf32>
    %c1_95 = arith.constant 1 : index
    %c0_96 = arith.constant 0 : index
    %c0_97 = arith.constant 0 : index
    %298 = vector.load %arg3[%c1_95, %c0_96, %c0_97] : memref<2x32x32xf32, #tpu.memory_space<vmem>>, vector<1x32x32xf32>
    %299 = vector.shape_cast %298 : vector<1x32x32xf32> to vector<32x32xf32>
    %c1_98 = arith.constant 1 : index
    %c0_99 = arith.constant 0 : index
    %c0_100 = arith.constant 0 : index
    %300 = vector.load %arg6[%c1_98, %c0_99, %c0_100] : memref<2x8x96xf32, #tpu.memory_space<vmem>>, vector<1x8x96xf32>
    %301 = vector.shape_cast %300 : vector<1x8x96xf32> to vector<8x96xf32>
    %cst_101 = arith.constant dense<0.000000e+00> : vector<16x96xf32>
    %302 = tpu.matmul %295, %297, %cst_101 {dimension_numbers = #tpu.dot_dimension_numbers<[1], [0], [0], [1], [0, 0, 1, 1], [], []>} : vector<16x32xf32>, vector<32x96xf32>, vector<16x96xf32> -> vector<16x96xf32>
    %303 = vector.extract_strided_slice %301 {offsets = [0, 0], sizes = [1, 96], strides = [1, 1]} : vector<8x96xf32> to vector<1x96xf32>
    %304 = vector.broadcast %303 : vector<1x96xf32> to vector<16x96xf32>
    %305 = arith.addf %302, %304 : vector<16x96xf32>
    %c0_102 = arith.constant 0 : index
    %c0_103 = arith.constant 0 : index
    %c0_104 = arith.constant 0 : index
    %306 = vector.load %arg1[%c0_102, %c0_103, %c0_104] : memref<2x1x8xf32, #tpu.memory_space<vmem>>, vector<1x1x8xf32>
    %307 = vector.shape_cast %306 : vector<1x1x8xf32> to vector<1x8xf32>
    %308 = vector.extract_strided_slice %301 {offsets = [1, 0], sizes = [1, 32], strides = [1, 1]} : vector<8x96xf32> to vector<1x32xf32>
    %309 = vector.extract_strided_slice %305 {offsets = [0, 0], sizes = [8, 8], strides = [1, 1]} : vector<16x96xf32> to vector<8x8xf32>
    %310 = vector.extract_strided_slice %305 {offsets = [0, 32], sizes = [8, 8], strides = [1, 1]} : vector<16x96xf32> to vector<8x8xf32>
    %311 = vector.extract_strided_slice %305 {offsets = [0, 64], sizes = [8, 8], strides = [1, 1]} : vector<16x96xf32> to vector<8x8xf32>
    %312 = tpu.transpose %310, [1, 0] : vector<8x8xf32> -> vector<8x8xf32>
    %cst_105 = arith.constant dense<0.000000e+00> : vector<8x8xf32>
    %313 = tpu.matmul %309, %312, %cst_105 {dimension_numbers = #tpu.dot_dimension_numbers<[1], [0], [0], [1], [0, 0, 1, 1], [], []>} : vector<8x8xf32>, vector<8x8xf32>, vector<8x8xf32> -> vector<8x8xf32>
    %cst_106 = arith.constant 0.353553385 : f32
    %314 = vector.broadcast %cst_106 : f32 to vector<8x8xf32>
    %315 = arith.mulf %313, %314 : vector<8x8xf32>
    %316 = vector.broadcast %307 : vector<1x8xf32> to vector<8x8xf32>
    %317 = arith.addf %315, %316 : vector<8x8xf32>
    %cst_107 = arith.constant dense<0xFF800000> : vector<8xf32>
    %318 = vector.multi_reduction <maximumf>, %317, %cst_107 [1] : vector<8x8xf32> to vector<8xf32>
    %319 = vector.shape_cast %318 : vector<8xf32> to vector<8x1xf32>
    %320 = vector.broadcast %319 : vector<8x1xf32> to vector<8x8xf32>
    %321 = arith.subf %317, %320 : vector<8x8xf32>
    %322 = math.exp %321 : vector<8x8xf32>
    %cst_108 = arith.constant dense<0.000000e+00> : vector<8xf32>
    %323 = vector.multi_reduction <add>, %322, %cst_108 [1] : vector<8x8xf32> to vector<8xf32>
    %324 = vector.shape_cast %323 : vector<8xf32> to vector<8x1xf32>
    %325 = vector.broadcast %324 : vector<8x1xf32> to vector<8x8xf32>
    %326 = arith.divf %322, %325 : vector<8x8xf32>
    %cst_109 = arith.constant dense<0.000000e+00> : vector<8x8xf32>
    %327 = tpu.matmul %326, %311, %cst_109 {dimension_numbers = #tpu.dot_dimension_numbers<[1], [0], [0], [1], [0, 0, 1, 1], [], []>} : vector<8x8xf32>, vector<8x8xf32>, vector<8x8xf32> -> vector<8x8xf32>
    %328 = vector.extract_strided_slice %299 {offsets = [0, 0], sizes = [8, 32], strides = [1, 1]} : vector<32x32xf32> to vector<8x32xf32>
    %cst_110 = arith.constant dense<0.000000e+00> : vector<8x32xf32>
    %329 = tpu.matmul %327, %328, %cst_110 {dimension_numbers = #tpu.dot_dimension_numbers<[1], [0], [0], [1], [0, 0, 1, 1], [], []>} : vector<8x8xf32>, vector<8x32xf32>, vector<8x32xf32> -> vector<8x32xf32>
    %330 = vector.broadcast %308 : vector<1x32xf32> to vector<8x32xf32>
    %331 = arith.addf %330, %329 : vector<8x32xf32>
    %332 = vector.extract_strided_slice %305 {offsets = [0, 8], sizes = [8, 8], strides = [1, 1]} : vector<16x96xf32> to vector<8x8xf32>
    %333 = vector.extract_strided_slice %305 {offsets = [0, 40], sizes = [8, 8], strides = [1, 1]} : vector<16x96xf32> to vector<8x8xf32>
    %334 = vector.extract_strided_slice %305 {offsets = [0, 72], sizes = [8, 8], strides = [1, 1]} : vector<16x96xf32> to vector<8x8xf32>
    %335 = tpu.transpose %333, [1, 0] : vector<8x8xf32> -> vector<8x8xf32>
    %cst_111 = arith.constant dense<0.000000e+00> : vector<8x8xf32>
    %336 = tpu.matmul %332, %335, %cst_111 {dimension_numbers = #tpu.dot_dimension_numbers<[1], [0], [0], [1], [0, 0, 1, 1], [], []>} : vector<8x8xf32>, vector<8x8xf32>, vector<8x8xf32> -> vector<8x8xf32>
    %cst_112 = arith.constant 0.353553385 : f32
    %337 = vector.broadcast %cst_112 : f32 to vector<8x8xf32>
    %338 = arith.mulf %336, %337 : vector<8x8xf32>
    %339 = vector.broadcast %307 : vector<1x8xf32> to vector<8x8xf32>
    %340 = arith.addf %338, %339 : vector<8x8xf32>
    %cst_113 = arith.constant dense<0xFF800000> : vector<8xf32>
    %341 = vector.multi_reduction <maximumf>, %340, %cst_113 [1] : vector<8x8xf32> to vector<8xf32>
    %342 = vector.shape_cast %341 : vector<8xf32> to vector<8x1xf32>
    %343 = vector.broadcast %342 : vector<8x1xf32> to vector<8x8xf32>
    %344 = arith.subf %340, %343 : vector<8x8xf32>
    %345 = math.exp %344 : vector<8x8xf32>
    %cst_114 = arith.constant dense<0.000000e+00> : vector<8xf32>
    %346 = vector.multi_reduction <add>, %345, %cst_114 [1] : vector<8x8xf32> to vector<8xf32>
    %347 = vector.shape_cast %346 : vector<8xf32> to vector<8x1xf32>
    %348 = vector.broadcast %347 : vector<8x1xf32> to vector<8x8xf32>
    %349 = arith.divf %345, %348 : vector<8x8xf32>
    %cst_115 = arith.constant dense<0.000000e+00> : vector<8x8xf32>
    %350 = tpu.matmul %349, %334, %cst_115 {dimension_numbers = #tpu.dot_dimension_numbers<[1], [0], [0], [1], [0, 0, 1, 1], [], []>} : vector<8x8xf32>, vector<8x8xf32>, vector<8x8xf32> -> vector<8x8xf32>
    %351 = vector.extract_strided_slice %299 {offsets = [8, 0], sizes = [8, 32], strides = [1, 1]} : vector<32x32xf32> to vector<8x32xf32>
    %cst_116 = arith.constant dense<0.000000e+00> : vector<8x32xf32>
    %352 = tpu.matmul %350, %351, %cst_116 {dimension_numbers = #tpu.dot_dimension_numbers<[1], [0], [0], [1], [0, 0, 1, 1], [], []>} : vector<8x8xf32>, vector<8x32xf32>, vector<8x32xf32> -> vector<8x32xf32>
    %353 = arith.addf %331, %352 : vector<8x32xf32>
    %354 = vector.extract_strided_slice %305 {offsets = [0, 16], sizes = [8, 8], strides = [1, 1]} : vector<16x96xf32> to vector<8x8xf32>
    %355 = vector.extract_strided_slice %305 {offsets = [0, 48], sizes = [8, 8], strides = [1, 1]} : vector<16x96xf32> to vector<8x8xf32>
    %356 = vector.extract_strided_slice %305 {offsets = [0, 80], sizes = [8, 8], strides = [1, 1]} : vector<16x96xf32> to vector<8x8xf32>
    %357 = tpu.transpose %355, [1, 0] : vector<8x8xf32> -> vector<8x8xf32>
    %cst_117 = arith.constant dense<0.000000e+00> : vector<8x8xf32>
    %358 = tpu.matmul %354, %357, %cst_117 {dimension_numbers = #tpu.dot_dimension_numbers<[1], [0], [0], [1], [0, 0, 1, 1], [], []>} : vector<8x8xf32>, vector<8x8xf32>, vector<8x8xf32> -> vector<8x8xf32>
    %cst_118 = arith.constant 0.353553385 : f32
    %359 = vector.broadcast %cst_118 : f32 to vector<8x8xf32>
    %360 = arith.mulf %358, %359 : vector<8x8xf32>
    %361 = vector.broadcast %307 : vector<1x8xf32> to vector<8x8xf32>
    %362 = arith.addf %360, %361 : vector<8x8xf32>
    %cst_119 = arith.constant dense<0xFF800000> : vector<8xf32>
    %363 = vector.multi_reduction <maximumf>, %362, %cst_119 [1] : vector<8x8xf32> to vector<8xf32>
    %364 = vector.shape_cast %363 : vector<8xf32> to vector<8x1xf32>
    %365 = vector.broadcast %364 : vector<8x1xf32> to vector<8x8xf32>
    %366 = arith.subf %362, %365 : vector<8x8xf32>
    %367 = math.exp %366 : vector<8x8xf32>
    %cst_120 = arith.constant dense<0.000000e+00> : vector<8xf32>
    %368 = vector.multi_reduction <add>, %367, %cst_120 [1] : vector<8x8xf32> to vector<8xf32>
    %369 = vector.shape_cast %368 : vector<8xf32> to vector<8x1xf32>
    %370 = vector.broadcast %369 : vector<8x1xf32> to vector<8x8xf32>
    %371 = arith.divf %367, %370 : vector<8x8xf32>
    %cst_121 = arith.constant dense<0.000000e+00> : vector<8x8xf32>
    %372 = tpu.matmul %371, %356, %cst_121 {dimension_numbers = #tpu.dot_dimension_numbers<[1], [0], [0], [1], [0, 0, 1, 1], [], []>} : vector<8x8xf32>, vector<8x8xf32>, vector<8x8xf32> -> vector<8x8xf32>
    %373 = vector.extract_strided_slice %299 {offsets = [16, 0], sizes = [8, 32], strides = [1, 1]} : vector<32x32xf32> to vector<8x32xf32>
    %cst_122 = arith.constant dense<0.000000e+00> : vector<8x32xf32>
    %374 = tpu.matmul %372, %373, %cst_122 {dimension_numbers = #tpu.dot_dimension_numbers<[1], [0], [0], [1], [0, 0, 1, 1], [], []>} : vector<8x8xf32>, vector<8x32xf32>, vector<8x32xf32> -> vector<8x32xf32>
    %375 = arith.addf %353, %374 : vector<8x32xf32>
    %376 = vector.extract_strided_slice %305 {offsets = [0, 24], sizes = [8, 8], strides = [1, 1]} : vector<16x96xf32> to vector<8x8xf32>
    %377 = vector.extract_strided_slice %305 {offsets = [0, 56], sizes = [8, 8], strides = [1, 1]} : vector<16x96xf32> to vector<8x8xf32>
    %378 = vector.extract_strided_slice %305 {offsets = [0, 88], sizes = [8, 8], strides = [1, 1]} : vector<16x96xf32> to vector<8x8xf32>
    %379 = tpu.transpose %377, [1, 0] : vector<8x8xf32> -> vector<8x8xf32>
    %cst_123 = arith.constant dense<0.000000e+00> : vector<8x8xf32>
    %380 = tpu.matmul %376, %379, %cst_123 {dimension_numbers = #tpu.dot_dimension_numbers<[1], [0], [0], [1], [0, 0, 1, 1], [], []>} : vector<8x8xf32>, vector<8x8xf32>, vector<8x8xf32> -> vector<8x8xf32>
    %cst_124 = arith.constant 0.353553385 : f32
    %381 = vector.broadcast %cst_124 : f32 to vector<8x8xf32>
    %382 = arith.mulf %380, %381 : vector<8x8xf32>
    %383 = vector.broadcast %307 : vector<1x8xf32> to vector<8x8xf32>
    %384 = arith.addf %382, %383 : vector<8x8xf32>
    %cst_125 = arith.constant dense<0xFF800000> : vector<8xf32>
    %385 = vector.multi_reduction <maximumf>, %384, %cst_125 [1] : vector<8x8xf32> to vector<8xf32>
    %386 = vector.shape_cast %385 : vector<8xf32> to vector<8x1xf32>
    %387 = vector.broadcast %386 : vector<8x1xf32> to vector<8x8xf32>
    %388 = arith.subf %384, %387 : vector<8x8xf32>
    %389 = math.exp %388 : vector<8x8xf32>
    %cst_126 = arith.constant dense<0.000000e+00> : vector<8xf32>
    %390 = vector.multi_reduction <add>, %389, %cst_126 [1] : vector<8x8xf32> to vector<8xf32>
    %391 = vector.shape_cast %390 : vector<8xf32> to vector<8x1xf32>
    %392 = vector.broadcast %391 : vector<8x1xf32> to vector<8x8xf32>
    %393 = arith.divf %389, %392 : vector<8x8xf32>
    %cst_127 = arith.constant dense<0.000000e+00> : vector<8x8xf32>
    %394 = tpu.matmul %393, %378, %cst_127 {dimension_numbers = #tpu.dot_dimension_numbers<[1], [0], [0], [1], [0, 0, 1, 1], [], []>} : vector<8x8xf32>, vector<8x8xf32>, vector<8x8xf32> -> vector<8x8xf32>
    %395 = vector.extract_strided_slice %299 {offsets = [24, 0], sizes = [8, 32], strides = [1, 1]} : vector<32x32xf32> to vector<8x32xf32>
    %cst_128 = arith.constant dense<0.000000e+00> : vector<8x32xf32>
    %396 = tpu.matmul %394, %395, %cst_128 {dimension_numbers = #tpu.dot_dimension_numbers<[1], [0], [0], [1], [0, 0, 1, 1], [], []>} : vector<8x8xf32>, vector<8x32xf32>, vector<8x32xf32> -> vector<8x32xf32>
    %397 = arith.addf %375, %396 : vector<8x32xf32>
    %c1_129 = arith.constant 1 : index
    %c0_130 = arith.constant 0 : index
    %c0_131 = arith.constant 0 : index
    %398 = vector.load %arg1[%c1_129, %c0_130, %c0_131] : memref<2x1x8xf32, #tpu.memory_space<vmem>>, vector<1x1x8xf32>
    %399 = vector.shape_cast %398 : vector<1x1x8xf32> to vector<1x8xf32>
    %400 = vector.extract_strided_slice %301 {offsets = [1, 0], sizes = [1, 32], strides = [1, 1]} : vector<8x96xf32> to vector<1x32xf32>
    %401 = vector.extract_strided_slice %305 {offsets = [8, 0], sizes = [8, 8], strides = [1, 1]} : vector<16x96xf32> to vector<8x8xf32>
    %402 = vector.extract_strided_slice %305 {offsets = [8, 32], sizes = [8, 8], strides = [1, 1]} : vector<16x96xf32> to vector<8x8xf32>
    %403 = vector.extract_strided_slice %305 {offsets = [8, 64], sizes = [8, 8], strides = [1, 1]} : vector<16x96xf32> to vector<8x8xf32>
    %404 = tpu.transpose %402, [1, 0] : vector<8x8xf32> -> vector<8x8xf32>
    %cst_132 = arith.constant dense<0.000000e+00> : vector<8x8xf32>
    %405 = tpu.matmul %401, %404, %cst_132 {dimension_numbers = #tpu.dot_dimension_numbers<[1], [0], [0], [1], [0, 0, 1, 1], [], []>} : vector<8x8xf32>, vector<8x8xf32>, vector<8x8xf32> -> vector<8x8xf32>
    %cst_133 = arith.constant 0.353553385 : f32
    %406 = vector.broadcast %cst_133 : f32 to vector<8x8xf32>
    %407 = arith.mulf %405, %406 : vector<8x8xf32>
    %408 = vector.broadcast %399 : vector<1x8xf32> to vector<8x8xf32>
    %409 = arith.addf %407, %408 : vector<8x8xf32>
    %cst_134 = arith.constant dense<0xFF800000> : vector<8xf32>
    %410 = vector.multi_reduction <maximumf>, %409, %cst_134 [1] : vector<8x8xf32> to vector<8xf32>
    %411 = vector.shape_cast %410 : vector<8xf32> to vector<8x1xf32>
    %412 = vector.broadcast %411 : vector<8x1xf32> to vector<8x8xf32>
    %413 = arith.subf %409, %412 : vector<8x8xf32>
    %414 = math.exp %413 : vector<8x8xf32>
    %cst_135 = arith.constant dense<0.000000e+00> : vector<8xf32>
    %415 = vector.multi_reduction <add>, %414, %cst_135 [1] : vector<8x8xf32> to vector<8xf32>
    %416 = vector.shape_cast %415 : vector<8xf32> to vector<8x1xf32>
    %417 = vector.broadcast %416 : vector<8x1xf32> to vector<8x8xf32>
    %418 = arith.divf %414, %417 : vector<8x8xf32>
    %cst_136 = arith.constant dense<0.000000e+00> : vector<8x8xf32>
    %419 = tpu.matmul %418, %403, %cst_136 {dimension_numbers = #tpu.dot_dimension_numbers<[1], [0], [0], [1], [0, 0, 1, 1], [], []>} : vector<8x8xf32>, vector<8x8xf32>, vector<8x8xf32> -> vector<8x8xf32>
    %420 = vector.extract_strided_slice %299 {offsets = [0, 0], sizes = [8, 32], strides = [1, 1]} : vector<32x32xf32> to vector<8x32xf32>
    %cst_137 = arith.constant dense<0.000000e+00> : vector<8x32xf32>
    %421 = tpu.matmul %419, %420, %cst_137 {dimension_numbers = #tpu.dot_dimension_numbers<[1], [0], [0], [1], [0, 0, 1, 1], [], []>} : vector<8x8xf32>, vector<8x32xf32>, vector<8x32xf32> -> vector<8x32xf32>
    %422 = vector.broadcast %400 : vector<1x32xf32> to vector<8x32xf32>
    %423 = arith.addf %422, %421 : vector<8x32xf32>
    %424 = vector.extract_strided_slice %305 {offsets = [8, 8], sizes = [8, 8], strides = [1, 1]} : vector<16x96xf32> to vector<8x8xf32>
    %425 = vector.extract_strided_slice %305 {offsets = [8, 40], sizes = [8, 8], strides = [1, 1]} : vector<16x96xf32> to vector<8x8xf32>
    %426 = vector.extract_strided_slice %305 {offsets = [8, 72], sizes = [8, 8], strides = [1, 1]} : vector<16x96xf32> to vector<8x8xf32>
    %427 = tpu.transpose %425, [1, 0] : vector<8x8xf32> -> vector<8x8xf32>
    %cst_138 = arith.constant dense<0.000000e+00> : vector<8x8xf32>
    %428 = tpu.matmul %424, %427, %cst_138 {dimension_numbers = #tpu.dot_dimension_numbers<[1], [0], [0], [1], [0, 0, 1, 1], [], []>} : vector<8x8xf32>, vector<8x8xf32>, vector<8x8xf32> -> vector<8x8xf32>
    %cst_139 = arith.constant 0.353553385 : f32
    %429 = vector.broadcast %cst_139 : f32 to vector<8x8xf32>
    %430 = arith.mulf %428, %429 : vector<8x8xf32>
    %431 = vector.broadcast %399 : vector<1x8xf32> to vector<8x8xf32>
    %432 = arith.addf %430, %431 : vector<8x8xf32>
    %cst_140 = arith.constant dense<0xFF800000> : vector<8xf32>
    %433 = vector.multi_reduction <maximumf>, %432, %cst_140 [1] : vector<8x8xf32> to vector<8xf32>
    %434 = vector.shape_cast %433 : vector<8xf32> to vector<8x1xf32>
    %435 = vector.broadcast %434 : vector<8x1xf32> to vector<8x8xf32>
    %436 = arith.subf %432, %435 : vector<8x8xf32>
    %437 = math.exp %436 : vector<8x8xf32>
    %cst_141 = arith.constant dense<0.000000e+00> : vector<8xf32>
    %438 = vector.multi_reduction <add>, %437, %cst_141 [1] : vector<8x8xf32> to vector<8xf32>
    %439 = vector.shape_cast %438 : vector<8xf32> to vector<8x1xf32>
    %440 = vector.broadcast %439 : vector<8x1xf32> to vector<8x8xf32>
    %441 = arith.divf %437, %440 : vector<8x8xf32>
    %cst_142 = arith.constant dense<0.000000e+00> : vector<8x8xf32>
    %442 = tpu.matmul %441, %426, %cst_142 {dimension_numbers = #tpu.dot_dimension_numbers<[1], [0], [0], [1], [0, 0, 1, 1], [], []>} : vector<8x8xf32>, vector<8x8xf32>, vector<8x8xf32> -> vector<8x8xf32>
    %443 = vector.extract_strided_slice %299 {offsets = [8, 0], sizes = [8, 32], strides = [1, 1]} : vector<32x32xf32> to vector<8x32xf32>
    %cst_143 = arith.constant dense<0.000000e+00> : vector<8x32xf32>
    %444 = tpu.matmul %442, %443, %cst_143 {dimension_numbers = #tpu.dot_dimension_numbers<[1], [0], [0], [1], [0, 0, 1, 1], [], []>} : vector<8x8xf32>, vector<8x32xf32>, vector<8x32xf32> -> vector<8x32xf32>
    %445 = arith.addf %423, %444 : vector<8x32xf32>
    %446 = vector.extract_strided_slice %305 {offsets = [8, 16], sizes = [8, 8], strides = [1, 1]} : vector<16x96xf32> to vector<8x8xf32>
    %447 = vector.extract_strided_slice %305 {offsets = [8, 48], sizes = [8, 8], strides = [1, 1]} : vector<16x96xf32> to vector<8x8xf32>
    %448 = vector.extract_strided_slice %305 {offsets = [8, 80], sizes = [8, 8], strides = [1, 1]} : vector<16x96xf32> to vector<8x8xf32>
    %449 = tpu.transpose %447, [1, 0] : vector<8x8xf32> -> vector<8x8xf32>
    %cst_144 = arith.constant dense<0.000000e+00> : vector<8x8xf32>
    %450 = tpu.matmul %446, %449, %cst_144 {dimension_numbers = #tpu.dot_dimension_numbers<[1], [0], [0], [1], [0, 0, 1, 1], [], []>} : vector<8x8xf32>, vector<8x8xf32>, vector<8x8xf32> -> vector<8x8xf32>
    %cst_145 = arith.constant 0.353553385 : f32
    %451 = vector.broadcast %cst_145 : f32 to vector<8x8xf32>
    %452 = arith.mulf %450, %451 : vector<8x8xf32>
    %453 = vector.broadcast %399 : vector<1x8xf32> to vector<8x8xf32>
    %454 = arith.addf %452, %453 : vector<8x8xf32>
    %cst_146 = arith.constant dense<0xFF800000> : vector<8xf32>
    %455 = vector.multi_reduction <maximumf>, %454, %cst_146 [1] : vector<8x8xf32> to vector<8xf32>
    %456 = vector.shape_cast %455 : vector<8xf32> to vector<8x1xf32>
    %457 = vector.broadcast %456 : vector<8x1xf32> to vector<8x8xf32>
    %458 = arith.subf %454, %457 : vector<8x8xf32>
    %459 = math.exp %458 : vector<8x8xf32>
    %cst_147 = arith.constant dense<0.000000e+00> : vector<8xf32>
    %460 = vector.multi_reduction <add>, %459, %cst_147 [1] : vector<8x8xf32> to vector<8xf32>
    %461 = vector.shape_cast %460 : vector<8xf32> to vector<8x1xf32>
    %462 = vector.broadcast %461 : vector<8x1xf32> to vector<8x8xf32>
    %463 = arith.divf %459, %462 : vector<8x8xf32>
    %cst_148 = arith.constant dense<0.000000e+00> : vector<8x8xf32>
    %464 = tpu.matmul %463, %448, %cst_148 {dimension_numbers = #tpu.dot_dimension_numbers<[1], [0], [0], [1], [0, 0, 1, 1], [], []>} : vector<8x8xf32>, vector<8x8xf32>, vector<8x8xf32> -> vector<8x8xf32>
    %465 = vector.extract_strided_slice %299 {offsets = [16, 0], sizes = [8, 32], strides = [1, 1]} : vector<32x32xf32> to vector<8x32xf32>
    %cst_149 = arith.constant dense<0.000000e+00> : vector<8x32xf32>
    %466 = tpu.matmul %464, %465, %cst_149 {dimension_numbers = #tpu.dot_dimension_numbers<[1], [0], [0], [1], [0, 0, 1, 1], [], []>} : vector<8x8xf32>, vector<8x32xf32>, vector<8x32xf32> -> vector<8x32xf32>
    %467 = arith.addf %445, %466 : vector<8x32xf32>
    %468 = vector.extract_strided_slice %305 {offsets = [8, 24], sizes = [8, 8], strides = [1, 1]} : vector<16x96xf32> to vector<8x8xf32>
    %469 = vector.extract_strided_slice %305 {offsets = [8, 56], sizes = [8, 8], strides = [1, 1]} : vector<16x96xf32> to vector<8x8xf32>
    %470 = vector.extract_strided_slice %305 {offsets = [8, 88], sizes = [8, 8], strides = [1, 1]} : vector<16x96xf32> to vector<8x8xf32>
    %471 = tpu.transpose %469, [1, 0] : vector<8x8xf32> -> vector<8x8xf32>
    %cst_150 = arith.constant dense<0.000000e+00> : vector<8x8xf32>
    %472 = tpu.matmul %468, %471, %cst_150 {dimension_numbers = #tpu.dot_dimension_numbers<[1], [0], [0], [1], [0, 0, 1, 1], [], []>} : vector<8x8xf32>, vector<8x8xf32>, vector<8x8xf32> -> vector<8x8xf32>
    %cst_151 = arith.constant 0.353553385 : f32
    %473 = vector.broadcast %cst_151 : f32 to vector<8x8xf32>
    %474 = arith.mulf %472, %473 : vector<8x8xf32>
    %475 = vector.broadcast %399 : vector<1x8xf32> to vector<8x8xf32>
    %476 = arith.addf %474, %475 : vector<8x8xf32>
    %cst_152 = arith.constant dense<0xFF800000> : vector<8xf32>
    %477 = vector.multi_reduction <maximumf>, %476, %cst_152 [1] : vector<8x8xf32> to vector<8xf32>
    %478 = vector.shape_cast %477 : vector<8xf32> to vector<8x1xf32>
    %479 = vector.broadcast %478 : vector<8x1xf32> to vector<8x8xf32>
    %480 = arith.subf %476, %479 : vector<8x8xf32>
    %481 = math.exp %480 : vector<8x8xf32>
    %cst_153 = arith.constant dense<0.000000e+00> : vector<8xf32>
    %482 = vector.multi_reduction <add>, %481, %cst_153 [1] : vector<8x8xf32> to vector<8xf32>
    %483 = vector.shape_cast %482 : vector<8xf32> to vector<8x1xf32>
    %484 = vector.broadcast %483 : vector<8x1xf32> to vector<8x8xf32>
    %485 = arith.divf %481, %484 : vector<8x8xf32>
    %cst_154 = arith.constant dense<0.000000e+00> : vector<8x8xf32>
    %486 = tpu.matmul %485, %470, %cst_154 {dimension_numbers = #tpu.dot_dimension_numbers<[1], [0], [0], [1], [0, 0, 1, 1], [], []>} : vector<8x8xf32>, vector<8x8xf32>, vector<8x8xf32> -> vector<8x8xf32>
    %487 = vector.extract_strided_slice %299 {offsets = [24, 0], sizes = [8, 32], strides = [1, 1]} : vector<32x32xf32> to vector<8x32xf32>
    %cst_155 = arith.constant dense<0.000000e+00> : vector<8x32xf32>
    %488 = tpu.matmul %486, %487, %cst_155 {dimension_numbers = #tpu.dot_dimension_numbers<[1], [0], [0], [1], [0, 0, 1, 1], [], []>} : vector<8x8xf32>, vector<8x32xf32>, vector<8x32xf32> -> vector<8x32xf32>
    %489 = arith.addf %467, %488 : vector<8x32xf32>
    %490 = tpu.concatenate %397, %489 in 0 : vector<8x32xf32>, vector<8x32xf32> -> vector<16x32xf32>
    %491 = arith.addf %295, %490 : vector<16x32xf32>
    %492 = vector.extract_strided_slice %301 {offsets = [2, 0], sizes = [1, 32], strides = [1, 1]} : vector<8x96xf32> to vector<1x32xf32>
    %493 = vector.extract_strided_slice %301 {offsets = [3, 0], sizes = [1, 32], strides = [1, 1]} : vector<8x96xf32> to vector<1x32xf32>
    %cst_156 = arith.constant dense<0.000000e+00> : vector<16xf32>
    %494 = vector.multi_reduction <add>, %491, %cst_156 [1] : vector<16x32xf32> to vector<16xf32>
    %495 = vector.shape_cast %494 : vector<16xf32> to vector<16x1xf32>
    %cst_157 = arith.constant 3.200000e+01 : f32
    %496 = vector.broadcast %cst_157 : f32 to vector<16x1xf32>
    %497 = arith.divf %495, %496 : vector<16x1xf32>
    %498 = vector.broadcast %497 : vector<16x1xf32> to vector<16x32xf32>
    %499 = arith.subf %491, %498 : vector<16x32xf32>
    %500 = arith.mulf %499, %499 : vector<16x32xf32>
    %cst_158 = arith.constant dense<0.000000e+00> : vector<16xf32>
    %501 = vector.multi_reduction <add>, %500, %cst_158 [1] : vector<16x32xf32> to vector<16xf32>
    %502 = vector.shape_cast %501 : vector<16xf32> to vector<16x1xf32>
    %cst_159 = arith.constant 3.200000e+01 : f32
    %503 = vector.broadcast %cst_159 : f32 to vector<16x1xf32>
    %504 = arith.divf %502, %503 : vector<16x1xf32>
    %505 = vector.broadcast %497 : vector<16x1xf32> to vector<16x32xf32>
    %506 = arith.subf %491, %505 : vector<16x32xf32>
    %cst_160 = arith.constant 9.99999996E-13 : f32
    %507 = vector.broadcast %cst_160 : f32 to vector<16x1xf32>
    %508 = arith.addf %504, %507 : vector<16x1xf32>
    %509 = math.rsqrt %508 : vector<16x1xf32>
    %510 = vector.broadcast %509 : vector<16x1xf32> to vector<16x32xf32>
    %511 = arith.mulf %506, %510 : vector<16x32xf32>
    %512 = vector.broadcast %492 : vector<1x32xf32> to vector<16x32xf32>
    %513 = arith.mulf %511, %512 : vector<16x32xf32>
    %514 = vector.broadcast %493 : vector<1x32xf32> to vector<16x32xf32>
    %515 = arith.addf %513, %514 : vector<16x32xf32>
    %c1_161 = arith.constant 1 : index
    %c0_162 = arith.constant 0 : index
    %c0_163 = arith.constant 0 : index
    %516 = vector.load %arg4[%c1_161, %c0_162, %c0_163] : memref<2x32x64xf32, #tpu.memory_space<vmem>>, vector<1x32x64xf32>
    %517 = vector.shape_cast %516 : vector<1x32x64xf32> to vector<32x64xf32>
    %cst_164 = arith.constant dense<0.000000e+00> : vector<16x64xf32>
    %518 = tpu.matmul %515, %517, %cst_164 {dimension_numbers = #tpu.dot_dimension_numbers<[1], [0], [0], [1], [0, 0, 1, 1], [], []>} : vector<16x32xf32>, vector<32x64xf32>, vector<16x64xf32> -> vector<16x64xf32>
    %519 = vector.extract_strided_slice %301 {offsets = [4, 0], sizes = [1, 64], strides = [1, 1]} : vector<8x96xf32> to vector<1x64xf32>
    %520 = vector.broadcast %519 : vector<1x64xf32> to vector<16x64xf32>
    %521 = arith.addf %518, %520 : vector<16x64xf32>
    %522 = arith.mulf %521, %521 : vector<16x64xf32>
    %523 = arith.mulf %521, %522 : vector<16x64xf32>
    %cst_165 = arith.constant 4.471500e-02 : f32
    %524 = vector.broadcast %cst_165 : f32 to vector<16x64xf32>
    %525 = arith.mulf %524, %523 : vector<16x64xf32>
    %526 = arith.addf %521, %525 : vector<16x64xf32>
    %cst_166 = arith.constant 0.797884583 : f32
    %527 = vector.broadcast %cst_166 : f32 to vector<16x64xf32>
    %528 = arith.mulf %527, %526 : vector<16x64xf32>
    %529 = math.tanh %528 : vector<16x64xf32>
    %cst_167 = arith.constant 1.000000e+00 : f32
    %530 = vector.broadcast %cst_167 : f32 to vector<16x64xf32>
    %531 = arith.addf %530, %529 : vector<16x64xf32>
    %cst_168 = arith.constant 5.000000e-01 : f32
    %532 = vector.broadcast %cst_168 : f32 to vector<16x64xf32>
    %533 = arith.mulf %532, %531 : vector<16x64xf32>
    %534 = arith.mulf %521, %533 : vector<16x64xf32>
    %c1_169 = arith.constant 1 : index
    %c0_170 = arith.constant 0 : index
    %c0_171 = arith.constant 0 : index
    %535 = vector.load %arg5[%c1_169, %c0_170, %c0_171] : memref<2x64x32xf32, #tpu.memory_space<vmem>>, vector<1x64x32xf32>
    %536 = vector.shape_cast %535 : vector<1x64x32xf32> to vector<64x32xf32>
    %cst_172 = arith.constant dense<0.000000e+00> : vector<16x32xf32>
    %537 = tpu.matmul %534, %536, %cst_172 {dimension_numbers = #tpu.dot_dimension_numbers<[1], [0], [0], [1], [0, 0, 1, 1], [], []>} : vector<16x64xf32>, vector<64x32xf32>, vector<16x32xf32> -> vector<16x32xf32>
    %538 = vector.extract_strided_slice %301 {offsets = [5, 0], sizes = [1, 32], strides = [1, 1]} : vector<8x96xf32> to vector<1x32xf32>
    %539 = vector.broadcast %538 : vector<1x32xf32> to vector<16x32xf32>
    %540 = arith.addf %537, %539 : vector<16x32xf32>
    %541 = arith.addf %515, %540 : vector<16x32xf32>
    %542 = vector.extract_strided_slice %301 {offsets = [6, 0], sizes = [1, 32], strides = [1, 1]} : vector<8x96xf32> to vector<1x32xf32>
    %543 = vector.extract_strided_slice %301 {offsets = [7, 0], sizes = [1, 32], strides = [1, 1]} : vector<8x96xf32> to vector<1x32xf32>
    %cst_173 = arith.constant dense<0.000000e+00> : vector<16xf32>
    %544 = vector.multi_reduction <add>, %541, %cst_173 [1] : vector<16x32xf32> to vector<16xf32>
    %545 = vector.shape_cast %544 : vector<16xf32> to vector<16x1xf32>
    %cst_174 = arith.constant 3.200000e+01 : f32
    %546 = vector.broadcast %cst_174 : f32 to vector<16x1xf32>
    %547 = arith.divf %545, %546 : vector<16x1xf32>
    %548 = vector.broadcast %547 : vector<16x1xf32> to vector<16x32xf32>
    %549 = arith.subf %541, %548 : vector<16x32xf32>
    %550 = arith.mulf %549, %549 : vector<16x32xf32>
    %cst_175 = arith.constant dense<0.000000e+00> : vector<16xf32>
    %551 = vector.multi_reduction <add>, %550, %cst_175 [1] : vector<16x32xf32> to vector<16xf32>
    %552 = vector.shape_cast %551 : vector<16xf32> to vector<16x1xf32>
    %cst_176 = arith.constant 3.200000e+01 : f32
    %553 = vector.broadcast %cst_176 : f32 to vector<16x1xf32>
    %554 = arith.divf %552, %553 : vector<16x1xf32>
    %555 = vector.broadcast %547 : vector<16x1xf32> to vector<16x32xf32>
    %556 = arith.subf %541, %555 : vector<16x32xf32>
    %cst_177 = arith.constant 9.99999996E-13 : f32
    %557 = vector.broadcast %cst_177 : f32 to vector<16x1xf32>
    %558 = arith.addf %554, %557 : vector<16x1xf32>
    %559 = math.rsqrt %558 : vector<16x1xf32>
    %560 = vector.broadcast %559 : vector<16x1xf32> to vector<16x32xf32>
    %561 = arith.mulf %556, %560 : vector<16x32xf32>
    %562 = vector.broadcast %542 : vector<1x32xf32> to vector<16x32xf32>
    %563 = arith.mulf %561, %562 : vector<16x32xf32>
    %564 = vector.broadcast %543 : vector<1x32xf32> to vector<16x32xf32>
    %565 = arith.addf %563, %564 : vector<16x32xf32>
    %566 = vector.extract_strided_slice %565 {offsets = [0, 0], sizes = [1, 32], strides = [1, 1]} : vector<16x32xf32> to vector<1x32xf32>
    %567 = vector.extract_strided_slice %565 {offsets = [8, 0], sizes = [1, 32], strides = [1, 1]} : vector<16x32xf32> to vector<1x32xf32>
    %568 = tpu.concatenate %566, %567 in 0 : vector<1x32xf32>, vector<1x32xf32> -> vector<2x32xf32>
    %c0_178 = arith.constant 0 : index
    %c0_179 = arith.constant 0 : index
    %569 = vector.load %arg8[%c0_178, %c0_179] : memref<32x32xf32, #tpu.memory_space<vmem>>, vector<32x32xf32>
    %cst_180 = arith.constant dense<0.000000e+00> : vector<2x32xf32>
    %570 = tpu.matmul %568, %569, %cst_180 {dimension_numbers = #tpu.dot_dimension_numbers<[1], [0], [0], [1], [0, 0, 1, 1], [], []>} : vector<2x32xf32>, vector<32x32xf32>, vector<2x32xf32> -> vector<2x32xf32>
    %571 = vector.extract_strided_slice %0 {offsets = [2, 0], sizes = [1, 32], strides = [1, 1]} : vector<6x32xf32> to vector<1x32xf32>
    %572 = vector.broadcast %571 : vector<1x32xf32> to vector<2x32xf32>
    %573 = arith.addf %570, %572 : vector<2x32xf32>
    %574 = math.tanh %573 : vector<2x32xf32>
    %c0_181 = arith.constant 0 : index
    %c0_182 = arith.constant 0 : index
    %575 = vector.load %arg9[%c0_181, %c0_182] : memref<32x16xf32, #tpu.memory_space<vmem>>, vector<32x16xf32>
    %cst_183 = arith.constant dense<0.000000e+00> : vector<2x16xf32>
    %576 = tpu.matmul %574, %575, %cst_183 {dimension_numbers = #tpu.dot_dimension_numbers<[1], [0], [0], [1], [0, 0, 1, 1], [], []>} : vector<2x32xf32>, vector<32x16xf32>, vector<2x16xf32> -> vector<2x16xf32>
    %577 = vector.extract_strided_slice %0 {offsets = [3, 0], sizes = [1, 16], strides = [1, 1]} : vector<6x32xf32> to vector<1x16xf32>
    %578 = vector.broadcast %577 : vector<1x16xf32> to vector<2x16xf32>
    %579 = arith.addf %576, %578 : vector<2x16xf32>
    %580 = vector.extract_strided_slice %0 {offsets = [4, 0], sizes = [1, 16], strides = [1, 1]} : vector<6x32xf32> to vector<1x16xf32>
    %581 = vector.extract_strided_slice %0 {offsets = [5, 0], sizes = [1, 16], strides = [1, 1]} : vector<6x32xf32> to vector<1x16xf32>
    %cst_184 = arith.constant dense<0.000000e+00> : vector<2xf32>
    %582 = vector.multi_reduction <add>, %579, %cst_184 [1] : vector<2x16xf32> to vector<2xf32>
    %583 = vector.shape_cast %582 : vector<2xf32> to vector<2x1xf32>
    %cst_185 = arith.constant 1.600000e+01 : f32
    %584 = vector.broadcast %cst_185 : f32 to vector<2x1xf32>
    %585 = arith.divf %583, %584 : vector<2x1xf32>
    %586 = vector.broadcast %585 : vector<2x1xf32> to vector<2x16xf32>
    %587 = arith.subf %579, %586 : vector<2x16xf32>
    %588 = arith.mulf %587, %587 : vector<2x16xf32>
    %cst_186 = arith.constant dense<0.000000e+00> : vector<2xf32>
    %589 = vector.multi_reduction <add>, %588, %cst_186 [1] : vector<2x16xf32> to vector<2xf32>
    %590 = vector.shape_cast %589 : vector<2xf32> to vector<2x1xf32>
    %cst_187 = arith.constant 1.600000e+01 : f32
    %591 = vector.broadcast %cst_187 : f32 to vector<2x1xf32>
    %592 = arith.divf %590, %591 : vector<2x1xf32>
    %593 = vector.broadcast %585 : vector<2x1xf32> to vector<2x16xf32>
    %594 = arith.subf %579, %593 : vector<2x16xf32>
    %cst_188 = arith.constant 9.99999996E-13 : f32
    %595 = vector.broadcast %cst_188 : f32 to vector<2x1xf32>
    %596 = arith.addf %592, %595 : vector<2x1xf32>
    %597 = math.rsqrt %596 : vector<2x1xf32>
    %598 = vector.broadcast %597 : vector<2x1xf32> to vector<2x16xf32>
    %599 = arith.mulf %594, %598 : vector<2x16xf32>
    %600 = vector.broadcast %580 : vector<1x16xf32> to vector<2x16xf32>
    %601 = arith.mulf %599, %600 : vector<2x16xf32>
    %602 = vector.broadcast %581 : vector<1x16xf32> to vector<2x16xf32>
    %603 = arith.addf %601, %602 : vector<2x16xf32>
    %c0_189 = arith.constant 0 : index
    %c0_190 = arith.constant 0 : index
    %604 = vector.load %arg10[%c0_189, %c0_190] : memref<2x16xf32, #tpu.memory_space<vmem>>, vector<2x16xf32>
    tpu.vector_store %arg10[%c0_189, %c0_190], %603 {strides = array<i32>} : memref<2x16xf32, #tpu.memory_space<vmem>>, vector<2x16xf32>,
    return
  }
}

</mosaic_0001>

<bundles_post_ra>
// kernel: text_encoder_forward.1
= control target key start
LH: loop header
LB: loop body
LE: loop exit
PB: predicated region body
PF: predicated region fallthrough
CT: control target
= control target key end

     0   :  { %vm39_vm0 = vcmask 261120   ;;  %s3244_s0 = inlined_call_operand.vmem [shape: f32[16,32], index: 0, kind: input, shape index: {}]   ;;  %s3245_s1 = inlined_call_operand.vmem [shape: f32[2,1,8], index: 1, kind: input, shape index: {}]   ;;  %s3246_s2 = inlined_call_operand.vmem [shape: f32[2,32,96], index: 2, kind: input, shape index: {}]   ;;  %s3247_s3 = inlined_call_operand.vmem [shape: f32[2,32,32], index: 3, kind: input, shape index: {}]   ;;  %s3248_s4 = inlined_call_operand.vmem [shape: f32[2,32,64], index: 4, kind: input, shape index: {}]   ;;  %s3249_s5 = inlined_call_operand.vmem [shape: f32[2,64,32], index: 5, kind: input, shape index: {}]   ;;  %s3250_s6 = inlined_call_operand.vmem [shape: f32[2,8,96], index: 6, kind: input, shape index: {}]   ;;  %s3251_s7 = inlined_call_operand.vmem [shape: f32[6,32], index: 7, kind: input, shape index: {}]   ;;  %s3252_s8 = inlined_call_operand.vmem [shape: f32[32,32], index: 8, kind: input, shape index: {}]   ;;  %s3253_s9 = inlined_call_operand.vmem [shape: f32[32,16], index: 9, kind: input, shape index: {}]   ;;  %s3254_s10 = inlined_call_operand.hbm [shape: f32[2,16], index: 10, kind: output, shape index: {}]  }
   0x1   :  { %v37_v0 = vld [vmem:[%s3244_s0] sm:$0xff]  ;;  %v38_v1 = vld [vmem:[%s3244_s0 + $0x8] sm:$0xff] }
   0x2   :  { %v40_v2 = vsel %vm39_vm0, %v37_v0, 0.0  ;;  %v43_v3 = vsel %vm39_vm0, %v38_v1, 0.0 }
   0x3   :  { %15 = vsyncpa [#allocation3], 0  ;;  %41 = vadd.xlane.f32.xlu0 %v40_v2  ;;  %44 = vadd.xlane.f32.xlu1 %v43_v3  ;;  %v2601_v4 = vmov 32.0   ;;  %v100_v21 = vld [vmem:[%s3246_s2 + $0x18] sm:$0xff]  ;;  %v99_v22 = vld [vmem:[%s3246_s2 + $0x10] sm:$0xff]  ;;  %s2602_s28 = smov 88  }
   0x4   :  { %2470 = vrcp.f32 %v2601_v4  ;;  %125 = vmatpush.msra.mxu0 %v100_v21  ;;  %v98_v23 = vld [vmem:[%s3246_s2 + $0x8] sm:$0xff]  ;;  %v97_v24 = vld [vmem:[%s3246_s2] sm:$0xff]  ;;  %s2603_s29 = smov 64   ;;  %s2604_s30 = smov 96   ;;  %vm140_vm8 = vcmask 64512  }
   0x5   :  { %v36_v40 = vld [vmem:[%s3251_s7] sm:$0x3f]  ;;  %s2605_s11 = smov 80   ;;  %s2606_s12 = smov 120  }
   0x6   :  { %126 = vmatpush.msra.mxu0 %v99_v22  ;;  %v91_v43 = vperm.slane %v36_v40, 0  ;;  %v94_v47 = vperm.slane %v36_v40, 1  ;;  %v2712_v54 = vld [vmem:[%s3250_s6] sm:$0xff]  ;;  %s2607_s13 = smov 72   ;;  %s2608_s16 = smov 112  }
   0x7   :  { %v106_v55 = vperm.slane %v2712_v54, 0  ;;  %s2609_s0 = smov 104   ;;  %s2610_s19 = smov 40  }
   0x8   :  { %127 = vmatpush.msra.mxu0 %v98_v23  ;;  %s2611_s20 = smov 56   ;;  %s2612_s21 = smov 48  }
   0x9   :  { %s2345_s17 = sshll.u32 %s3254_s10, 4  ;;  %s2346_s17 = int_to_ptr.hbm [resolvable:$true] %s2345_s17 }
   0xa   :  { %v2471_v5 = vpop.eup %2470  ;;  %128 = vmatpush.msra.mxu0 %v97_v24 }
   0xb   :  { %v47_v6 = vmul.f32 32.0, %v2471_v5  ;;  %vm51_vm1 = vweird.f32 %v2471_v5 }
   0xd   :  { %v48_v7 = vsub.f32 1.0, %v47_v6 }
   0xf   :  { %v49_v8 = vmul.f32 %v2471_v5, %v48_v7 }
  0x11   :  { %v50_v9 = vadd.f32 %v2471_v5, %v49_v8 }
  0x13   :  { %v2678_v10 = vsel %vm51_vm1, %v2471_v5, %v50_v9 }
  0x76   :  { %v42_v11 = vpop.xlane.xlu0 %41  ;;  %v45_v12 = vpop.xlane.xlu1 %44 }
  0x77   :  { %v53_v13 = vmul.f32 %v2678_v10, %v42_v11  ;;  %v54_v14 = vmul.f32 %v2678_v10, %v45_v12 }
  0x79   :  { %v55_v15 = vsub.f32 %v37_v0, %v53_v13  ;;  %v56_v16 = vsub.f32 %v38_v1, %v54_v14  ;;  %v2468_v0 = vld [vmem:[%s3245_s1] ss:$0 sm:$0xff] }
  0x7b   :  { %v57_v17 = vmul.f32 %v55_v15, %v55_v15  ;;  %v58_v18 = vmul.f32 %v56_v16, %v56_v16 }
  0x7d   :  { %v59_v19 = vsel %vm39_vm0, %v57_v17, 0.0  ;;  %v62_v20 = vsel %vm39_vm0, %v58_v18, 0.0 }
  0x7e   :  { %60 = vadd.xlane.f32.xlu0 %v59_v19  ;;  %63 = vadd.xlane.f32.xlu1 %v62_v20 }
  0xf1   :  { %v61_v25 = vpop.xlane.xlu0 %60  ;;  %v64_v26 = vpop.xlane.xlu1 %63 }
  0xf2   :  { %v65_v27 = vmul.f32 %v61_v25, %v2678_v10  ;;  %v66_v28 = vmul.f32 %v64_v26, %v2678_v10  ;;  %v101_v26 = vld [vmem:[%s3247_s3] sm:$0xff] }
  0xf3   :  { %238 = vmatpush.msra.mxu3 %v101_v26 }
  0xf4   :  { %v67_v29 = vadd.f32 1e-12, %v65_v27  ;;  %v68_v30 = vadd.f32 1e-12, %v66_v28 }
  0xf6   :  { %2472 = vrsqrt.f32 %v67_v29  ;;  %vm85_vm2 = vweird.f32 %v68_v30  ;;  %vm75_vm5 = vweird.f32 %v67_v29 }
  0xf7   :  { %2474 = vrsqrt.f32 %v68_v30 }
  0xfc   :  { %v2473_v31 = vpop.eup %2472 }
  0xfd   :  { %v2475_v32 = vpop.eup %2474  ;;  %v70_v33 = vmul.f32 %v2473_v31, %v67_v29  ;;  %vm76_vm4 = vweird.f32 %v2473_v31 }
  0xfe   :  { %v80_v34 = vmul.f32 %v2475_v32, %v68_v30  ;;  %vm86_vm3 = vweird.f32 %v2475_v32  ;;  %vm77_vm7 = vmor %vm75_vm5, %vm76_vm4 }
  0xff   :  { %v71_v35 = vmul.f32 %v2473_v31, %v70_v33  ;;  %vm87_vm6 = vmor %vm85_vm2, %vm86_vm3 }
 0x100   :  { %v81_v36 = vmul.f32 %v2475_v32, %v80_v34 }
 0x101   :  { %v72_v37 = vmul.f32 0.5, %v71_v35 }
 0x102   :  { %v82_v38 = vmul.f32 0.5, %v81_v36 }
 0x103   :  { %v73_v39 = vsub.f32 1.5, %v72_v37 }
 0x104   :  { %v83_v41 = vsub.f32 1.5, %v82_v38 }
 0x105   :  { %v74_v42 = vmul.f32 %v2473_v31, %v73_v39 }
 0x106   :  { %v84_v44 = vmul.f32 %v2475_v32, %v83_v41 }
 0x107   :  { %v78_v45 = vsel %vm77_vm7, %v2473_v31, %v74_v42 }
 0x108   :  { %v89_v46 = vmul.f32 %v78_v45, %v55_v15  ;;  %v88_v48 = vsel %vm87_vm6, %v2475_v32, %v84_v44 }
 0x109   :  { %v90_v50 = vmul.f32 %v88_v48, %v56_v16 }
 0x10a   :  { %v92_v49 = vmul.f32 %v91_v43, %v89_v46 }
 0x10b   :  { %v93_v52 = vmul.f32 %v91_v43, %v90_v50 }
 0x10c   :  { %v2701_v51 = vadd.f32 %v94_v47, %v92_v49 }
 0x10d   :  { %v2705_v53 = vadd.f32 %v94_v47, %v93_v52 }
 0x10e   :  { %2354 = vmatmul.msk.f32.vlgmr.msra.gmra.mxu0 %vm39_vm0, %v2701_v51 }
 0x116   :  { %2355 = vmatmul.msk.f32.gmra.mxu0 %vm39_vm0, %v2705_v53 }
 0x18b   :  { %v130_v56 = vpop.f32.mrf.mxu0 }
 0x18c   :  { %v2717_v57 = vadd.f32 %v130_v56, %v106_v55 }
 0x18e   :  { %247 = vrot.lane.b32.xlu0 %v2717_v57, %s2602_s28  ;;  %194 = vrot.lane.b32.xlu1 %v2717_v57, %s2603_s29 }
 0x18f   :  { %138 = vrot.lane.b32.xlu2 %v2717_v57, %s2604_s30 }
 0x193   :  { %v2736_v63 = vpop.f32.mrf.mxu0 }
 0x194   :  { %v2764_v40 = vadd.f32 %v2736_v63, %v106_v55 }
 0x196   :  { %351 = vrot.lane.b32.xlu0 %v2717_v57, %s2605_s11  ;;  %245 = vrot.lane.b32.xlu1 %v2717_v57, %s2606_s12 }
 0x19e   :  { %455 = vrot.lane.b32.xlu1 %v2717_v57, %s2607_s13 }
 0x1e9   :  { %v139_v58 = vpop.permute.xlu2 %138 }
 0x1ea   :  { %2356 = vmatpush.xpose.msk.msrb.mxu0 %vm140_vm8, %v139_v58 }
 0x1ed   :  { %2357 = vmatmul.msk.f32.vlgmr.msrb.gmra.mxu0 %vm140_vm8, %v2717_v57 }
 0x200   :  { %v248_v59 = vpop.permute.xlu0 %247  ;;  %v195_v60 = vpop.permute.xlu1 %194 }
 0x201   :  { %215 = vmatpush.msra.mxu2 %v195_v60 }
 0x203   :  { %2360 = vmatpush.xpose.msk.msrb.mxu2 %vm140_vm8, %v248_v59 }
 0x208   :  { %v246_v61 = vpop.permute.xlu1 %245  ;;  %v352_v11 = vpop.permute.xlu0 %351 }
 0x210   :  { %v456_v62 = vpop.permute.xlu1 %455 }
 0x211   :  { %2368 = vmatpush.xpose.msk.msra.mxu0 %vm140_vm8, %v456_v62 }
 0x26a   :  { %v162_v1 = vpop.f32.mrf.mxu0 }
 0x26b   :  { %v165_v2 = vmul.f32 0.35355338, %v162_v1 }
 0x26d   :  { %v169_v3 = vadd.f32 %v2468_v0, %v165_v2 }
 0x26f   :  { %v170_v4 = vsel %vm140_vm8, %v169_v3, -inf }
 0x270   :  { %171 = vmax.xlane.f32.xlu2 %v170_v4 }
 0x288   :  { %349 = vrot.lane.b32.xlu2 %v2717_v57, %s2608_s16 }
 0x2e3   :  { %v172_v5 = vpop.xlane.xlu2 %171 }
 0x2e4   :  { %v173_v6 = vsub.f32 %v169_v3, %v172_v5 }
 0x2e6   :  { %v174_v7 = vmul.f32 1.442695, %v173_v6 }
 0x2e8   :  { %2476 = vpow2.f32 %v174_v7 }
 0x2eb   :  { %v350_v25 = vpop.permute.xlu2 %349 }
 0x2ee   :  { %v2477_v8 = vpop.eup %2476 }
 0x2ef   :  { %v176_v9 = vsel %vm140_vm8, %v2477_v8, 0.0 }
 0x2f0   :  { %177 = vadd.xlane.f32.xlu0 %v176_v9 }
 0x304   :  { %453 = vrot.lane.b32.xlu0 %v2717_v57, %s2609_s0 }
 0x363   :  { %v178_v12 = vpop.xlane.xlu0 %177 }
 0x364   :  { %2478 = vrcp.f32 %v178_v12  ;;  %v190_v16 = vand.u32 2147483648, %v178_v12  ;;  %v188_v18 = vand.u32 2147483647, %v178_v12  ;;  %vm184_vm10 = vweird.f32 %v178_v12 }
 0x366   :  { %v191_v20 = vor.u32 1.1754944e-38, %v190_v16  ;;  %vm189_vm12 = vcmp.eq.f32.partialorder %v188_v18, 8.507059e+37 }
 0x36a   :  { %v2479_v13 = vpop.eup %2478 }
 0x36b   :  { %v180_v14 = vmul.f32 %v2479_v13, %v178_v12  ;;  %vm185_vm9 = vweird.f32 %v2479_v13 }
 0x36c   :  { %vm186_vm11 = vmor %vm184_vm10, %vm185_vm9 }
 0x36d   :  { %v181_v15 = vsub.f32 1.0, %v180_v14 }
 0x36f   :  { %v182_v17 = vmul.f32 %v2479_v13, %v181_v15 }
 0x371   :  { %v183_v19 = vadd.f32 %v2479_v13, %v182_v17 }
 0x373   :  { %v187_v21 = vsel %vm186_vm11, %v2479_v13, %v183_v19 }
 0x374   :  { %v192_v22 = vsel %vm189_vm12, %v191_v20, %v187_v21 }
 0x375   :  { %v193_v23 = vmul.f32 %v2477_v8, %v192_v22 }
 0x376   :  { %v454_v24 = vpop.permute.xlu0 %453 }
 0x377   :  { %2358 = vmatmul.msk.f32.vlgmr.msra.gmra.mxu2 %vm140_vm8, %v193_v23  ;;  %2369 = vmatmul.msk.f32.vlgmr.msra.gmra.mxu0 %vm140_vm8, %v454_v24 }
 0x378   :  { %2364 = vmatpush.xpose.msk.msra.mxu2 %vm140_vm8, %v352_v11 }
 0x37f   :  { %2361 = vmatmul.msk.f32.vlgmr.msrb.gmra.mxu2 %vm140_vm8, %v246_v61 }
 0x387   :  { %2365 = vmatmul.msk.f32.vlgmr.msra.gmra.mxu2 %vm140_vm8, %v350_v25 }
 0x3f4   :  { %v478_v27 = vpop.f32.mrf.mxu0 }
 0x3f5   :  { %v481_v28 = vmul.f32 0.35355338, %v478_v27 }
 0x3f7   :  { %v482_v29 = vadd.f32 %v2468_v0, %v481_v28 }
 0x3f9   :  { %v483_v30 = vsel %vm140_vm8, %v482_v29, -inf }
 0x3fa   :  { %v217_v31 = vpop.f32.mrf.mxu2  ;;  %484 = vmax.xlane.f32.xlu0 %v483_v30 }
 0x3fb   :  { %2359 = vmatmul.msk.f32.vlgmr.msra.gmra.mxu3 %vm140_vm8, %v217_v31 }
 0x402   :  { %v270_v32 = vpop.f32.mrf.mxu2 }
 0x403   :  { %v273_v33 = vmul.f32 0.35355338, %v270_v32 }
 0x405   :  { %v274_v34 = vadd.f32 %v2468_v0, %v273_v33 }
 0x407   :  { %v275_v35 = vsel %vm140_vm8, %v274_v34, -inf }
 0x408   :  { %276 = vmax.xlane.f32.xlu1 %v275_v35  ;;  %v2788_v35 = vld [vmem:[%s3247_s3 + $0x18] sm:$0xff] }
 0x40a   :  { %v374_v36 = vpop.f32.mrf.mxu2 }
 0x40b   :  { %v377_v37 = vmul.f32 0.35355338, %v374_v36 }
 0x40d   :  { %v378_v38 = vadd.f32 %v2468_v0, %v377_v37  ;;  %v2796_v37 = vld [vmem:[%s3247_s3 + $0x8] sm:$0xff] }
 0x40e   :  { %343 = vmatpush.msra.mxu1 %v2796_v37 }
 0x40f   :  { %v379_v39 = vsel %vm140_vm8, %v378_v38, -inf }
 0x410   :  { %380 = vmax.xlane.f32.xlu2 %v379_v39 }
 0x428   :  { %507 = vrot.lane.b32.xlu2 %v2717_v57, %s2610_s19 }
 0x430   :  { %560 = vrot.lane.b32.xlu2 %v2764_v40, %s2604_s30 }
 0x46d   :  { %v485_v41 = vpop.xlane.xlu0 %484 }
 0x46e   :  { %v486_v42 = vsub.f32 %v482_v29, %v485_v41 }
 0x470   :  { %v487_v43 = vmul.f32 1.442695, %v486_v42 }
 0x472   :  { %2480 = vpow2.f32 %v487_v43 }
 0x478   :  { %v2481_v44 = vpop.eup %2480 }
 0x479   :  { %v489_v45 = vsel %vm140_vm8, %v2481_v44, 0.0 }
 0x47a   :  { %490 = vadd.xlane.f32.xlu0 %v489_v45 }
 0x47b   :  { %v277_v46 = vpop.xlane.xlu1 %276 }
 0x47c   :  { %v278_v47 = vsub.f32 %v274_v34, %v277_v46 }
 0x47e   :  { %v279_v48 = vmul.f32 1.442695, %v278_v47  ;;  %v240_v41 = vpop.f32.mrf.mxu3  ;;  %v2812_v47 = vld [vmem:[%s3245_s1 + $0x1] ss:$0 sm:$0xff] }
 0x480   :  { %2482 = vpow2.f32 %v279_v48 }
 0x483   :  { %v381_v49 = vpop.xlane.xlu2 %380 }
 0x484   :  { %v382_v50 = vsub.f32 %v378_v38, %v381_v49  ;;  %v103_v38 = vld [vmem:[%s3247_s3 + $0x10] sm:$0xff] }
 0x485   :  { %447 = vmatpush.msrb.mxu1 %v103_v38 }
 0x486   :  { %v2483_v52 = vpop.eup %2482  ;;  %v383_v55 = vmul.f32 1.442695, %v382_v50 }
 0x487   :  { %v281_v56 = vsel %vm140_vm8, %v2483_v52, 0.0 }
 0x488   :  { %2484 = vpow2.f32 %v383_v55  ;;  %282 = vadd.xlane.f32.xlu1 %v281_v56  ;;  %v243_v56 = vperm.slane %v2712_v54, 1 }
 0x48b   :  { %v508_v58 = vpop.permute.xlu2 %507 }
 0x48c   :  { %528 = vmatpush.msrb.mxu2 %v508_v58  ;;  %v244_v58 = vadd.f32 %v243_v56, %v240_v41 }
 0x48e   :  { %659 = vmatpush.msra.mxu2 %v101_v26  ;;  %v2770_v59 = vpop.eup %2484  ;;  %299 = vrot.lane.b32.xlu0 %v2717_v57, %s2611_s20 }
 0x48f   :  { %v385_v60 = vsel %vm140_vm8, %v2770_v59, 0.0 }
 0x490   :  { %386 = vadd.xlane.f32.xlu1 %v385_v60 }
 0x496   :  { %667 = vrot.lane.b32.xlu0 %v2764_v40, %s2602_s28 }
 0x49e   :  { %665 = vrot.lane.b32.xlu0 %v2764_v40, %s2606_s12 }
 0x4a9   :  { %403 = vrot.lane.b32.xlu1 %v2717_v57, %s2612_s21 }
 0x4ed   :  { %v491_v61 = vpop.xlane.xlu0 %490 }
 0x4ee   :  { %2486 = vrcp.f32 %v491_v61  ;;  %v503_v1 = vand.u32 2147483648, %v491_v61  ;;  %v501_v3 = vand.u32 2147483647, %v491_v61  ;;  %vm497_vm14 = vweird.f32 %v491_v61 }
 0x4f0   :  { %v504_v6 = vor.u32 1.1754944e-38, %v503_v1  ;;  %vm502_vm1 = vcmp.eq.f32.partialorder %v501_v3, 8.507059e+37 }
 0x4f4   :  { %v2487_v62 = vpop.eup %2486 }
 0x4f5   :  { %v493_v63 = vmul.f32 %v2487_v62, %v491_v61  ;;  %vm498_vm13 = vweird.f32 %v2487_v62 }
 0x4f6   :  { %vm499_vm15 = vmor %vm497_vm14, %vm498_vm13 }
 0x4f7   :  { %v494_v0 = vsub.f32 1.0, %v493_v63 }
 0x4f9   :  { %v495_v2 = vmul.f32 %v2487_v62, %v494_v0 }
 0x4fb   :  { %v496_v4 = vadd.f32 %v2487_v62, %v495_v2  ;;  %v283_v5 = vpop.xlane.xlu1 %282 }
 0x4fc   :  { %2488 = vrcp.f32 %v283_v5  ;;  %v295_v15 = vand.u32 2147483648, %v283_v5  ;;  %v293_v17 = vand.u32 2147483647, %v283_v5  ;;  %vm289_vm3 = vweird.f32 %v283_v5 }
 0x4fd   :  { %v500_v7 = vsel %vm499_vm15, %v2487_v62, %v496_v4 }
 0x4fe   :  { %v505_v8 = vsel %vm502_vm1, %v504_v6, %v500_v7  ;;  %v296_v20 = vor.u32 1.1754944e-38, %v295_v15  ;;  %vm294_vm5 = vcmp.eq.f32.partialorder %v293_v17, 8.507059e+37 }
 0x4ff   :  { %v506_v9 = vmul.f32 %v2481_v44, %v505_v8  ;;  %v561_v44 = vpop.permute.xlu2 %560 }
 0x500   :  { %v300_v57 = vpop.permute.xlu0 %299 }
 0x501   :  { %320 = vmatpush.msrb.mxu3 %v300_v57  ;;  %2370 = vmatmul.msk.f32.vlgmr.msrb.gmra.mxu2 %vm140_vm8, %v506_v9 }
 0x502   :  { %v2489_v11 = vpop.eup %2488 }
 0x503   :  { %v285_v12 = vmul.f32 %v2489_v11, %v283_v5  ;;  %v387_v13 = vpop.xlane.xlu1 %386  ;;  %vm290_vm2 = vweird.f32 %v2489_v11 }
 0x504   :  { %2490 = vrcp.f32 %v387_v13  ;;  %vm291_vm4 = vmor %vm289_vm3, %vm290_vm2  ;;  %v399_v28 = vand.u32 2147483648, %v387_v13  ;;  %vm393_vm7 = vweird.f32 %v387_v13  ;;  %v397_v29 = vand.u32 2147483647, %v387_v13 }
 0x505   :  { %v286_v14 = vsub.f32 1.0, %v285_v12 }
 0x506   :  { %v400_v31 = vor.u32 1.1754944e-38, %v399_v28  ;;  %vm398_vm10 = vcmp.eq.f32.partialorder %v397_v29, 8.507059e+37 }
 0x507   :  { %v287_v16 = vmul.f32 %v2489_v11, %v286_v14 }
 0x508   :  { %v668_v36 = vpop.permute.xlu0 %667 }
 0x509   :  { %v288_v18 = vadd.f32 %v2489_v11, %v287_v16 }
 0x50a   :  { %v2491_v19 = vpop.eup %2490 }
 0x50b   :  { %v389_v21 = vmul.f32 %v2491_v19, %v387_v13  ;;  %v292_v22 = vsel %vm291_vm4, %v2489_v11, %v288_v18  ;;  %vm394_vm6 = vweird.f32 %v2491_v19 }
 0x50c   :  { %v297_v23 = vsel %vm294_vm5, %v296_v20, %v292_v22  ;;  %vm395_vm9 = vmor %vm393_vm7, %vm394_vm6 }
 0x50d   :  { %v390_v24 = vsub.f32 1.0, %v389_v21  ;;  %v298_v25 = vmul.f32 %v2483_v52, %v297_v23 }
 0x50f   :  { %v391_v26 = vmul.f32 %v2491_v19, %v390_v24  ;;  %2362 = vmatmul.msk.f32.vlgmr.msrb.gmra.mxu3 %vm140_vm8, %v298_v25 }
 0x510   :  { %v666_v42 = vpop.permute.xlu0 %665 }
 0x511   :  { %v392_v27 = vadd.f32 %v2491_v19, %v391_v26 }
 0x513   :  { %v396_v30 = vsel %vm395_vm9, %v2491_v19, %v392_v27 }
 0x514   :  { %v401_v32 = vsel %vm398_vm10, %v400_v31, %v396_v30 }
 0x515   :  { %v402_v34 = vmul.f32 %v2770_v59, %v401_v32 }
 0x51b   :  { %v404_v33 = vpop.permute.xlu1 %403 }
 0x51c   :  { %424 = vmatpush.msra.mxu3 %v404_v33 }
 0x51d   :  { %2366 = vmatmul.msk.f32.vlgmr.msra.gmra.mxu3 %vm140_vm8, %v402_v34 }
 0x51e   :  { %551 = vmatpush.msrb.mxu3 %v2788_v35 }
 0x520   :  { %2377 = vmatpush.xpose.msk.msra.mxu3 %vm140_vm8, %v668_v36 }
 0x584   :  { %v530_v39 = vpop.f32.mrf.mxu2 }
 0x585   :  { %2371 = vmatmul.msk.f32.vlgmr.msrb.gmra.mxu3 %vm140_vm8, %v530_v39 }
 0x58d   :  { %2378 = vmatmul.msk.f32.vlgmr.msra.gmra.mxu3 %vm140_vm8, %v666_v42 }
 0x592   :  { %v322_v43 = vpop.f32.mrf.mxu3 }
 0x593   :  { %2363 = vmatmul.msk.f32.vlgmr.msra.gmra.mxu1 %vm140_vm8, %v322_v43 }
 0x594   :  { %2373 = vmatpush.xpose.msk.msra.mxu1 %vm140_vm8, %v561_v44 }
 0x5a0   :  { %v426_v45 = vpop.f32.mrf.mxu3 }
 0x5a1   :  { %2367 = vmatmul.msk.f32.vlgmr.msrb.gmra.mxu1 %vm140_vm8, %v426_v45 }
 0x5a9   :  { %2374 = vmatmul.msk.f32.vlgmr.msra.gmra.mxu1 %vm140_vm8, %v2764_v40 }
 0x608   :  { %v553_v46 = vpop.f32.mrf.mxu3 }
 0x610   :  { %v690_v48 = vpop.f32.mrf.mxu3  ;;  %v345_v55 = vpop.f32.mrf.mxu1 }
 0x611   :  { %v693_v49 = vmul.f32 0.35355338, %v690_v48  ;;  %v348_v59 = vadd.f32 %v345_v55, %v244_v58 }
 0x613   :  { %v694_v50 = vadd.f32 %v2812_v47, %v693_v49 }
 0x615   :  { %v695_v52 = vsel %vm140_vm8, %v694_v50, -inf }
 0x616   :  { %696 = vmax.xlane.f32.xlu0 %v695_v52 }
 0x61e   :  { %v449_v60 = vpop.f32.mrf.mxu1 }
 0x61f   :  { %v452_v61 = vadd.f32 %v449_v60, %v348_v59 }
 0x621   :  { %v2819_v62 = vadd.f32 %v553_v46, %v452_v61 }
 0x626   :  { %v583_v63 = vpop.f32.mrf.mxu1 }
 0x627   :  { %v586_v0 = vmul.f32 0.35355338, %v583_v63 }
 0x629   :  { %v590_v1 = vadd.f32 %v2812_v47, %v586_v0 }
 0x62a   :  { %719 = vrot.lane.b32.xlu0 %v2764_v40, %s2611_s20 }
 0x62b   :  { %v591_v2 = vsel %vm140_vm8, %v590_v1, -inf }
 0x62c   :  { %592 = vmax.xlane.f32.xlu1 %v591_v2 }
 0x632   :  { %875 = vrot.lane.b32.xlu0 %v2764_v40, %s2607_s13 }
 0x689   :  { %v697_v3 = vpop.xlane.xlu0 %696 }
 0x68a   :  { %v698_v4 = vsub.f32 %v694_v50, %v697_v3 }
 0x68c   :  { %v699_v5 = vmul.f32 1.442695, %v698_v4 }
 0x68e   :  { %2492 = vpow2.f32 %v699_v5 }
 0x694   :  { %v2493_v6 = vpop.eup %2492 }
 0x695   :  { %v701_v7 = vsel %vm140_vm8, %v2493_v6, 0.0 }
 0x696   :  { %702 = vadd.xlane.f32.xlu1 %v701_v7 }
 0x69c   :  { %v720_v8 = vpop.permute.xlu0 %719 }
 0x69d   :  { %740 = vmatpush.msrb.mxu1 %v720_v8 }
 0x69f   :  { %867 = vmatpush.msra.mxu1 %v103_v38  ;;  %v593_v9 = vpop.xlane.xlu1 %592 }
 0x6a0   :  { %v594_v57 = vsub.f32 %v590_v1, %v593_v9 }
 0x6a2   :  { %v595_v11 = vmul.f32 1.442695, %v594_v57 }
 0x6a4   :  { %2494 = vpow2.f32 %v595_v11  ;;  %v876_v43 = vpop.permute.xlu0 %875  ;;  %v977_v11 = vadd.f32 %v2819_v62, %v2701_v51 }
 0x6aa   :  { %v2495_v12 = vpop.eup %2494 }
 0x6ab   :  { %v597_v13 = vsel %vm140_vm8, %v2495_v12, 0.0 }
 0x6ac   :  { %598 = vadd.xlane.f32.xlu2 %v597_v13 }
 0x6af   :  { %771 = vrot.lane.b32.xlu1 %v2764_v40, %s2605_s11 }
 0x6b7   :  { %873 = vrot.lane.b32.xlu1 %v2764_v40, %s2609_s0 }
 0x6c4   :  { %615 = vrot.lane.b32.xlu2 %v2764_v40, %s2603_s29 }
 0x6cc   :  { %769 = vrot.lane.b32.xlu2 %v2764_v40, %s2608_s16 }
 0x709   :  { %v703_v14 = vpop.xlane.xlu1 %702 }
 0x70a   :  { %2496 = vrcp.f32 %v703_v14  ;;  %v715_v18 = vand.u32 2147483648, %v703_v14  ;;  %v713_v20 = vand.u32 2147483647, %v703_v14  ;;  %vm709_vm12 = vweird.f32 %v703_v14 }
 0x70c   :  { %v716_v22 = vor.u32 1.1754944e-38, %v715_v18  ;;  %vm714_vm14 = vcmp.eq.f32.partialorder %v713_v20, 8.507059e+37 }
 0x710   :  { %v2497_v15 = vpop.eup %2496 }
 0x711   :  { %v705_v16 = vmul.f32 %v2497_v15, %v703_v14  ;;  %vm710_vm11 = vweird.f32 %v2497_v15 }
 0x712   :  { %vm711_vm13 = vmor %vm709_vm12, %vm710_vm11 }
 0x713   :  { %v706_v17 = vsub.f32 1.0, %v705_v16 }
 0x715   :  { %v707_v19 = vmul.f32 %v2497_v15, %v706_v17 }
 0x717   :  { %v708_v21 = vadd.f32 %v2497_v15, %v707_v19 }
 0x719   :  { %v712_v23 = vsel %vm711_vm13, %v2497_v15, %v708_v21 }
 0x71a   :  { %v717_v24 = vsel %vm714_vm14, %v716_v22, %v712_v23 }
 0x71b   :  { %v718_v25 = vmul.f32 %v2493_v6, %v717_v24 }
 0x71d   :  { %2379 = vmatmul.msk.f32.vlgmr.msrb.gmra.mxu1 %vm140_vm8, %v718_v25 }
 0x71f   :  { %v599_v26 = vpop.xlane.xlu2 %598 }
 0x720   :  { %2498 = vrcp.f32 %v599_v26  ;;  %v611_v32 = vand.u32 2147483648, %v599_v26  ;;  %v609_v34 = vand.u32 2147483647, %v599_v26  ;;  %vm605_vm1 = vweird.f32 %v599_v26 }
 0x721   :  { %v772_v27 = vpop.permute.xlu1 %771 }
 0x722   :  { %2381 = vmatpush.xpose.msk.msrb.mxu2 %vm140_vm8, %v772_v27  ;;  %v612_v38 = vor.u32 1.1754944e-38, %v611_v32  ;;  %vm610_vm3 = vcmp.eq.f32.partialorder %v609_v34, 8.507059e+37 }
 0x726   :  { %v2499_v28 = vpop.eup %2498 }
 0x727   :  { %v601_v29 = vmul.f32 %v2499_v28, %v599_v26  ;;  %v616_v30 = vpop.permute.xlu2 %615  ;;  %vm606_vm15 = vweird.f32 %v2499_v28 }
 0x728   :  { %636 = vmatpush.msrb.mxu0 %v616_v30  ;;  %vm607_vm2 = vmor %vm605_vm1, %vm606_vm15  ;;  %vm1090_vm1 = vcmask 523264  }
 0x729   :  { %v602_v31 = vsub.f32 1.0, %v601_v29 }
 0x72a   :  { %763 = vmatpush.msra.mxu0 %v2796_v37  ;;  %v874_v37 = vpop.permute.xlu1 %873 }
 0x72b   :  { %v603_v33 = vmul.f32 %v2499_v28, %v602_v31 }
 0x72d   :  { %v604_v36 = vadd.f32 %v2499_v28, %v603_v33 }
 0x72f   :  { %v608_v39 = vsel %vm607_vm2, %v2499_v28, %v604_v36  ;;  %v770_v46 = vpop.permute.xlu2 %769 }
 0x730   :  { %v613_v41 = vsel %vm610_vm3, %v612_v38, %v608_v39 }
 0x731   :  { %v614_v42 = vmul.f32 %v2495_v12, %v613_v41  ;;  %v979_v12 = vsel %vm39_vm0, %v977_v11, 0.0 }
 0x733   :  { %2375 = vmatmul.msk.f32.vlgmr.msrb.gmra.mxu0 %vm140_vm8, %v614_v42  ;;  %v1032_v42 = vld [vmem:[%s3248_s4 + $0x18] sm:$0xff] }
 0x734   :  { %2385 = vmatpush.xpose.msk.msrb.mxu0 %vm140_vm8, %v876_v43  ;;  %1052 = vmatpush.msrb.mxu1 %v1032_v42 }
 0x79a   :  { %v742_v44 = vpop.f32.mrf.mxu1 }
 0x79b   :  { %2380 = vmatmul.msk.f32.vlgmr.msra.gmra.mxu0 %vm140_vm8, %v742_v44  ;;  %v1031_v44 = vld [vmem:[%s3248_s4 + $0x10] sm:$0xff] }
 0x79c   :  { %1053 = vmatpush.msrb.mxu1 %v1031_v44 }
 0x7a3   :  { %2386 = vmatmul.msk.f32.vlgmr.msrb.gmra.mxu0 %vm140_vm8, %v874_v37  ;;  %v1030_v37 = vld [vmem:[%s3248_s4 + $0x8] sm:$0xff] }
 0x7a4   :  { %1054 = vmatpush.msrb.mxu1 %v1030_v37 }
 0x7b0   :  { %v638_v45 = vpop.f32.mrf.mxu0 }
 0x7b1   :  { %2376 = vmatmul.msk.f32.vlgmr.msra.gmra.mxu2 %vm140_vm8, %v638_v45  ;;  %v1029_v45 = vld [vmem:[%s3248_s4] sm:$0xff] }
 0x7b2   :  { %1055 = vmatpush.msrb.mxu1 %v1029_v45 }
 0x7b9   :  { %2382 = vmatmul.msk.f32.vlgmr.msrb.gmra.mxu2 %vm140_vm8, %v770_v46 }
 0x818   :  { %v765_v48 = vpop.f32.mrf.mxu0 }
 0x820   :  { %v898_v49 = vpop.f32.mrf.mxu0 }
 0x821   :  { %v901_v50 = vmul.f32 0.35355338, %v898_v49 }
 0x823   :  { %v902_v52 = vadd.f32 %v2812_v47, %v901_v50 }
 0x825   :  { %v903_v55 = vsel %vm140_vm8, %v902_v52, -inf }
 0x826   :  { %904 = vmax.xlane.f32.xlu0 %v903_v55 }
 0x834   :  { %v661_v58 = vpop.f32.mrf.mxu2 }
 0x835   :  { %v664_v59 = vadd.f32 %v661_v58, %v243_v56 }
 0x837   :  { %v2850_v60 = vadd.f32 %v765_v48, %v664_v59 }
 0x83c   :  { %v794_v61 = vpop.f32.mrf.mxu2 }
 0x83d   :  { %v797_v63 = vmul.f32 0.35355338, %v794_v61 }
 0x83f   :  { %v798_v0 = vadd.f32 %v2812_v47, %v797_v63 }
 0x841   :  { %v799_v1 = vsel %vm140_vm8, %v798_v0, -inf }
 0x842   :  { %800 = vmax.xlane.f32.xlu2 %v799_v1 }
 0x85a   :  { %927 = vrot.lane.b32.xlu2 %v2764_v40, %s2610_s19 }
 0x899   :  { %v905_v2 = vpop.xlane.xlu0 %904 }
 0x89a   :  { %v906_v3 = vsub.f32 %v902_v52, %v905_v2 }
 0x89c   :  { %v907_v4 = vmul.f32 1.442695, %v906_v3  ;;  %v1026_v3 = vperm.slane %v2712_v54, 3 }
 0x89e   :  { %2500 = vpow2.f32 %v907_v4 }
 0x8a4   :  { %v2501_v5 = vpop.eup %2500 }
 0x8a5   :  { %v909_v6 = vsel %vm140_vm8, %v2501_v5, 0.0 }
 0x8a6   :  { %910 = vadd.xlane.f32.xlu1 %v909_v6  ;;  %v1088_v6 = vld [vmem:[%s3249_s5 + $0x38] sm:$0xff] }
 0x8a7   :  { %1105 = vmatpush.msra.mxu0 %v1088_v6 }
 0x8b5   :  { %v801_v56 = vpop.xlane.xlu2 %800 }
 0x8b6   :  { %v802_v7 = vsub.f32 %v798_v0, %v801_v56  ;;  %v1023_v0 = vperm.slane %v2712_v54, 2  ;;  %v1087_v56 = vld [vmem:[%s3249_s5 + $0x30] sm:$0xff] }
 0x8b7   :  { %1106 = vmatpush.msra.mxu0 %v1087_v56 }
 0x8b8   :  { %v803_v8 = vmul.f32 1.442695, %v802_v7  ;;  %v1086_v7 = vld [vmem:[%s3249_s5 + $0x28] sm:$0xff] }
 0x8b9   :  { %1107 = vmatpush.msra.mxu0 %v1086_v7 }
 0x8ba   :  { %2502 = vpow2.f32 %v803_v8  ;;  %v1085_v8 = vld [vmem:[%s3249_s5 + $0x20] sm:$0xff] }
 0x8bb   :  { %1108 = vmatpush.msra.mxu0 %v1085_v8 }
 0x8bd   :  { %v928_v9 = vpop.permute.xlu2 %927 }
 0x8be   :  { %948 = vmatpush.msra.mxu2 %v928_v9  ;;  %v1084_v9 = vld [vmem:[%s3249_s5 + $0x18] sm:$0xff] }
 0x8bf   :  { %823 = vrot.lane.b32.xlu1 %v2764_v40, %s2612_s21  ;;  %1109 = vmatpush.msra.mxu0 %v1084_v9 }
 0x8c0   :  { %v2503_v47 = vpop.eup %2502 }
 0x8c1   :  { %v805_v57 = vsel %vm140_vm8, %v2503_v47, 0.0 }
 0x8c2   :  { %806 = vadd.xlane.f32.xlu0 %v805_v57  ;;  %v1082_v57 = vld [vmem:[%s3249_s5 + $0x8] sm:$0xff] }
 0x8ca   :  { %980 = vadd.xlane.f32.xlu0 %v979_v12  ;;  %v1081_v12 = vld [vmem:[%s3249_s5] sm:$0xff] }
 0x919   :  { %v911_v13 = vpop.xlane.xlu1 %910 }
 0x91a   :  { %2504 = vrcp.f32 %v911_v13  ;;  %v923_v17 = vand.u32 2147483648, %v911_v13  ;;  %v921_v19 = vand.u32 2147483647, %v911_v13  ;;  %vm917_vm5 = vweird.f32 %v911_v13 }
 0x91c   :  { %v924_v20 = vor.u32 1.1754944e-38, %v923_v17  ;;  %vm922_vm7 = vcmp.eq.f32.partialorder %v921_v19, 8.507059e+37  ;;  %v1033_v17 = vperm.slane %v2712_v54, 4 }
 0x920   :  { %v2505_v14 = vpop.eup %2504 }
 0x921   :  { %v913_v15 = vmul.f32 %v2505_v14, %v911_v13  ;;  %vm918_vm4 = vweird.f32 %v2505_v14 }
 0x922   :  { %vm919_vm6 = vmor %vm917_vm5, %vm918_vm4 }
 0x923   :  { %v914_v16 = vsub.f32 1.0, %v913_v15 }
 0x925   :  { %v915_v18 = vmul.f32 %v2505_v14, %v914_v16 }
 0x927   :  { %v916_v40 = vadd.f32 %v2505_v14, %v915_v18 }
 0x929   :  { %v920_v21 = vsel %vm919_vm6, %v2505_v14, %v916_v40 }
 0x92a   :  { %v925_v22 = vsel %vm922_vm7, %v924_v20, %v920_v21 }
 0x92b   :  { %v926_v51 = vmul.f32 %v2501_v5, %v925_v22 }
 0x92d   :  { %2387 = vmatmul.msk.f32.vlgmr.msra.gmra.mxu2 %vm140_vm8, %v926_v51 }
 0x931   :  { %v824_v62 = vpop.permute.xlu1 %823 }
 0x932   :  { %844 = vmatpush.msrb.mxu3 %v824_v62 }
 0x934   :  { %971 = vmatpush.msra.mxu3 %v2788_v35 }
 0x935   :  { %v807_v23 = vpop.xlane.xlu0 %806 }
 0x936   :  { %2506 = vrcp.f32 %v807_v23  ;;  %v819_v29 = vand.u32 2147483648, %v807_v23  ;;  %v817_v32 = vand.u32 2147483647, %v807_v23  ;;  %vm813_vm10 = vweird.f32 %v807_v23 }
 0x938   :  { %v820_v36 = vor.u32 1.1754944e-38, %v819_v29  ;;  %vm818_vm12 = vcmp.eq.f32.partialorder %v817_v32, 8.507059e+37 }
 0x93c   :  { %v2507_v24 = vpop.eup %2506 }
 0x93d   :  { %v809_v25 = vmul.f32 %v2507_v24, %v807_v23  ;;  %v981_v26 = vpop.xlane.xlu0 %980  ;;  %vm814_vm9 = vweird.f32 %v2507_v24 }
 0x93e   :  { %v985_v27 = vmul.f32 %v981_v26, %v2678_v10  ;;  %vm815_vm11 = vmor %vm813_vm10, %vm814_vm9 }
 0x93f   :  { %v810_v28 = vsub.f32 1.0, %v809_v25 }
 0x940   :  { %v987_v30 = vsub.f32 %v977_v11, %v985_v27 }
 0x941   :  { %v811_v31 = vmul.f32 %v2507_v24, %v810_v28 }
 0x942   :  { %v989_v33 = vmul.f32 %v987_v30, %v987_v30 }
 0x943   :  { %v812_v34 = vadd.f32 %v2507_v24, %v811_v31 }
 0x944   :  { %v991_v35 = vsel %vm39_vm0, %v989_v33, 0.0 }
 0x945   :  { %v816_v38 = vsel %vm815_vm11, %v2507_v24, %v812_v34  ;;  %992 = vadd.xlane.f32.xlu0 %v991_v35 }
 0x946   :  { %v821_v39 = vsel %vm818_vm12, %v820_v36, %v816_v38 }
 0x947   :  { %v822_v41 = vmul.f32 %v2503_v47, %v821_v39  ;;  %v1083_v47 = vld [vmem:[%s3249_s5 + $0x10] sm:$0xff] }
 0x948   :  { %1110 = vmatpush.msra.mxu0 %v1083_v47 }
 0x949   :  { %2383 = vmatmul.msk.f32.vlgmr.msrb.gmra.mxu3 %vm140_vm8, %v822_v41 }
 0x94a   :  { %1111 = vmatpush.msra.mxu0 %v1082_v57 }
 0x94c   :  { %1112 = vmatpush.msra.mxu0 %v1081_v12 }
 0x9b0   :  { %v950_v43 = vpop.f32.mrf.mxu2 }
 0x9b1   :  { %2388 = vmatmul.msk.f32.vlgmr.msra.gmra.mxu3 %vm140_vm8, %v950_v43 }
 0x9b8   :  { %v993_v46 = vpop.xlane.xlu0 %992 }
 0x9b9   :  { %v997_v48 = vmul.f32 %v993_v46, %v2678_v10 }
 0x9bb   :  { %v999_v49 = vadd.f32 1e-12, %v997_v48 }
 0x9bd   :  { %2508 = vrsqrt.f32 %v999_v49  ;;  %vm1007_vm14 = vweird.f32 %v999_v49 }
 0x9c3   :  { %v2509_v50 = vpop.eup %2508 }
 0x9c4   :  { %v1002_v52 = vmul.f32 %v2509_v50, %v999_v49  ;;  %vm1008_vm13 = vweird.f32 %v2509_v50 }
 0x9c5   :  { %vm1009_vm15 = vmor %vm1007_vm14, %vm1008_vm13 }
 0x9c6   :  { %v1003_v55 = vmul.f32 %v2509_v50, %v1002_v52 }
 0x9c8   :  { %v1004_v58 = vmul.f32 0.5, %v1003_v55 }
 0x9ca   :  { %v1005_v59 = vsub.f32 1.5, %v1004_v58 }
 0x9cc   :  { %v1006_v61 = vmul.f32 %v2509_v50, %v1005_v59  ;;  %v846_v63 = vpop.f32.mrf.mxu3 }
 0x9cd   :  { %2384 = vmatmul.msk.f32.vlgmr.msra.gmra.mxu1 %vm140_vm8, %v846_v63  ;;  %v2395_v63 = vld [vmem:[%s3246_s2 + $0x30] sm:$0xff] }
 0x9ce   :  { %v1010_v1 = vsel %vm1009_vm15, %v2509_v50, %v1006_v61  ;;  %v2396_v61 = vld [vmem:[%s3246_s2 + $0x38] sm:$0xff] }
 0x9cf   :  { %v1021_v2 = vmul.f32 %v1010_v1, %v987_v30  ;;  %v1089_v30 = vperm.slane %v2712_v54, 5  ;;  %1203 = vmatpush.msrb.mxu2 %v2396_v61  ;;  %v2393_v1 = vld [vmem:[%s3246_s2 + $0x20] sm:$0xff] }
 0x9d1   :  { %v1024_v4 = vmul.f32 %v1023_v0, %v1021_v2  ;;  %1204 = vmatpush.msrb.mxu2 %v2395_v63 }
 0x9d3   :  { %v1027_v5 = vadd.f32 %v1026_v3, %v1024_v4 }
 0x9d5   :  { %2389 = vmatmul.msk.f32.vlgmr.msrb.gmra.mxu1 %vm39_vm0, %v1027_v5 }
 0xa34   :  { %v973_v14 = vpop.f32.mrf.mxu3 }
 0xa4a   :  { %v869_v11 = vpop.f32.mrf.mxu1 }
 0xa4b   :  { %v872_v13 = vadd.f32 %v869_v11, %v2850_v60 }
 0xa4d   :  { %v976_v15 = vadd.f32 %v973_v14, %v872_v13 }
 0xa4f   :  { %v978_v16 = vadd.f32 %v976_v15, %v2705_v53 }
 0xa51   :  { %v982_v18 = vsel %vm39_vm0, %v978_v16, 0.0 }
 0xa52   :  { %983 = vadd.xlane.f32.xlu0 %v982_v18  ;;  %v1057_v19 = vpop.f32.mrf.mxu1 }
 0xa53   :  { %v1058_v40 = vadd.f32 %v1057_v19, %v1033_v17  ;;  %v1166_v19 = vperm.slane %v2712_v54, 6 }
 0xa55   :  { %v1063_v20 = vmul.f32 %v1058_v40, %v1058_v40 }
 0xa57   :  { %v1065_v21 = vmul.f32 %v1063_v20, %v1058_v40 }
 0xa59   :  { %v1067_v22 = vmul.f32 0.044715, %v1065_v21 }
 0xa5b   :  { %v1069_v51 = vadd.f32 %v1067_v22, %v1058_v40  ;;  %v2570_v22 = vld [vmem:[%s3250_s6] sm:$0xff] }
 0xa5d   :  { %v1071_v62 = vmul.f32 0.7978846, %v1069_v51  ;;  %v1169_v51 = vperm.slane %v2570_v22, 7 }
 0xa5f   :  { %2510 = vtanh.f32 %v1071_v62 }
 0xa65   :  { %v2511_v23 = vpop.eup %2510 }
 0xa66   :  { %v1075_v60 = vadd.f32 1.0, %v2511_v23 }
 0xa68   :  { %v1077_v24 = vmul.f32 0.5, %v1075_v60 }
 0xa6a   :  { %v1079_v25 = vmul.f32 %v1077_v24, %v1058_v40 }
 0xa6c   :  { %2391 = vmatmul.msk.f32.vlgmr.msra.gmra.mxu0 %vm1090_vm1, %v1079_v25 }
 0xac5   :  { %v984_v53 = vpop.xlane.xlu0 %983 }
 0xac6   :  { %v986_v26 = vmul.f32 %v984_v53, %v2678_v10 }
 0xac8   :  { %v988_v27 = vsub.f32 %v978_v16, %v986_v26  ;;  %v2961_v26 = vld [vmem:[%s3250_s6 + $0x8] sm:$0xff] }
 0xaca   :  { %v990_v28 = vmul.f32 %v988_v27, %v988_v27 }
 0xacc   :  { %v994_v29 = vsel %vm39_vm0, %v990_v28, 0.0 }
 0xacd   :  { %995 = vadd.xlane.f32.xlu2 %v994_v29 }
 0xae9   :  { %v1114_v31 = vpop.f32.mrf.mxu0 }
 0xaea   :  { %v1115_v32 = vadd.f32 %v1114_v31, %v1089_v30 }
 0xaec   :  { %v1120_v33 = vadd.f32 %v1115_v32, %v1027_v5 }
 0xaee   :  { %v1122_v34 = vsel %vm39_vm0, %v1120_v33, 0.0 }
 0xaef   :  { %1123 = vadd.xlane.f32.xlu0 %v1122_v34 }
 0xb40   :  { %v996_v36 = vpop.xlane.xlu2 %995 }
 0xb41   :  { %v998_v35 = vmul.f32 %v996_v36, %v2678_v10 }
 0xb43   :  { %v1000_v38 = vadd.f32 1e-12, %v998_v35 }
 0xb45   :  { %2512 = vrsqrt.f32 %v1000_v38  ;;  %vm1017_vm3 = vweird.f32 %v1000_v38 }
 0xb4b   :  { %v2513_v39 = vpop.eup %2512 }
 0xb4c   :  { %v1012_v41 = vmul.f32 %v2513_v39, %v1000_v38  ;;  %vm1018_vm2 = vweird.f32 %v2513_v39 }
 0xb4d   :  { %vm1019_vm4 = vmor %vm1017_vm3, %vm1018_vm2 }
 0xb4e   :  { %v1013_v42 = vmul.f32 %v2513_v39, %v1012_v41 }
 0xb50   :  { %v1014_v43 = vmul.f32 0.5, %v1013_v42 }
 0xb52   :  { %v1015_v44 = vsub.f32 1.5, %v1014_v43 }
 0xb54   :  { %v1016_v37 = vmul.f32 %v2513_v39, %v1015_v44 }
 0xb56   :  { %v1020_v45 = vsel %vm1019_vm4, %v2513_v39, %v1016_v37 }
 0xb57   :  { %v1022_v46 = vmul.f32 %v1020_v45, %v988_v27  ;;  %v1184_v27 = vperm.slane %v2961_v26, 0 }
 0xb59   :  { %v1025_v48 = vmul.f32 %v1023_v0, %v1022_v46  ;;  %v2394_v0 = vld [vmem:[%s3246_s2 + $0x28] sm:$0xff] }
 0xb5a   :  { %1205 = vmatpush.msrb.mxu2 %v2394_v0 }
 0xb5b   :  { %v1028_v49 = vadd.f32 %v1026_v3, %v1025_v48 }
 0xb5c   :  { %1206 = vmatpush.msrb.mxu2 %v2393_v1 }
 0xb5d   :  { %2390 = vmatmul.msk.f32.gmra.mxu1 %vm39_vm0, %v1028_v49 }
 0xb62   :  { %v1124_v50 = vpop.xlane.xlu0 %1123 }
 0xb63   :  { %v1128_v52 = vmul.f32 %v1124_v50, %v2678_v10 }
 0xb65   :  { %v1130_v55 = vsub.f32 %v1120_v33, %v1128_v52 }
 0xb67   :  { %v1132_v58 = vmul.f32 %v1130_v55, %v1130_v55 }
 0xb69   :  { %v1134_v59 = vsel %vm39_vm0, %v1132_v58, 0.0 }
 0xb6a   :  { %1135 = vadd.xlane.f32.xlu1 %v1134_v59  ;;  %v2989_v59 = vld [vmem:[%s3245_s1] ss:$0 sm:$0xff] }
 0xbda   :  { %v1060_v2 = vpop.f32.mrf.mxu1 }
 0xbdb   :  { %v1061_v3 = vadd.f32 %v1060_v2, %v1033_v17 }
 0xbdd   :  { %v1064_v4 = vmul.f32 %v1061_v3, %v1061_v3  ;;  %v1136_v5 = vpop.xlane.xlu1 %1135 }
 0xbde   :  { %v1140_v6 = vmul.f32 %v1136_v5, %v2678_v10 }
 0xbdf   :  { %v1066_v56 = vmul.f32 %v1064_v4, %v1061_v3 }
 0xbe0   :  { %v1142_v7 = vadd.f32 1e-12, %v1140_v6 }
 0xbe1   :  { %v1068_v8 = vmul.f32 0.044715, %v1066_v56 }
 0xbe2   :  { %2514 = vrsqrt.f32 %v1142_v7  ;;  %vm1150_vm6 = vweird.f32 %v1142_v7 }
 0xbe3   :  { %v1070_v9 = vadd.f32 %v1068_v8, %v1061_v3 }
 0xbe5   :  { %v1072_v47 = vmul.f32 0.7978846, %v1070_v9 }
 0xbe7   :  { %2516 = vtanh.f32 %v1072_v47 }
 0xbe8   :  { %v2515_v57 = vpop.eup %2514 }
 0xbe9   :  { %v1145_v11 = vmul.f32 %v2515_v57, %v1142_v7  ;;  %vm1151_vm5 = vweird.f32 %v2515_v57 }
 0xbea   :  { %vm1152_vm7 = vmor %vm1150_vm6, %vm1151_vm5 }
 0xbeb   :  { %v1146_v12 = vmul.f32 %v2515_v57, %v1145_v11 }
 0xbed   :  { %v2517_v13 = vpop.eup %2516  ;;  %v1147_v14 = vmul.f32 0.5, %v1146_v12 }
 0xbee   :  { %v1076_v15 = vadd.f32 1.0, %v2517_v13 }
 0xbef   :  { %v1148_v16 = vsub.f32 1.5, %v1147_v14 }
 0xbf0   :  { %v1078_v17 = vmul.f32 0.5, %v1076_v15 }
 0xbf1   :  { %v1149_v18 = vmul.f32 %v2515_v57, %v1148_v16 }
 0xbf2   :  { %v1080_v40 = vmul.f32 %v1078_v17, %v1061_v3 }
 0xbf3   :  { %v1153_v20 = vsel %vm1152_vm7, %v2515_v57, %v1149_v18  ;;  %v3014_v18 = vld [vmem:[%s3247_s3 + $0x20] sm:$0xff] }
 0xbf4   :  { %v1164_v21 = vmul.f32 %v1153_v20, %v1130_v55  ;;  %2392 = vmatmul.msk.f32.gmra.mxu0 %vm1090_vm1, %v1080_v40  ;;  %1311 = vmatpush.msra.mxu1 %v3014_v18 }
 0xbf6   :  { %v1167_v62 = vmul.f32 %v1166_v19, %v1164_v21 }
 0xbf8   :  { %v2951_v23 = vadd.f32 %v1169_v51, %v1167_v62 }
 0xbfa   :  { %2402 = vmatmul.msk.f32.vlgmr.msrb.gmra.mxu2 %vm39_vm0, %v2951_v23 }
 0xc71   :  { %v1117_v60 = vpop.f32.mrf.mxu0 }
 0xc72   :  { %v1118_v24 = vadd.f32 %v1117_v60, %v1089_v30 }
 0xc74   :  { %v1121_v25 = vadd.f32 %v1118_v24, %v1028_v49 }
 0xc76   :  { %v1125_v53 = vsel %vm39_vm0, %v1121_v25, 0.0 }
 0xc77   :  { %1126 = vadd.xlane.f32.xlu0 %v1125_v53 }
 0xc7d   :  { %v1208_v28 = vpop.f32.mrf.mxu2 }
 0xc7e   :  { %v2966_v29 = vadd.f32 %v1208_v28, %v1184_v27 }
 0xc80   :  { %1318 = vrot.lane.b32.xlu1 %v2966_v29, %s2606_s12  ;;  %1320 = vrot.lane.b32.xlu2 %v2966_v29, %s2602_s28 }
 0xcda   :  { %v1321_v54 = vpop.permute.xlu2 %1320 }
 0xcdb   :  { %2408 = vmatpush.xpose.msk.msra.mxu2 %vm140_vm8, %v1321_v54 }
 0xcea   :  { %v1127_v30 = vpop.xlane.xlu0 %1126 }
 0xceb   :  { %v1129_v31 = vmul.f32 %v1127_v30, %v2678_v10 }
 0xced   :  { %v1131_v32 = vsub.f32 %v1121_v25, %v1129_v31 }
 0xcef   :  { %v1133_v33 = vmul.f32 %v1131_v32, %v1131_v32 }
 0xcf1   :  { %v1137_v34 = vsel %vm39_vm0, %v1133_v33, 0.0 }
 0xcf2   :  { %1138 = vadd.xlane.f32.xlu0 %v1137_v34  ;;  %v1319_v52 = vpop.permute.xlu1 %1318 }
 0xd06   :  { %1215 = vrot.lane.b32.xlu0 %v2966_v29, %s2604_s30 }
 0xd65   :  { %v1139_v36 = vpop.xlane.xlu0 %1138 }
 0xd66   :  { %v1141_v35 = vmul.f32 %v1139_v36, %v2678_v10 }
 0xd68   :  { %v1143_v38 = vadd.f32 1e-12, %v1141_v35 }
 0xd6a   :  { %2518 = vrsqrt.f32 %v1143_v38  ;;  %vm1160_vm10 = vweird.f32 %v1143_v38 }
 0xd70   :  { %v2519_v39 = vpop.eup %2518 }
 0xd71   :  { %v1155_v41 = vmul.f32 %v2519_v39, %v1143_v38  ;;  %vm1161_vm9 = vweird.f32 %v2519_v39 }
 0xd72   :  { %vm1162_vm11 = vmor %vm1160_vm10, %vm1161_vm9 }
 0xd73   :  { %v1156_v42 = vmul.f32 %v2519_v39, %v1155_v41 }
 0xd75   :  { %v1157_v43 = vmul.f32 0.5, %v1156_v42  ;;  %v3024_v42 = vld [vmem:[%s3247_s3 + $0x28] sm:$0xff] }
 0xd76   :  { %1416 = vmatpush.msrb.mxu1 %v3024_v42 }
 0xd77   :  { %v1158_v44 = vsub.f32 1.5, %v1157_v43 }
 0xd78   :  { %v1216_v37 = vpop.permute.xlu0 %1215 }
 0xd79   :  { %v1159_v45 = vmul.f32 %v2519_v39, %v1158_v44  ;;  %2404 = vmatpush.xpose.msk.msrb.mxu3 %vm140_vm8, %v1216_v37 }
 0xd7b   :  { %v1163_v46 = vsel %vm1162_vm11, %v2519_v39, %v1159_v45 }
 0xd7c   :  { %2405 = vmatmul.msk.f32.vlgmr.msrb.gmra.mxu3 %vm140_vm8, %v2966_v29  ;;  %v1165_v48 = vmul.f32 %v1163_v46, %v1131_v32 }
 0xd7e   :  { %v1168_v49 = vmul.f32 %v1166_v19, %v1165_v48 }
 0xd80   :  { %v2981_v50 = vadd.f32 %v1169_v51, %v1168_v49 }
 0xd82   :  { %2403 = vmatmul.msk.f32.gmra.mxu2 %vm39_vm0, %v2981_v50 }
 0xd8a   :  { %2409 = vmatmul.msk.f32.vlgmr.msra.gmra.mxu2 %vm140_vm8, %v1319_v52 }
 0xdff   :  { %v1238_v55 = vpop.f32.mrf.mxu3 }
 0xe00   :  { %v1241_v58 = vmul.f32 0.35355338, %v1238_v55 }
 0xe02   :  { %v1242_v61 = vadd.f32 %v2989_v59, %v1241_v58 }
 0xe04   :  { %v1243_v63 = vsel %vm140_vm8, %v1242_v61, -inf }
 0xe05   :  { %v2993_v0 = vpop.f32.mrf.mxu2  ;;  %1244 = vmax.xlane.f32.xlu0 %v1243_v63 }
 0xe0d   :  { %v1343_v1 = vpop.f32.mrf.mxu2 }
 0xe0e   :  { %v1346_v2 = vmul.f32 0.35355338, %v1343_v1  ;;  %v1316_v1 = vperm.slane %v2961_v26, 1 }
 0xe10   :  { %v1347_v3 = vadd.f32 %v2989_v59, %v1346_v2 }
 0xe12   :  { %v1348_v4 = vsel %vm140_vm8, %v1347_v3, -inf }
 0xe13   :  { %1349 = vmax.xlane.f32.xlu2 %v1348_v4 }
 0xe2b   :  { %1372 = vrot.lane.b32.xlu2 %v2966_v29, %s2611_s20 }
 0xe33   :  { %1526 = vrot.lane.b32.xlu2 %v2966_v29, %s2609_s0 }
 0xe78   :  { %v1245_v5 = vpop.xlane.xlu0 %1244 }
 0xe79   :  { %v1246_v6 = vsub.f32 %v1242_v61, %v1245_v5 }
 0xe7b   :  { %v1247_v56 = vmul.f32 1.442695, %v1246_v6 }
 0xe7d   :  { %2520 = vpow2.f32 %v1247_v56 }
 0xe83   :  { %v2521_v7 = vpop.eup %2520 }
 0xe84   :  { %v1249_v8 = vsel %vm140_vm8, %v2521_v7, 0.0 }
 0xe85   :  { %1250 = vadd.xlane.f32.xlu1 %v1249_v8 }
 0xe86   :  { %v1350_v9 = vpop.xlane.xlu2 %1349 }
 0xe87   :  { %v1351_v47 = vsub.f32 %v1347_v3, %v1350_v9 }
 0xe89   :  { %v1352_v57 = vmul.f32 1.442695, %v1351_v47  ;;  %v3048_v47 = vadd.f32 %v2993_v0, %v1184_v27 }
 0xe8b   :  { %2522 = vpow2.f32 %v1352_v57 }
 0xe8e   :  { %v1373_v34 = vpop.permute.xlu2 %1372 }
 0xe91   :  { %v2523_v11 = vpop.eup %2522 }
 0xe92   :  { %v1354_v12 = vsel %vm140_vm8, %v2523_v11, 0.0 }
 0xe93   :  { %1355 = vadd.xlane.f32.xlu0 %v1354_v12 }
 0xe96   :  { %v1527_v52 = vpop.permute.xlu2 %1526 }
 0xe9e   :  { %1424 = vrot.lane.b32.xlu1 %v2966_v29, %s2605_s11 }
 0xea7   :  { %1267 = vrot.lane.b32.xlu0 %v2966_v29, %s2603_s29 }
 0xeaf   :  { %1422 = vrot.lane.b32.xlu0 %v2966_v29, %s2608_s16 }
 0xeb7   :  { %1528 = vrot.lane.b32.xlu0 %v2966_v29, %s2607_s13 }
 0xef8   :  { %v1251_v13 = vpop.xlane.xlu1 %1250 }
 0xef9   :  { %2524 = vrcp.f32 %v1251_v13  ;;  %v1263_v22 = vand.u32 2147483648, %v1251_v13  ;;  %vm1257_vm13 = vweird.f32 %v1251_v13  ;;  %v1261_v60 = vand.u32 2147483647, %v1251_v13 }
 0xefb   :  { %v1264_v53 = vor.u32 1.1754944e-38, %v1263_v22  ;;  %vm1262_vm15 = vcmp.eq.f32.partialorder %v1261_v60, 8.507059e+37  ;;  %v3055_v22 = vld [vmem:[%s3247_s3 + $0x38] sm:$0xff] }
 0xeff   :  { %v2525_v14 = vpop.eup %2524 }
 0xf00   :  { %v1253_v15 = vmul.f32 %v2525_v14, %v1251_v13  ;;  %vm1258_vm12 = vweird.f32 %v2525_v14 }
 0xf01   :  { %vm1259_vm14 = vmor %vm1257_vm13, %vm1258_vm12 }
 0xf02   :  { %v1254_v17 = vsub.f32 1.0, %v1253_v15 }
 0xf04   :  { %v1255_v19 = vmul.f32 %v2525_v14, %v1254_v17 }
 0xf06   :  { %v1356_v16 = vpop.xlane.xlu0 %1355  ;;  %v1256_v21 = vadd.f32 %v2525_v14, %v1255_v19 }
 0xf07   :  { %2526 = vrcp.f32 %v1356_v16  ;;  %v1368_v30 = vand.u32 2147483648, %v1356_v16  ;;  %vm1362_vm3 = vweird.f32 %v1356_v16  ;;  %v1366_v31 = vand.u32 2147483647, %v1356_v16 }
 0xf08   :  { %v1260_v24 = vsel %vm1259_vm14, %v2525_v14, %v1256_v21 }
 0xf09   :  { %v1265_v28 = vsel %vm1262_vm15, %v1264_v53, %v1260_v24  ;;  %v1369_v35 = vor.u32 1.1754944e-38, %v1368_v30  ;;  %vm1367_vm5 = vcmp.eq.f32.partialorder %v1366_v31, 8.507059e+37 }
 0xf0a   :  { %v1266_v33 = vmul.f32 %v2521_v7, %v1265_v28 }
 0xf0d   :  { %v2527_v40 = vpop.eup %2526 }
 0xf0e   :  { %v1358_v20 = vmul.f32 %v2527_v40, %v1356_v16  ;;  %vm1363_vm2 = vweird.f32 %v2527_v40 }
 0xf0f   :  { %vm1364_vm4 = vmor %vm1362_vm3, %vm1363_vm2 }
 0xf10   :  { %v1359_v51 = vsub.f32 1.0, %v1358_v20  ;;  %v1425_v62 = vpop.permute.xlu1 %1424 }
 0xf11   :  { %2412 = vmatpush.xpose.msk.msrb.mxu0 %vm140_vm8, %v1425_v62 }
 0xf12   :  { %v1360_v25 = vmul.f32 %v2527_v40, %v1359_v51 }
 0xf14   :  { %v1361_v54 = vadd.f32 %v2527_v40, %v1360_v25  ;;  %v3069_v25 = vld [vmem:[%s3247_s3 + $0x30] sm:$0xff] }
 0xf16   :  { %v1365_v36 = vsel %vm1364_vm4, %v2527_v40, %v1361_v54 }
 0xf17   :  { %v1370_v38 = vsel %vm1367_vm5, %v1369_v35, %v1365_v36 }
 0xf18   :  { %v1371_v41 = vmul.f32 %v2523_v11, %v1370_v38 }
 0xf19   :  { %v1268_v32 = vpop.permute.xlu0 %1267 }
 0xf1a   :  { %1288 = vmatpush.msra.mxu3 %v1268_v32 }
 0xf1b   :  { %2406 = vmatmul.msk.f32.vlgmr.msra.gmra.mxu3 %vm140_vm8, %v1266_v33 }
 0xf1c   :  { %1393 = vmatpush.msrb.mxu3 %v1373_v34 }
 0xf1e   :  { %1520 = vmatpush.msra.mxu3 %v3069_v25 }
 0xf21   :  { %v1423_v39 = vpop.permute.xlu0 %1422 }
 0xf22   :  { %2413 = vmatmul.msk.f32.vlgmr.msrb.gmra.mxu0 %vm140_vm8, %v1423_v39 }
 0xf23   :  { %2410 = vmatmul.msk.f32.vlgmr.msrb.gmra.mxu3 %vm140_vm8, %v1371_v41 }
 0xf29   :  { %v1529_v44 = vpop.permute.xlu0 %1528 }
 0xf9e   :  { %v1290_v43 = vpop.f32.mrf.mxu3 }
 0xf9f   :  { %2407 = vmatmul.msk.f32.vlgmr.msra.gmra.mxu1 %vm140_vm8, %v1290_v43  ;;  %v1447_v37 = vpop.f32.mrf.mxu0 }
 0xfa0   :  { %v1450_v45 = vmul.f32 0.35355338, %v1447_v37  ;;  %2416 = vmatpush.xpose.msk.msra.mxu1 %vm140_vm8, %v1529_v44 }
 0xfa2   :  { %v1451_v46 = vadd.f32 %v2989_v59, %v1450_v45 }
 0xfa4   :  { %v1452_v48 = vsel %vm140_vm8, %v1451_v46, -inf }
 0xfa5   :  { %1453 = vmax.xlane.f32.xlu0 %v1452_v48 }
 0xfa6   :  { %v1395_v49 = vpop.f32.mrf.mxu3 }
 0xfa7   :  { %2411 = vmatmul.msk.f32.vlgmr.msrb.gmra.mxu1 %vm140_vm8, %v1395_v49  ;;  %v3083_v49 = vld [vmem:[%s3245_s1 + $0x1] ss:$0 sm:$0xff] }
 0xfaf   :  { %2417 = vmatmul.msk.f32.vlgmr.msra.gmra.mxu1 %vm140_vm8, %v1527_v52 }
0x1018   :  { %v1454_v55 = vpop.xlane.xlu0 %1453 }
0x1019   :  { %v1455_v58 = vsub.f32 %v1451_v46, %v1454_v55 }
0x101b   :  { %v1456_v61 = vmul.f32 1.442695, %v1455_v58 }
0x101c   :  { %v1313_v63 = vpop.f32.mrf.mxu1 }
0x101d   :  { %2528 = vpow2.f32 %v1456_v61  ;;  %v1317_v3 = vadd.f32 %v1316_v1, %v1313_v63 }
0x1023   :  { %v2529_v2 = vpop.eup %2528 }
0x1024   :  { %v1418_v4 = vpop.f32.mrf.mxu1  ;;  %v1458_v5 = vsel %vm140_vm8, %v2529_v2, 0.0 }
0x1025   :  { %v3037_v6 = vadd.f32 %v1418_v4, %v1317_v3  ;;  %1459 = vadd.xlane.f32.xlu1 %v1458_v5 }
0x102c   :  { %v1551_v56 = vpop.f32.mrf.mxu1 }
0x102d   :  { %v1554_v7 = vmul.f32 0.35355338, %v1551_v56 }
0x102f   :  { %v1555_v8 = vadd.f32 %v2989_v59, %v1554_v7 }
0x1031   :  { %v1556_v9 = vsel %vm140_vm8, %v1555_v8, -inf }
0x1032   :  { %1557 = vmax.xlane.f32.xlu2 %v1556_v9 }
0x103e   :  { %1580 = vrot.lane.b32.xlu1 %v2966_v29, %s2610_s19 }
0x104a   :  { %1476 = vrot.lane.b32.xlu2 %v2966_v29, %s2612_s21 }
0x1052   :  { %1735 = vrot.lane.b32.xlu2 %v3048_v47, %s2602_s28 }
0x1098   :  { %v1460_v57 = vpop.xlane.xlu1 %1459 }
0x1099   :  { %2530 = vrcp.f32 %v1460_v57  ;;  %v1472_v14 = vand.u32 2147483648, %v1460_v57  ;;  %v1470_v15 = vand.u32 2147483647, %v1460_v57  ;;  %vm1466_vm7 = vweird.f32 %v1460_v57 }
0x109b   :  { %v1473_v27 = vor.u32 1.1754944e-38, %v1472_v14  ;;  %vm1471_vm10 = vcmp.eq.f32.partialorder %v1470_v15, 8.507059e+37 }
0x109f   :  { %v2531_v59 = vpop.eup %2530 }
0x10a0   :  { %v1462_v11 = vmul.f32 %v2531_v59, %v1460_v57  ;;  %vm1467_vm6 = vweird.f32 %v2531_v59 }
0x10a1   :  { %vm1468_vm9 = vmor %vm1466_vm7, %vm1467_vm6 }
0x10a2   :  { %v1463_v12 = vsub.f32 1.0, %v1462_v11 }
0x10a4   :  { %v1464_v13 = vmul.f32 %v2531_v59, %v1463_v12 }
0x10a5   :  { %v1558_v16 = vpop.xlane.xlu2 %1557 }
0x10a6   :  { %v1465_v17 = vadd.f32 %v2531_v59, %v1464_v13  ;;  %v1559_v29 = vsub.f32 %v1555_v8, %v1558_v16 }
0x10a8   :  { %v1469_v19 = vsel %vm1468_vm9, %v2531_v59, %v1465_v17  ;;  %v1560_v0 = vmul.f32 1.442695, %v1559_v29 }
0x10a9   :  { %v1474_v40 = vsel %vm1471_vm10, %v1473_v27, %v1469_v19 }
0x10aa   :  { %2532 = vpow2.f32 %v1560_v0  ;;  %v1475_v21 = vmul.f32 %v2529_v2, %v1474_v40 }
0x10ad   :  { %v1477_v20 = vpop.permute.xlu2 %1476 }
0x10ae   :  { %1497 = vmatpush.msrb.mxu2 %v1477_v20 }
0x10af   :  { %2414 = vmatmul.msk.f32.vlgmr.msrb.gmra.mxu2 %vm140_vm8, %v1475_v21 }
0x10b0   :  { %v2533_v51 = vpop.eup %2532  ;;  %v1581_v62 = vpop.permute.xlu1 %1580  ;;  %1624 = vmatpush.msra.mxu2 %v3055_v22 }
0x10b1   :  { %1601 = vmatpush.msra.mxu0 %v1581_v62  ;;  %v1562_v60 = vsel %vm140_vm8, %v2533_v51, 0.0 }
0x10b2   :  { %1563 = vadd.xlane.f32.xlu0 %v1562_v60 }
0x10b3   :  { %1727 = vmatpush.msrb.mxu0 %v3014_v18 }
0x10b5   :  { %v1736_v24 = vpop.permute.xlu2 %1735 }
0x10b6   :  { %2424 = vmatpush.xpose.msk.msrb.mxu2 %vm140_vm8, %v1736_v24 }
0x10c6   :  { %1631 = vrot.lane.b32.xlu0 %v3048_v47, %s2604_s30 }
0x10ce   :  { %1733 = vrot.lane.b32.xlu0 %v3048_v47, %s2606_s12 }
0x1125   :  { %v1564_v53 = vpop.xlane.xlu0 %1563 }
0x1126   :  { %2534 = vrcp.f32 %v1564_v53  ;;  %v1576_v30 = vand.u32 2147483648, %v1564_v53  ;;  %v1574_v32 = vand.u32 2147483647, %v1564_v53  ;;  %vm1570_vm12 = vweird.f32 %v1564_v53 }
0x1128   :  { %v1577_v36 = vor.u32 1.1754944e-38, %v1576_v30  ;;  %vm1575_vm14 = vcmp.eq.f32.partialorder %v1574_v32, 8.507059e+37 }
0x112c   :  { %v2535_v28 = vpop.eup %2534 }
0x112d   :  { %v1566_v18 = vmul.f32 %v2535_v28, %v1564_v53  ;;  %vm1571_vm11 = vweird.f32 %v2535_v28 }
0x112e   :  { %vm1572_vm13 = vmor %vm1570_vm12, %vm1571_vm11 }
0x112f   :  { %v1567_v54 = vsub.f32 1.0, %v1566_v18 }
0x1131   :  { %v1568_v31 = vmul.f32 %v2535_v28, %v1567_v54 }
0x1132   :  { %v1499_v33 = vpop.f32.mrf.mxu2 }
0x1133   :  { %v1569_v34 = vadd.f32 %v2535_v28, %v1568_v31  ;;  %2415 = vmatmul.msk.f32.vlgmr.msra.gmra.mxu3 %vm140_vm8, %v1499_v33 }
0x1135   :  { %v1573_v35 = vsel %vm1572_vm13, %v2535_v28, %v1569_v34 }
0x1136   :  { %v1578_v38 = vsel %vm1575_vm14, %v1577_v36, %v1573_v35 }
0x1137   :  { %v1579_v39 = vmul.f32 %v2533_v51, %v1578_v38 }
0x1138   :  { %v1632_v41 = vpop.permute.xlu0 %1631 }
0x1139   :  { %2418 = vmatmul.msk.f32.vlgmr.msra.gmra.mxu0 %vm140_vm8, %v1579_v39  ;;  %2420 = vmatpush.xpose.msk.msrb.mxu3 %vm140_vm8, %v1632_v41 }
0x113c   :  { %2421 = vmatmul.msk.f32.vlgmr.msrb.gmra.mxu3 %vm140_vm8, %v3048_v47 }
0x1140   :  { %v1734_v45 = vpop.permute.xlu0 %1733 }
0x11b6   :  { %v1522_v43 = vpop.f32.mrf.mxu3  ;;  %v1603_v44 = vpop.f32.mrf.mxu0 }
0x11b7   :  { %v1525_v37 = vadd.f32 %v1522_v43, %v3037_v6  ;;  %2419 = vmatmul.msk.f32.vlgmr.msra.gmra.mxu2 %vm140_vm8, %v1603_v44 }
0x11bf   :  { %v1654_v46 = vpop.f32.mrf.mxu3  ;;  %2425 = vmatmul.msk.f32.vlgmr.msrb.gmra.mxu2 %vm140_vm8, %v1734_v45 }
0x11c0   :  { %v1657_v48 = vmul.f32 0.35355338, %v1654_v46 }
0x11c2   :  { %v1658_v52 = vadd.f32 %v3083_v49, %v1657_v48 }
0x11c4   :  { %v1659_v55 = vsel %vm140_vm8, %v1658_v52, -inf }
0x11c5   :  { %1660 = vmax.xlane.f32.xlu1 %v1659_v55 }
0x1238   :  { %v1661_v58 = vpop.xlane.xlu1 %1660 }
0x1239   :  { %v1662_v61 = vsub.f32 %v1658_v52, %v1661_v58 }
0x123a   :  { %v1626_v63 = vpop.f32.mrf.mxu2 }
0x123b   :  { %v1663_v2 = vmul.f32 1.442695, %v1662_v61  ;;  %v3087_v3 = vadd.f32 %v1626_v63, %v1525_v37 }
0x123d   :  { %2536 = vpow2.f32 %v1663_v2 }
0x1242   :  { %v1758_v4 = vpop.f32.mrf.mxu2 }
0x1243   :  { %v2537_v5 = vpop.eup %2536  ;;  %v1761_v6 = vmul.f32 0.35355338, %v1758_v4 }
0x1244   :  { %v1665_v56 = vsel %vm140_vm8, %v2537_v5, 0.0 }
0x1245   :  { %1666 = vadd.xlane.f32.xlu0 %v1665_v56  ;;  %v1762_v7 = vadd.f32 %v3083_v49, %v1761_v6 }
0x1247   :  { %v1763_v8 = vsel %vm140_vm8, %v1762_v7, -inf }
0x1248   :  { %1764 = vmax.xlane.f32.xlu2 %v1763_v8 }
0x1259   :  { %1787 = vrot.lane.b32.xlu0 %v3048_v47, %s2611_s20 }
0x1260   :  { %1683 = vrot.lane.b32.xlu2 %v3048_v47, %s2603_s29 }
0x1261   :  { %1837 = vrot.lane.b32.xlu0 %v3048_v47, %s2608_s16 }
0x1268   :  { %1943 = vrot.lane.b32.xlu2 %v3048_v47, %s2607_s13 }
0x12b8   :  { %v1667_v9 = vpop.xlane.xlu0 %1666 }
0x12b9   :  { %2538 = vrcp.f32 %v1667_v9  ;;  %v1679_v15 = vand.u32 2147483648, %v1667_v9  ;;  %v1677_v29 = vand.u32 2147483647, %v1667_v9  ;;  %vm1673_vm2 = vweird.f32 %v1667_v9 }
0x12bb   :  { %v1765_v57 = vpop.xlane.xlu2 %1764  ;;  %v1680_v0 = vor.u32 1.1754944e-38, %v1679_v15  ;;  %vm1678_vm4 = vcmp.eq.f32.partialorder %v1677_v29, 8.507059e+37 }
0x12bc   :  { %v1766_v59 = vsub.f32 %v1762_v7, %v1765_v57 }
0x12be   :  { %v1767_v11 = vmul.f32 1.442695, %v1766_v59 }
0x12bf   :  { %v2539_v12 = vpop.eup %2538 }
0x12c0   :  { %v1669_v13 = vmul.f32 %v2539_v12, %v1667_v9  ;;  %2540 = vpow2.f32 %v1767_v11  ;;  %vm1674_vm15 = vweird.f32 %v2539_v12 }
0x12c1   :  { %vm1675_vm3 = vmor %vm1673_vm2, %vm1674_vm15 }
0x12c2   :  { %v1670_v14 = vsub.f32 1.0, %v1669_v13 }
0x12c3   :  { %v1684_v16 = vpop.permute.xlu2 %1683 }
0x12c4   :  { %v1671_v17 = vmul.f32 %v2539_v12, %v1670_v14  ;;  %1704 = vmatpush.msrb.mxu1 %v1684_v16 }
0x12c6   :  { %1831 = vmatpush.msra.mxu1 %v3024_v42  ;;  %v2541_v19 = vpop.eup %2540  ;;  %v1672_v27 = vadd.f32 %v2539_v12, %v1671_v17 }
0x12c7   :  { %v1769_v40 = vsel %vm140_vm8, %v2541_v19, 0.0 }
0x12c8   :  { %v1676_v20 = vsel %vm1675_vm3, %v2539_v12, %v1672_v27  ;;  %1770 = vadd.xlane.f32.xlu1 %v1769_v40 }
0x12c9   :  { %v1681_v21 = vsel %vm1678_vm4, %v1680_v0, %v1676_v20  ;;  %v2045_v0 = vadd.f32 %v3087_v3, %v2951_v23 }
0x12ca   :  { %v1682_v51 = vmul.f32 %v2537_v5, %v1681_v21 }
0x12cb   :  { %v1944_v62 = vpop.permute.xlu2 %1943  ;;  %v1788_v60 = vpop.permute.xlu0 %1787  ;;  %v2047_v20 = vsel %vm39_vm0, %v2045_v0, 0.0 }
0x12cc   :  { %2422 = vmatmul.msk.f32.vlgmr.msrb.gmra.mxu1 %vm140_vm8, %v1682_v51  ;;  %1808 = vmatpush.msra.mxu3 %v1788_v60 }
0x12cd   :  { %2432 = vmatpush.xpose.msk.msrb.mxu1 %vm140_vm8, %v1944_v62 }
0x12ce   :  { %1935 = vmatpush.msrb.mxu3 %v3069_v25 }
0x12d3   :  { %v1838_v38 = vpop.permute.xlu0 %1837 }
0x12e1   :  { %1839 = vrot.lane.b32.xlu1 %v3048_v47, %s2605_s11 }
0x12e9   :  { %1941 = vrot.lane.b32.xlu1 %v3048_v47, %s2609_s0 }
0x133b   :  { %v1771_v42 = vpop.xlane.xlu1 %1770 }
0x133c   :  { %2542 = vrcp.f32 %v1771_v42  ;;  %v1783_v18 = vand.u32 2147483648, %v1771_v42  ;;  %v1781_v30 = vand.u32 2147483647, %v1771_v42  ;;  %vm1777_vm6 = vweird.f32 %v1771_v42 }
0x133e   :  { %v1784_v25 = vor.u32 1.1754944e-38, %v1783_v18  ;;  %vm1782_vm9 = vcmp.eq.f32.partialorder %v1781_v30, 8.507059e+37 }
0x1342   :  { %v2543_v24 = vpop.eup %2542 }
0x1343   :  { %v1773_v53 = vmul.f32 %v2543_v24, %v1771_v42  ;;  %vm1778_vm5 = vweird.f32 %v2543_v24 }
0x1344   :  { %vm1779_vm7 = vmor %vm1777_vm6, %vm1778_vm5 }
0x1345   :  { %v1774_v28 = vsub.f32 1.0, %v1773_v53 }
0x1347   :  { %v1775_v54 = vmul.f32 %v2543_v24, %v1774_v28 }
0x1349   :  { %v1776_v31 = vadd.f32 %v2543_v24, %v1775_v54  ;;  %v1706_v32 = vpop.f32.mrf.mxu1 }
0x134a   :  { %2423 = vmatmul.msk.f32.vlgmr.msrb.gmra.mxu0 %vm140_vm8, %v1706_v32 }
0x134b   :  { %v1780_v33 = vsel %vm1779_vm7, %v2543_v24, %v1776_v31 }
0x134c   :  { %v1785_v34 = vsel %vm1782_vm9, %v1784_v25, %v1780_v33 }
0x134d   :  { %v1786_v36 = vmul.f32 %v2541_v19, %v1785_v34 }
0x134f   :  { %2426 = vmatmul.msk.f32.vlgmr.msra.gmra.mxu3 %vm140_vm8, %v1786_v36  ;;  %v2439_v36 = vld [vmem:[%s3248_s4 + $0x38] sm:$0xff] }
0x1350   :  { %2121 = vmatpush.msra.mxu3 %v2439_v36 }
0x1353   :  { %v1840_v35 = vpop.permute.xlu1 %1839 }
0x1354   :  { %2428 = vmatpush.xpose.msk.msra.mxu0 %vm140_vm8, %v1840_v35  ;;  %v2438_v35 = vld [vmem:[%s3248_s4 + $0x30] sm:$0xff] }
0x1355   :  { %2122 = vmatpush.msra.mxu3 %v2438_v35 }
0x1357   :  { %2429 = vmatmul.msk.f32.vlgmr.msra.gmra.mxu0 %vm140_vm8, %v1838_v38  ;;  %v2437_v38 = vld [vmem:[%s3248_s4 + $0x28] sm:$0xff] }
0x1358   :  { %2123 = vmatpush.msra.mxu3 %v2437_v38 }
0x135b   :  { %v1942_v46 = vpop.permute.xlu1 %1941 }
0x13c7   :  { %v1729_v39 = vpop.f32.mrf.mxu0 }
0x13c8   :  { %v1732_v55 = vadd.f32 %v1729_v39, %v1316_v1  ;;  %v2436_v39 = vld [vmem:[%s3248_s4 + $0x20] sm:$0xff] }
0x13c9   :  { %2124 = vmatpush.msra.mxu3 %v2436_v39 }
0x13d2   :  { %v1810_v41 = vpop.f32.mrf.mxu3 }
0x13d3   :  { %2427 = vmatmul.msk.f32.vlgmr.msra.gmra.mxu1 %vm140_vm8, %v1810_v41 }
0x13d4   :  { %v1862_v43 = vpop.f32.mrf.mxu0 }
0x13d5   :  { %v1865_v44 = vmul.f32 0.35355338, %v1862_v43 }
0x13d7   :  { %v1866_v37 = vadd.f32 %v3083_v49, %v1865_v44 }
0x13d9   :  { %v1867_v45 = vsel %vm140_vm8, %v1866_v37, -inf }
0x13da   :  { %1868 = vmax.xlane.f32.xlu0 %v1867_v45 }
0x13db   :  { %2433 = vmatmul.msk.f32.vlgmr.msrb.gmra.mxu1 %vm140_vm8, %v1942_v46 }
0x13ee   :  { %1891 = vrot.lane.b32.xlu0 %v3048_v47, %s2612_s21 }
0x144d   :  { %v1869_v48 = vpop.xlane.xlu0 %1868 }
0x144e   :  { %v1870_v52 = vsub.f32 %v1866_v37, %v1869_v48 }
0x1450   :  { %v1871_v58 = vmul.f32 1.442695, %v1870_v52  ;;  %v1833_v61 = vpop.f32.mrf.mxu1 }
0x1451   :  { %v3121_v63 = vadd.f32 %v1833_v61, %v1732_v55  ;;  %v2091_v61 = vperm.slane %v2961_v26, 2 }
0x1452   :  { %2544 = vpow2.f32 %v1871_v58 }
0x1458   :  { %v2545_v2 = vpop.eup %2544  ;;  %v1966_v4 = vpop.f32.mrf.mxu1 }
0x1459   :  { %v1969_v5 = vmul.f32 0.35355338, %v1966_v4  ;;  %v1873_v6 = vsel %vm140_vm8, %v2545_v2, 0.0 }
0x145a   :  { %1874 = vadd.xlane.f32.xlu1 %v1873_v6 }
0x145b   :  { %v1970_v56 = vadd.f32 %v3083_v49, %v1969_v5  ;;  %v2094_v5 = vperm.slane %v2961_v26, 3 }
0x145d   :  { %v1971_v7 = vsel %vm140_vm8, %v1970_v56, -inf }
0x145e   :  { %1972 = vmax.xlane.f32.xlu2 %v1971_v7  ;;  %v2449_v7 = vld [vmem:[%s3249_s5 + $0x78] sm:$0xff] }
0x145f   :  { %2174 = vmatpush.msra.mxu1 %v2449_v7 }
0x1460   :  { %v1892_v8 = vpop.permute.xlu0 %1891 }
0x1461   :  { %1912 = vmatpush.msra.mxu2 %v1892_v8  ;;  %v2448_v8 = vld [vmem:[%s3249_s5 + $0x70] sm:$0xff] }
0x1462   :  { %2175 = vmatpush.msra.mxu1 %v2448_v8 }
0x1463   :  { %2039 = vmatpush.msrb.mxu2 %v3055_v22 }
0x1473   :  { %1995 = vrot.lane.b32.xlu1 %v3048_v47, %s2610_s19 }
0x14cd   :  { %v1875_v1 = vpop.xlane.xlu1 %1874 }
0x14ce   :  { %2546 = vrcp.f32 %v1875_v1  ;;  %v1887_v49 = vand.u32 2147483648, %v1875_v1  ;;  %v1885_v15 = vand.u32 2147483647, %v1875_v1  ;;  %vm1881_vm11 = vweird.f32 %v1875_v1 }
0x14d0   :  { %v1888_v22 = vor.u32 1.1754944e-38, %v1887_v49  ;;  %vm1886_vm13 = vcmp.eq.f32.partialorder %v1885_v15, 8.507059e+37  ;;  %v2443_v15 = vld [vmem:[%s3249_s5 + $0x48] sm:$0xff] }
0x14d1   :  { %v1973_v9 = vpop.xlane.xlu2 %1972 }
0x14d2   :  { %v1974_v57 = vsub.f32 %v1970_v56, %v1973_v9  ;;  %v2447_v9 = vld [vmem:[%s3249_s5 + $0x68] sm:$0xff] }
0x14d3   :  { %2176 = vmatpush.msra.mxu1 %v2447_v9 }
0x14d4   :  { %v2547_v59 = vpop.eup %2546  ;;  %v1975_v11 = vmul.f32 1.442695, %v1974_v57 }
0x14d5   :  { %v1877_v12 = vmul.f32 %v2547_v59, %v1875_v1  ;;  %vm1882_vm10 = vweird.f32 %v2547_v59 }
0x14d6   :  { %2548 = vpow2.f32 %v1975_v11  ;;  %vm1883_vm12 = vmor %vm1881_vm11, %vm1882_vm10 }
0x14d7   :  { %v1878_v13 = vsub.f32 1.0, %v1877_v12 }
0x14d9   :  { %v1879_v14 = vmul.f32 %v2547_v59, %v1878_v13  ;;  %v2445_v13 = vld [vmem:[%s3249_s5 + $0x58] sm:$0xff] }
0x14db   :  { %v1880_v16 = vadd.f32 %v2547_v59, %v1879_v14  ;;  %v2444_v14 = vld [vmem:[%s3249_s5 + $0x50] sm:$0xff] }
0x14dc   :  { %v2549_v17 = vpop.eup %2548 }
0x14dd   :  { %v1884_v29 = vsel %vm1883_vm12, %v2547_v59, %v1880_v16  ;;  %v1977_v47 = vsel %vm140_vm8, %v2549_v17, 0.0  ;;  %v2446_v59 = vld [vmem:[%s3249_s5 + $0x60] sm:$0xff] }
0x14de   :  { %v1889_v19 = vsel %vm1886_vm13, %v1888_v22, %v1884_v29  ;;  %1978 = vadd.xlane.f32.xlu2 %v1977_v47  ;;  %2177 = vmatpush.msra.mxu1 %v2446_v59  ;;  %v2442_v16 = vld [vmem:[%s3249_s5 + $0x40] sm:$0xff] }
0x14df   :  { %v1890_v27 = vmul.f32 %v2545_v2, %v1889_v19 }
0x14e0   :  { %2178 = vmatpush.msra.mxu1 %v2445_v13 }
0x14e1   :  { %2430 = vmatmul.msk.f32.vlgmr.msra.gmra.mxu2 %vm140_vm8, %v1890_v27 }
0x14e2   :  { %2179 = vmatpush.msra.mxu1 %v2444_v14 }
0x14e4   :  { %2180 = vmatpush.msra.mxu1 %v2443_v15 }
0x14e5   :  { %v1996_v40 = vpop.permute.xlu1 %1995 }
0x14e6   :  { %2048 = vadd.xlane.f32.xlu2 %v2047_v20  ;;  %2016 = vmatpush.msrb.mxu0 %v1996_v40 }
0x14e7   :  { %2181 = vmatpush.msra.mxu1 %v2442_v16 }
0x1551   :  { %v1979_v21 = vpop.xlane.xlu2 %1978 }
0x1552   :  { %2550 = vrcp.f32 %v1979_v21  ;;  %v1991_v53 = vand.u32 2147483648, %v1979_v21  ;;  %v1989_v54 = vand.u32 2147483647, %v1979_v21  ;;  %vm1985_vm15 = vweird.f32 %v1979_v21 }
0x1554   :  { %v1992_v3 = vor.u32 1.1754944e-38, %v1991_v53  ;;  %vm1990_vm3 = vcmp.eq.f32.partialorder %v1989_v54, 8.507059e+37 }
0x1558   :  { %v2551_v51 = vpop.eup %2550 }
0x1559   :  { %v1981_v62 = vmul.f32 %v2551_v51, %v1979_v21  ;;  %v2049_v60 = vpop.xlane.xlu2 %2048  ;;  %vm1986_vm14 = vweird.f32 %v2551_v51 }
0x155a   :  { %v2053_v42 = vmul.f32 %v2049_v60, %v2678_v10  ;;  %vm1987_vm2 = vmor %vm1985_vm15, %vm1986_vm14  ;;  %vm2244_vm15 = vcmask 1040384  }
0x155b   :  { %v1982_v24 = vsub.f32 1.0, %v1981_v62 }
0x155c   :  { %v2055_v28 = vsub.f32 %v2045_v0, %v2053_v42 }
0x155d   :  { %v1983_v18 = vmul.f32 %v2551_v51, %v1982_v24 }
0x155e   :  { %v2057_v30 = vmul.f32 %v2055_v28, %v2055_v28 }
0x155f   :  { %v1984_v23 = vadd.f32 %v2551_v51, %v1983_v18 }
0x1560   :  { %v2059_v31 = vsel %vm39_vm0, %v2057_v30, 0.0 }
0x1561   :  { %v1988_v32 = vsel %vm1987_vm2, %v2551_v51, %v1984_v23  ;;  %2060 = vadd.xlane.f32.xlu0 %v2059_v31  ;;  %vm2303_vm2 = vcmask 123904  }
0x1562   :  { %v1993_v25 = vsel %vm1990_vm3, %v1992_v3, %v1988_v32 }
0x1563   :  { %v1994_v33 = vmul.f32 %v2549_v17, %v1993_v25 }
0x1564   :  { %v1914_v34 = vpop.f32.mrf.mxu2 }
0x1565   :  { %2431 = vmatmul.msk.f32.vlgmr.msrb.gmra.mxu3 %vm140_vm8, %v1914_v34  ;;  %2434 = vmatmul.msk.f32.vlgmr.msrb.gmra.mxu0 %vm140_vm8, %v1994_v33 }
0x15d4   :  { %v2061_v41 = vpop.xlane.xlu0 %2060 }
0x15d5   :  { %v2065_v43 = vmul.f32 %v2061_v41, %v2678_v10 }
0x15d7   :  { %v2067_v44 = vadd.f32 1e-12, %v2065_v43 }
0x15d9   :  { %2552 = vrsqrt.f32 %v2067_v44  ;;  %vm2075_vm5 = vweird.f32 %v2067_v44 }
0x15df   :  { %v2553_v37 = vpop.eup %2552 }
0x15e0   :  { %v2070_v45 = vmul.f32 %v2553_v37, %v2067_v44  ;;  %vm2076_vm4 = vweird.f32 %v2553_v37 }
0x15e1   :  { %vm2077_vm6 = vmor %vm2075_vm5, %vm2076_vm4 }
0x15e2   :  { %v2071_v46 = vmul.f32 %v2553_v37, %v2070_v45  ;;  %v2018_v48 = vpop.f32.mrf.mxu0 }
0x15e3   :  { %2435 = vmatmul.msk.f32.vlgmr.msrb.gmra.mxu2 %vm140_vm8, %v2018_v48 }
0x15e4   :  { %v2072_v52 = vmul.f32 0.5, %v2071_v46 }
0x15e6   :  { %v2073_v55 = vsub.f32 1.5, %v2072_v52 }
0x15e8   :  { %v2074_v58 = vmul.f32 %v2553_v37, %v2073_v55  ;;  %v1937_v1 = vpop.f32.mrf.mxu3 }
0x15e9   :  { %v1940_v57 = vadd.f32 %v1937_v1, %v3121_v63 }
0x15ea   :  { %v2078_v2 = vsel %vm2077_vm6, %v2553_v37, %v2074_v58 }
0x15eb   :  { %v2089_v4 = vmul.f32 %v2078_v2, %v2055_v28  ;;  %v2159_v28 = vperm.slane %v2961_v26, 5 }
0x15ed   :  { %v2092_v6 = vmul.f32 %v2091_v61, %v2089_v4 }
0x15ef   :  { %v2095_v56 = vadd.f32 %v2094_v5, %v2092_v6 }
0x15f1   :  { %2440 = vmatmul.msk.f32.vlgmr.msra.gmra.mxu3 %vm39_vm0, %v2095_v56 }
0x1666   :  { %v2041_v11 = vpop.f32.mrf.mxu2 }
0x1667   :  { %v2044_v12 = vadd.f32 %v2041_v11, %v1940_v57 }
0x1669   :  { %v2046_v49 = vadd.f32 %v2044_v12, %v2981_v50  ;;  %v2102_v50 = vperm.slane %v2961_v26, 4 }
0x166b   :  { %v2050_v63 = vsel %vm39_vm0, %v2046_v49, 0.0 }
0x166c   :  { %2051 = vadd.xlane.f32.xlu2 %v2050_v63  ;;  %v2249_v63 = vld [vmem:[%s3252_s8 + $0x18] sm:$0xff] }
0x166d   :  { %2266 = vmatpush.msra.mxu0 %v2249_v63 }
0x1674   :  { %v2126_v17 = vpop.f32.mrf.mxu3 }
0x1675   :  { %v2127_v22 = vadd.f32 %v2126_v17, %v2102_v50  ;;  %v2247_v17 = vld [vmem:[%s3252_s8 + $0x8] sm:$0xff] }
0x1677   :  { %v2132_v29 = vmul.f32 %v2127_v22, %v2127_v22 }
0x1679   :  { %v2134_v47 = vmul.f32 %v2132_v29, %v2127_v22  ;;  %v2246_v29 = vld [vmem:[%s3252_s8] sm:$0xff] }
0x167b   :  { %v2136_v19 = vmul.f32 0.044715, %v2134_v47 }
0x167d   :  { %v2138_v27 = vadd.f32 %v2136_v19, %v2127_v22 }
0x167f   :  { %v2140_v0 = vmul.f32 0.7978846, %v2138_v27 }
0x1681   :  { %2554 = vtanh.f32 %v2140_v0 }
0x1687   :  { %v2555_v40 = vpop.eup %2554 }
0x1688   :  { %v2144_v20 = vadd.f32 1.0, %v2555_v40 }
0x168a   :  { %v2146_v21 = vmul.f32 0.5, %v2144_v20 }
0x168c   :  { %v2148_v51 = vmul.f32 %v2146_v21, %v2127_v22 }
0x168e   :  { %2450 = vmatmul.msk.f32.vlgmr.msra.gmra.mxu1 %vm1090_vm1, %v2148_v51 }
0x16df   :  { %v2052_v62 = vpop.xlane.xlu2 %2051 }
0x16e0   :  { %v2054_v60 = vmul.f32 %v2052_v62, %v2678_v10 }
0x16e2   :  { %v2056_v42 = vsub.f32 %v2046_v49, %v2054_v60 }
0x16e4   :  { %v2058_v24 = vmul.f32 %v2056_v42, %v2056_v42 }
0x16e6   :  { %v2062_v53 = vsel %vm39_vm0, %v2058_v24, 0.0 }
0x16e7   :  { %2063 = vadd.xlane.f32.xlu2 %v2062_v53 }
0x170b   :  { %v2183_v18 = vpop.f32.mrf.mxu1 }
0x170c   :  { %v2184_v54 = vadd.f32 %v2183_v18, %v2159_v28 }
0x170e   :  { %v2189_v30 = vadd.f32 %v2184_v54, %v2095_v56 }
0x1710   :  { %v2191_v23 = vsel %vm39_vm0, %v2189_v30, 0.0 }
0x1711   :  { %2192 = vadd.xlane.f32.xlu2 %v2191_v23 }
0x175a   :  { %v2064_v3 = vpop.xlane.xlu2 %2063 }
0x175b   :  { %v2066_v31 = vmul.f32 %v2064_v3, %v2678_v10 }
0x175d   :  { %v2068_v32 = vadd.f32 1e-12, %v2066_v31 }
0x175f   :  { %2556 = vrsqrt.f32 %v2068_v32  ;;  %vm2085_vm7 = vweird.f32 %v2068_v32 }
0x1765   :  { %v2557_v25 = vpop.eup %2556 }
0x1766   :  { %v2080_v33 = vmul.f32 %v2557_v25, %v2068_v32  ;;  %vm2086_vm8 = vweird.f32 %v2557_v25 }
0x1767   :  { %vm2087_vm9 = vmor %vm2085_vm7, %vm2086_vm8 }
0x1768   :  { %v2081_v34 = vmul.f32 %v2557_v25, %v2080_v33 }
0x176a   :  { %v2082_v36 = vmul.f32 0.5, %v2081_v34 }
0x176c   :  { %v2083_v35 = vsub.f32 1.5, %v2082_v36 }
0x176e   :  { %v2084_v38 = vmul.f32 %v2557_v25, %v2083_v35 }
0x1770   :  { %v2088_v39 = vsel %vm2087_vm9, %v2557_v25, %v2084_v38 }
0x1771   :  { %v2090_v41 = vmul.f32 %v2088_v39, %v2056_v42  ;;  %v2278_v39 = vld [vmem:[%s3253_s9 + $0x18] sm:$0xff] }
0x1772   :  { %2295 = vmatpush.msra.mxu2 %v2278_v39 }
0x1773   :  { %v2093_v43 = vmul.f32 %v2091_v61, %v2090_v41  ;;  %v2277_v41 = vld [vmem:[%s3253_s9 + $0x10] sm:$0xff] }
0x1774   :  { %2296 = vmatpush.msra.mxu2 %v2277_v41 }
0x1775   :  { %v2096_v44 = vadd.f32 %v2094_v5, %v2093_v43  ;;  %v2276_v43 = vld [vmem:[%s3253_s9 + $0x8] sm:$0xff] }
0x1776   :  { %2297 = vmatpush.msra.mxu2 %v2276_v43 }
0x1777   :  { %2441 = vmatmul.msk.f32.gmra.mxu3 %vm39_vm0, %v2096_v44 }
0x1784   :  { %v2193_v8 = vpop.xlane.xlu2 %2192 }
0x1785   :  { %v2197_v57 = vmul.f32 %v2193_v8, %v2678_v10 }
0x1787   :  { %v2199_v12 = vsub.f32 %v2189_v30, %v2197_v57 }
0x1789   :  { %v2201_v49 = vmul.f32 %v2199_v12, %v2199_v12 }
0x178b   :  { %v2203_v14 = vsel %vm39_vm0, %v2201_v49, 0.0 }
0x17fa   :  { %v2129_v37 = vpop.f32.mrf.mxu3 }
0x17fb   :  { %v2130_v45 = vadd.f32 %v2129_v37, %v2102_v50  ;;  %v2248_v50 = vld [vmem:[%s3252_s8 + $0x10] sm:$0xff]  ;;  %v2574_v37 = vld [vmem:[%s3251_s7] sm:$0x3f]  ;;  %s2614_s7 = smov [#allocation2]  }
0x17fc   :  { %2267 = vmatpush.msra.mxu0 %v2248_v50 }
0x17fd   :  { %v2133_v46 = vmul.f32 %v2130_v45, %v2130_v45 }
0x17fe   :  { %2268 = vmatpush.msra.mxu0 %v2247_v17 }
0x17ff   :  { %v2135_v48 = vmul.f32 %v2133_v46, %v2130_v45 }
0x1800   :  { %2269 = vmatpush.msra.mxu0 %v2246_v29 }
0x1801   :  { %v2137_v52 = vmul.f32 0.044715, %v2135_v48 }
0x1803   :  { %v2139_v55 = vadd.f32 %v2137_v52, %v2130_v45 }
0x1805   :  { %v2141_v58 = vmul.f32 0.7978846, %v2139_v55  ;;  %v2279_v55 = vperm.slane %v2574_v37, 3 }
0x1807   :  { %2558 = vtanh.f32 %v2141_v58 }
0x180d   :  { %v2559_v2 = vpop.eup %2558 }
0x180e   :  { %v2145_v4 = vadd.f32 1.0, %v2559_v2 }
0x1810   :  { %v2147_v6 = vmul.f32 0.5, %v2145_v4 }
0x1812   :  { %v2149_v56 = vmul.f32 %v2147_v6, %v2130_v45  ;;  %v2250_v45 = vperm.slane %v2574_v37, 2  ;;  %v2613_v6 = vmov 16.0  }
0x1814   :  { %2451 = vmatmul.msk.f32.gmra.mxu1 %vm1090_vm1, %v2149_v56 }
0x1891   :  { %v2186_v61 = vpop.f32.mrf.mxu1 }
0x1892   :  { %v2187_v7 = vadd.f32 %v2186_v61, %v2159_v28  ;;  %v2573_v28 = vld [vmem:[%s3250_s6 + $0x8] sm:$0xff] }
0x1893   :  { %v2238_v3 = vperm.slane %v2573_v28, 7 }
0x1894   :  { %v2190_v26 = vadd.f32 %v2187_v7, %v2096_v44  ;;  %v2275_v44 = vld [vmem:[%s3253_s9] sm:$0xff]  ;;  %s2343_s9 = sshll.u32 %s2614_s7, 4  ;;  %s2344_s9 = int_to_ptr.vmem [resolvable:$true] %s2343_s9 }
0x1895   :  { %2298 = vmatpush.msra.mxu2 %v2275_v44 }
0x1896   :  { %v2194_v5 = vsel %vm39_vm0, %v2190_v26, 0.0 }
0x1897   :  { %2195 = vadd.xlane.f32.xlu1 %v2194_v5 }
0x190a   :  { %v2196_v1 = vpop.xlane.xlu1 %2195 }
0x190b   :  { %v2198_v9 = vmul.f32 %v2196_v1, %v2678_v10 }
0x190d   :  { %v2200_v59 = vsub.f32 %v2190_v26, %v2198_v9 }
0x190f   :  { %v2202_v11 = vmul.f32 %v2200_v59, %v2200_v59 }
0x1911   :  { %v2206_v13 = vsel %vm39_vm0, %v2202_v11, 0.0 }
0x1912   :  { %2207 = vadd.xlane.f32.xlu2 %v2206_v13 }
0x191a   :  { %2204 = vadd.xlane.f32.xlu2 %v2203_v14 }
0x1985   :  { %v2208_v15 = vpop.xlane.xlu2 %2207 }
0x1986   :  { %v2210_v16 = vmul.f32 %v2208_v15, %v2678_v10 }
0x1988   :  { %v2212_v22 = vadd.f32 1e-12, %v2210_v16 }
0x198a   :  { %2560 = vrsqrt.f32 %v2212_v22  ;;  %vm2229_vm10 = vweird.f32 %v2212_v22 }
0x198d   :  { %v2205_v47 = vpop.xlane.xlu2 %2204 }
0x198e   :  { %v2209_v19 = vmul.f32 %v2205_v47, %v2678_v10  ;;  %v2235_v10 = vperm.slane %v2573_v28, 6 }
0x1990   :  { %v2561_v27 = vpop.eup %2560  ;;  %v2211_v0 = vadd.f32 1e-12, %v2209_v19  ;;  %v2335_v19 = vperm.slane %v2574_v37, 5 }
0x1991   :  { %v2224_v40 = vmul.f32 %v2561_v27, %v2212_v22  ;;  %vm2230_vm1 = vweird.f32 %v2561_v27  ;;  %v2333_v22 = vperm.slane %v2574_v37, 4 }
0x1992   :  { %2562 = vrsqrt.f32 %v2211_v0  ;;  %vm2231_vm11 = vmor %vm2229_vm10, %vm2230_vm1  ;;  %vm2219_vm13 = vweird.f32 %v2211_v0 }
0x1993   :  { %v2225_v20 = vmul.f32 %v2561_v27, %v2224_v40 }
0x1995   :  { %v2226_v21 = vmul.f32 0.5, %v2225_v20 }
0x1997   :  { %v2227_v51 = vsub.f32 1.5, %v2226_v21 }
0x1998   :  { %v2563_v62 = vpop.eup %2562 }
0x1999   :  { %v2228_v60 = vmul.f32 %v2561_v27, %v2227_v51  ;;  %v2214_v42 = vmul.f32 %v2563_v62, %v2211_v0  ;;  %vm2220_vm12 = vweird.f32 %v2563_v62 }
0x199a   :  { %vm2221_vm14 = vmor %vm2219_vm13, %vm2220_vm12 }
0x199b   :  { %v2232_v24 = vsel %vm2231_vm11, %v2561_v27, %v2228_v60  ;;  %v2215_v53 = vmul.f32 %v2563_v62, %v2214_v42 }
0x199c   :  { %v2234_v18 = vmul.f32 %v2232_v24, %v2200_v59 }
0x199d   :  { %v2216_v54 = vmul.f32 0.5, %v2215_v53 }
0x199e   :  { %v2237_v23 = vmul.f32 %v2235_v10, %v2234_v18 }
0x199f   :  { %v2217_v30 = vsub.f32 1.5, %v2216_v54 }
0x19a0   :  { %v2240_v33 = vadd.f32 %v2238_v3, %v2237_v23 }
0x19a1   :  { %v2218_v31 = vmul.f32 %v2563_v62, %v2217_v30 }
0x19a2   :  { %v2242_v35 = vrot.slane %v2240_v33, 7 }
0x19a3   :  { %v2222_v32 = vsel %vm2221_vm14, %v2563_v62, %v2218_v31 }
0x19a4   :  { %v2233_v25 = vmul.f32 %v2222_v32, %v2199_v12 }
0x19a6   :  { %v2236_v34 = vmul.f32 %v2235_v10, %v2233_v25 }
0x19a8   :  { %v2239_v36 = vadd.f32 %v2238_v3, %v2236_v34 }
0x19aa   :  { %v2245_v38 = vsel %vm2244_vm15, %v2239_v36, %v2242_v35 }
0x19ab   :  { %2452 = vmatmul.msk.f32.vlgmr.msra.gmra.mxu0 %vm39_vm0, %v2245_v38 }
0x1a28   :  { %v2271_v46 = vpop.f32.mrf.mxu0 }
0x1a29   :  { %v2272_v48 = vadd.f32 %v2271_v46, %v2250_v45 }
0x1a2b   :  { %2564 = vtanh.f32 %v2272_v48 }
0x1a2c   :  { %2566 = vrcp.f32 %v2613_v6 }
0x1a31   :  { %v2565_v52 = vpop.eup %2564 }
0x1a32   :  { %2453 = vmatmul.msk.f32.vlgmr.msra.gmra.mxu2 %vm39_vm0, %v2565_v52  ;;  %v2567_v56 = vpop.eup %2566 }
0x1a33   :  { %v2308_v61 = vmul.f32 16.0, %v2567_v56  ;;  %vm2312_vm3 = vweird.f32 %v2567_v56 }
0x1a35   :  { %v2309_v7 = vsub.f32 1.0, %v2308_v61 }
0x1a37   :  { %v2310_v26 = vmul.f32 %v2567_v56, %v2309_v7 }
0x1a39   :  { %v2311_v5 = vadd.f32 %v2567_v56, %v2310_v26 }
0x1a3b   :  { %v2313_v8 = vsel %vm2312_vm3, %v2567_v56, %v2311_v5 }
0x1ab5   :  { %v2300_v58 = vpop.f32.mrf.mxu2 }
0x1ab6   :  { %v2301_v2 = vadd.f32 %v2300_v58, %v2279_v55 }
0x1ab8   :  { %v2304_v4 = vsel %vm2303_vm2, %v2301_v2, 0.0 }
0x1ab9   :  { %2305 = vadd.xlane.f32.xlu2 %v2304_v4 }
0x1b2c   :  { %v2306_v1 = vpop.xlane.xlu2 %2305 }
0x1b2d   :  { %v2314_v9 = vmul.f32 %v2313_v8, %v2306_v1 }
0x1b2f   :  { %v2315_v57 = vsub.f32 %v2301_v2, %v2314_v9 }
0x1b31   :  { %v2316_v59 = vmul.f32 %v2315_v57, %v2315_v57 }
0x1b33   :  { %v2317_v11 = vsel %vm2303_vm2, %v2316_v59, 0.0 }
0x1b34   :  { %2318 = vadd.xlane.f32.xlu0 %v2317_v11 }
0x1ba7   :  { %v2319_v12 = vpop.xlane.xlu0 %2318 }
0x1ba8   :  { %v2320_v13 = vmul.f32 %v2319_v12, %v2313_v8 }
0x1baa   :  { %v2321_v49 = vadd.f32 1e-12, %v2320_v13 }
0x1bac   :  { %2568 = vrsqrt.f32 %v2321_v49  ;;  %vm2328_vm4 = vweird.f32 %v2321_v49 }
0x1bb2   :  { %v2569_v14 = vpop.eup %2568 }
0x1bb3   :  { %v2323_v63 = vmul.f32 %v2569_v14, %v2321_v49  ;;  %vm2329_vm0 = vweird.f32 %v2569_v14 }
0x1bb4   :  { %vm2330_vm5 = vmor %vm2328_vm4, %vm2329_vm0 }
0x1bb5   :  { %v2324_v15 = vmul.f32 %v2569_v14, %v2323_v63 }
0x1bb7   :  { %v2325_v16 = vmul.f32 0.5, %v2324_v15 }
0x1bb9   :  { %v2326_v50 = vsub.f32 1.5, %v2325_v16 }
0x1bbb   :  { %v2327_v17 = vmul.f32 %v2569_v14, %v2326_v50 }
0x1bbd   :  { %v2331_v29 = vsel %vm2330_vm5, %v2569_v14, %v2327_v17 }
0x1bbe   :  { %v2332_v47 = vmul.f32 %v2331_v29, %v2315_v57 }
0x1bc0   :  { %v2334_v27 = vmul.f32 %v2333_v22, %v2332_v47 }
0x1bc2   :  { %v2336_v0 = vadd.f32 %v2335_v19, %v2334_v27 }
0x1bc4   :  { %2337 = vst.msk [vmem:[#allocation2] sm:$0x3] %vm2303_vm2, %v2336_v0 }
0x1bc5   :  { %2348 = dma.vmem_to_hbm [thread:$0]  %s2344_s9, 32, %s2346_s17, [#allocation3]  }
0x1bc6   :  { %2599 = dma.done.wait [#allocation3], 32  }
0x1bc7   :  { %2600 = vsyncadd [#allocation3], 4294967264 }
0x1bc8   :  { %2353 = vsyncpa [#allocation3], 1 }

</bundles_post_ra>
